<compile_context>
chip_gen: v7x
topology: tpu7x:2x2x1
jax: 0.10.0
libtpu: 0.0.40
codegen_flags: <defaults>
</compile_context>

<pallas_src>
import jax
import jax.numpy as jnp
from jax.experimental import pallas as pl
from jax.experimental.pallas import tpu as pltpu

# ---------------- model config (scaled-down synthetic SimSiam-ViT) ----------------
B = 2            # per-view batch
IMG = 16         # image H = W
PATCH = 8        # patch size
C_IN = 3         # input channels
GRID = IMG // PATCH
NUM_PATCHES = GRID * GRID          # 4
NTOK = NUM_PATCHES + 1             # real tokens (+cls) = 5
NTOK_P = 8                         # padded tokens per sample (sublane aligned)
EMBED = 32                         # ViT embed dim == prev_dim in the head
HEADS = 4
HEAD_DIM = EMBED // HEADS
DEPTH = 2
MLP_HID = EMBED * 4
DIM = 16                           # SimSiam feature dim (PyTorch default 2048)
PRED_DIM = 8                       # predictor hidden dim (PyTorch default 512)

NVIEW = 2                          # the two augmented views
NSAMP = NVIEW * B                  # total samples processed by the single program
ROWS_ALL = NSAMP * NTOK_P          # 32 token rows in the fused kernel
CPP = C_IN * PATCH * PATCH         # flattened patch length
LN_EPS = 1e-6
BN_EPS = 1e-5

_N_BLOCK_REFS = 12
_N_HEAD_REFS = 14

_BLOCK_KEYS = ("ln1_g", "ln1_b", "qkv_w", "qkv_b", "proj_w", "proj_b",
               "ln2_g", "ln2_b", "fc1_w", "fc1_b", "fc2_w", "fc2_b")
_HEAD_KEYS = ("norm_g", "norm_b",
              "head_w1", "head_bn1_g", "head_bn1_b",
              "head_w2", "head_bn2_g", "head_bn2_b", "head_w3",
              "pred_w1", "pred_bn_g", "pred_bn_b", "pred_w2", "pred_b2")


# ------------------------------ in-kernel math helpers ------------------------------
def _mm(a, b):
    return jnp.dot(a, b, preferred_element_type=jnp.float32)


def _layernorm(x, g, b):
    mu = jnp.mean(x, axis=-1, keepdims=True)
    var = jnp.mean((x - mu) ** 2, axis=-1, keepdims=True)
    return (x - mu) * jax.lax.rsqrt(var + LN_EPS) * g + b


def _bn_per_view(x, g=None, b=None, relu=False):
    """nn.BatchNorm1d training-mode stats, computed PER VIEW over B rows.

    x: (NVIEW*B, N) with rows ordered view-major (sample s = view*B + b).
    """
    n = x.shape[-1]
    x3 = x.reshape(NVIEW, B, n)
    mu = jnp.mean(x3, axis=1, keepdims=True)
    var = jnp.mean((x3 - mu) ** 2, axis=1, keepdims=True)
    y = ((x3 - mu) * jax.lax.rsqrt(var + BN_EPS)).reshape(NVIEW * B, n)
    if g is not None:
        y = y * g + b
    if relu:
        y = jnp.maximum(y, 0.0)
    return y


def _gelu(x):
    # TODO(synk): timm ViT uses exact erf GELU; tanh approximation used here (Mosaic-safe).
    c = jnp.float32(0.7978845608028654)  # sqrt(2/pi)
    return 0.5 * x * (1.0 + jnp.tanh(c * (x + 0.044715 * x * x * x)))


def _assemble_tokens(patches, cls, pos_pad):
    """Assemble the padded (NSAMP*NTOK_P, EMBED) token block fully in registers.

    patches: (NSAMP*NUM_PATCHES, EMBED) patch embeddings (both views).
    cls:     (1, EMBED) learned cls token.
    pos_pad: (NTOK_P, EMBED) positional embedding, zero in the pad rows.
    Layout per sample: row 0 = cls, rows 1..NUM_PATCHES = patches, rows NTOK.. = pad(0).
    """
    np_all = NSAMP * NUM_PATCHES
    s = jax.lax.broadcasted_iota(jnp.int32, (NSAMP, NTOK_P, np_all), 0)
    t = jax.lax.broadcasted_iota(jnp.int32, (NSAMP, NTOK_P, np_all), 1)
    c = jax.lax.broadcasted_iota(jnp.int32, (NSAMP, NTOK_P, np_all), 2)
    take = jnp.logical_and(jnp.logical_and(t >= 1, t <= NUM_PATCHES),
                           c == s * NUM_PATCHES + (t - 1))
    scatter = jnp.where(take, 1.0, 0.0).reshape(ROWS_ALL, np_all)
    tok = _mm(scatter, patches)                                   # (ROWS_ALL, EMBED)

    tok3 = tok.reshape(NSAMP, NTOK_P, EMBED)
    tcls = jax.lax.broadcasted_iota(jnp.int32, (1, NTOK_P, 1), 1)
    tok3 = tok3 + jnp.where(tcls == 0, 1.0, 0.0) * cls[None, :, :]   # cls at token 0
    tok3 = tok3 + pos_pad[None, :, :]                                # pad rows get +0
    return tok3.reshape(ROWS_ALL, EMBED)


def _block_fwd(x, refs):
    """One pre-norm ViT block on all samples: x + Proj(Attn(LN(x))); x + MLP(LN(x))."""
    (ln1_g, ln1_b, qkv_w, qkv_b, proj_w, proj_b,
     ln2_g, ln2_b, fc1_w, fc1_b, fc2_w, fc2_b) = refs

    # ---- attention branch ----
    h = _layernorm(x, ln1_g[...], ln1_b[...])
    qkv = _mm(h, qkv_w[...]) + qkv_b[...]                     # (ROWS_ALL, 3*EMBED)
    qkv3 = qkv.reshape(NSAMP, NTOK_P, 3 * EMBED)
    scale = jnp.float32(HEAD_DIM ** -0.5)
    # mask the pad tokens (index >= NTOK) out of the softmax as keys
    kmask = jax.lax.broadcasted_iota(jnp.int32, (1, 1, NTOK_P), 2) < NTOK

    attn = jnp.zeros((ROWS_ALL, EMBED), jnp.float32)
    for hh in range(HEADS):                                    # unrolled, sample-batched
        c = hh * HEAD_DIM
        q = qkv3[:, :, c:c + HEAD_DIM]                         # (NSAMP, NTOK_P, HD)
        k = qkv3[:, :, EMBED + c:EMBED + c + HEAD_DIM]
        v = qkv3[:, :, 2 * EMBED + c:2 * EMBED + c + HEAD_DIM]
        s = jnp.einsum("bqd,bkd->bqk", q, k,
                       preferred_element_type=jnp.float32) * scale
        s = jnp.where(kmask, s, jnp.float32(-1e30))
        s = s - jnp.max(s, axis=-1, keepdims=True)
        pr = jnp.exp(s)
        pr = pr * pl.reciprocal(jnp.sum(pr, axis=-1, keepdims=True), approx=True)
        o = jnp.einsum("bqk,bkd->bqd", pr, v,
                       preferred_element_type=jnp.float32)     # (NSAMP, NTOK_P, HD)
        # fold the output projection per head (avoids concatenating heads)
        attn = attn + _mm(o.reshape(ROWS_ALL, HEAD_DIM), proj_w[c:c + HEAD_DIM, :])
    x = x + attn + proj_b[...]                                 # residual (+ proj bias)

    # ---- MLP branch ----
    h = _layernorm(x, ln2_g[...], ln2_b[...])
    h = _gelu(_mm(h, fc1_w[...]) + fc1_b[...])
    return x + _mm(h, fc2_w[...]) + fc2_b[...]                 # residual


# --------------------------------- fused Pallas kernel ---------------------------------
def _fused_kernel(*refs):
    xp_ref, patch_w, patch_b, cls_ref, pos_ref = refs[:5]
    off = 5
    block_refs = [refs[off + i * _N_BLOCK_REFS: off + (i + 1) * _N_BLOCK_REFS]
                  for i in range(DEPTH)]
    off += DEPTH * _N_BLOCK_REFS
    (norm_g, norm_b, hw1, bn1_g, bn1_b, hw2, bn2_g, bn2_b, hw3,
     pw1, pbn_g, pbn_b, pw2, pb2) = refs[off:off + _N_HEAD_REFS]
    zp_ref = refs[off + _N_HEAD_REFS]

    # ---- patch embedding (both views at once) + token assembly ----
    patches = _mm(xp_ref[...], patch_w[...]) + patch_b[...]    # (NSAMP*NUM_PATCHES, EMBED)
    x = _assemble_tokens(patches, cls_ref[...], pos_ref[...])  # (ROWS_ALL, EMBED)

    # ---- transformer blocks ----
    for brefs in block_refs:
        x = _block_fwd(x, brefs)

    # ---- final LN on the CLS token of every sample ----
    cls = x.reshape(NSAMP, NTOK_P, EMBED)[:, 0, :]             # (NSAMP, EMBED)
    cls = _layernorm(cls, norm_g[...], norm_b[...])

    # ---- projection head: Linear(no bias)/BN/ReLU x2, Linear(no bias), BN(affine=False)
    h = _bn_per_view(_mm(cls, hw1[...]), bn1_g[...], bn1_b[...], relu=True)
    h = _bn_per_view(_mm(h, hw2[...]), bn2_g[...], bn2_b[...], relu=True)
    z = _bn_per_view(_mm(h, hw3[...]))                         # (NSAMP, DIM)

    # ---- predictor: Linear(no bias)/BN/ReLU, Linear(bias) ----
    h = _bn_per_view(_mm(z, pw1[...]), pbn_g[...], pbn_b[...], relu=True)
    p = _mm(h, pw2[...]) + pb2[...]                            # (NSAMP, DIM)

    # pack z and p into one output buffer (single HBM writeback)
    zp_ref[:, 0:DIM] = z
    zp_ref[:, DIM:2 * DIM] = p


# ------------------------------------ model code ------------------------------------
def simsiam_forward(params, x1, x2):
    # Stack the two views on a leading axis; the whole forward runs in ONE pallas_call
    # with per-view BatchNorm statistics (rows grouped view-major).
    # TODO(synk): at real image sizes fold this NCHW->patch rearrangement into the kernel
    # (index_map / strided in-kernel load) instead of an XLA transpose pass.
    xv = jnp.stack([x1, x2], axis=0)                               # (NVIEW, B, C, H, W)
    xp = xv.reshape(NVIEW, B, C_IN, GRID, PATCH, GRID, PATCH)
    xp = xp.transpose(0, 1, 3, 5, 2, 4, 6).reshape(NSAMP * NUM_PATCHES, CPP)

    args = [xp, params["patch_w"], params["patch_b"], params["cls"], params["pos"]]
    for bp in params["blocks"]:
        args.extend(bp[k] for k in _BLOCK_KEYS)
    args.extend(params[k] for k in _HEAD_KEYS)

    vmem = pltpu.MemorySpace.VMEM
    zp = pl.pallas_call(
        _fused_kernel,
        in_specs=[pl.BlockSpec(memory_space=vmem)] * len(args),
        out_specs=pl.BlockSpec(memory_space=vmem),
        out_shape=jax.ShapeDtypeStruct((NSAMP, 2 * DIM), jnp.float32),
    )(*args)

    z = zp[:, :DIM].reshape(NVIEW, B, DIM)
    p = zp[:, DIM:].reshape(NVIEW, B, DIM)
    p1, p2 = p[0], p[1]
    z1, z2 = z[0], z[1]
    # .detach() -> stop_gradient
    return p1, p2, jax.lax.stop_gradient(z1), jax.lax.stop_gradient(z2)


# ------------------------------- deterministic params -------------------------------
def init_params(key):
    ks = iter(jax.random.split(key, 64))

    def nrm(shape, s=0.02):
        return s * jax.random.normal(next(ks), shape, jnp.float32)

    ones = lambda shape: jnp.ones(shape, jnp.float32)
    zeros = lambda shape: jnp.zeros(shape, jnp.float32)

    blocks = []
    for _ in range(DEPTH):
        blocks.append(dict(
            ln1_g=ones((1, EMBED)), ln1_b=zeros((1, EMBED)),
            qkv_w=nrm((EMBED, 3 * EMBED)), qkv_b=zeros((1, 3 * EMBED)),
            proj_w=nrm((EMBED, EMBED)), proj_b=zeros((1, EMBED)),
            ln2_g=ones((1, EMBED)), ln2_b=zeros((1, EMBED)),
            fc1_w=nrm((EMBED, MLP_HID)), fc1_b=zeros((1, MLP_HID)),
            fc2_w=nrm((MLP_HID, EMBED)), fc2_b=zeros((1, EMBED)),
        ))

    # positional embedding padded to NTOK_P rows (pad rows zero, never read)
    pos = jnp.concatenate(
        [nrm((NTOK, EMBED)), jnp.zeros((NTOK_P - NTOK, EMBED), jnp.float32)], axis=0)

    return dict(
        patch_w=nrm((CPP, EMBED)), patch_b=zeros((1, EMBED)),
        cls=nrm((1, EMBED)), pos=pos,
        blocks=blocks,
        norm_g=ones((1, EMBED)), norm_b=zeros((1, EMBED)),
        head_w1=nrm((EMBED, EMBED)),
        head_bn1_g=ones((1, EMBED)), head_bn1_b=zeros((1, EMBED)),
        head_w2=nrm((EMBED, EMBED)),
        head_bn2_g=ones((1, EMBED)), head_bn2_b=zeros((1, EMBED)),
        head_w3=nrm((EMBED, DIM)),
        pred_w1=nrm((DIM, PRED_DIM)),
        pred_bn_g=ones((1, PRED_DIM)), pred_bn_b=zeros((1, PRED_DIM)),
        pred_w2=nrm((PRED_DIM, DIM)), pred_b2=zeros((1, DIM)),
    )


# --------------------------------------- main ---------------------------------------
if __name__ == "__main__":
    key = jax.random.PRNGKey(0)
    pkey, k1, k2 = jax.random.split(key, 3)
    params = init_params(pkey)

    x1 = jax.random.normal(k1, (B, C_IN, IMG, IMG), jnp.float32)  # NCHW, like PyTorch
    x2 = jax.random.normal(k2, (B, C_IN, IMG, IMG), jnp.float32)

    fwd = jax.jit(simsiam_forward)
    p1, p2, z1, z2 = fwd(params, x1, x2)
    jax.block_until_ready((p1, p2, z1, z2))

    assert p1.shape == (B, DIM) and p2.shape == (B, DIM)
    assert z1.shape == (B, DIM) and z2.shape == (B, DIM)
    assert all(bool(jnp.all(jnp.isfinite(a))) for a in (p1, p2, z1, z2))
    print("KERNEL_OK")
</pallas_src>

<mosaic_0001>
module attributes {stable_mosaic.version = 11 : i64} {
  func.func @_fused_kernel(%arg0: memref<16x192xf32, #tpu.memory_space<vmem>>, %arg1: memref<192x32xf32, #tpu.memory_space<vmem>>, %arg2: memref<1x32xf32, #tpu.memory_space<vmem>>, %arg3: memref<1x32xf32, #tpu.memory_space<vmem>>, %arg4: memref<8x32xf32, #tpu.memory_space<vmem>>, %arg5: memref<1x32xf32, #tpu.memory_space<vmem>>, %arg6: memref<1x32xf32, #tpu.memory_space<vmem>>, %arg7: memref<32x96xf32, #tpu.memory_space<vmem>>, %arg8: memref<1x96xf32, #tpu.memory_space<vmem>>, %arg9: memref<32x32xf32, #tpu.memory_space<vmem>>, %arg10: memref<1x32xf32, #tpu.memory_space<vmem>>, %arg11: memref<1x32xf32, #tpu.memory_space<vmem>>, %arg12: memref<1x32xf32, #tpu.memory_space<vmem>>, %arg13: memref<32x128xf32, #tpu.memory_space<vmem>>, %arg14: memref<1x128xf32, #tpu.memory_space<vmem>>, %arg15: memref<128x32xf32, #tpu.memory_space<vmem>>, %arg16: memref<1x32xf32, #tpu.memory_space<vmem>>, %arg17: memref<1x32xf32, #tpu.memory_space<vmem>>, %arg18: memref<1x32xf32, #tpu.memory_space<vmem>>, %arg19: memref<32x96xf32, #tpu.memory_space<vmem>>, %arg20: memref<1x96xf32, #tpu.memory_space<vmem>>, %arg21: memref<32x32xf32, #tpu.memory_space<vmem>>, %arg22: memref<1x32xf32, #tpu.memory_space<vmem>>, %arg23: memref<1x32xf32, #tpu.memory_space<vmem>>, %arg24: memref<1x32xf32, #tpu.memory_space<vmem>>, %arg25: memref<32x128xf32, #tpu.memory_space<vmem>>, %arg26: memref<1x128xf32, #tpu.memory_space<vmem>>, %arg27: memref<128x32xf32, #tpu.memory_space<vmem>>, %arg28: memref<1x32xf32, #tpu.memory_space<vmem>>, %arg29: memref<1x32xf32, #tpu.memory_space<vmem>>, %arg30: memref<1x32xf32, #tpu.memory_space<vmem>>, %arg31: memref<32x32xf32, #tpu.memory_space<vmem>>, %arg32: memref<1x32xf32, #tpu.memory_space<vmem>>, %arg33: memref<1x32xf32, #tpu.memory_space<vmem>>, %arg34: memref<32x32xf32, #tpu.memory_space<vmem>>, %arg35: memref<1x32xf32, #tpu.memory_space<vmem>>, %arg36: memref<1x32xf32, #tpu.memory_space<vmem>>, %arg37: memref<32x16xf32, #tpu.memory_space<vmem>>, %arg38: memref<16x8xf32, #tpu.memory_space<vmem>>, %arg39: memref<1x8xf32, #tpu.memory_space<vmem>>, %arg40: memref<1x8xf32, #tpu.memory_space<vmem>>, %arg41: memref<8x16xf32, #tpu.memory_space<vmem>>, %arg42: memref<1x16xf32, #tpu.memory_space<vmem>>, %arg43: memref<4x32xf32, #tpu.memory_space<vmem>>) attributes {dimension_semantics = [], scalar_prefetch = 0 : i64, scratch_operands = 0 : i64, tpu.core_type = #tpu.core_type<tc>} {
    %c0 = arith.constant 0 : index
    %c0_0 = arith.constant 0 : index
    %0 = vector.load %arg0[%c0, %c0_0] : memref<16x192xf32, #tpu.memory_space<vmem>>, vector<16x192xf32>
    %c0_1 = arith.constant 0 : index
    %c0_2 = arith.constant 0 : index
    %1 = vector.load %arg1[%c0_1, %c0_2] : memref<192x32xf32, #tpu.memory_space<vmem>>, vector<192x32xf32>
    %cst = arith.constant dense<0.000000e+00> : vector<16x32xf32>
    %2 = tpu.matmul %0, %1, %cst {dimension_numbers = #tpu.dot_dimension_numbers<[1], [0], [0], [1], [0, 0, 1, 1], [], []>} : vector<16x192xf32>, vector<192x32xf32>, vector<16x32xf32> -> vector<16x32xf32>
    %c0_3 = arith.constant 0 : index
    %c0_4 = arith.constant 0 : index
    %3 = vector.load %arg2[%c0_3, %c0_4] : memref<1x32xf32, #tpu.memory_space<vmem>>, vector<1x32xf32>
    %4 = vector.broadcast %3 : vector<1x32xf32> to vector<16x32xf32>
    %5 = arith.addf %2, %4 : vector<16x32xf32>
    %c0_5 = arith.constant 0 : index
    %c0_6 = arith.constant 0 : index
    %6 = vector.load %arg3[%c0_5, %c0_6] : memref<1x32xf32, #tpu.memory_space<vmem>>, vector<1x32xf32>
    %c0_7 = arith.constant 0 : index
    %c0_8 = arith.constant 0 : index
    %7 = vector.load %arg4[%c0_7, %c0_8] : memref<8x32xf32, #tpu.memory_space<vmem>>, vector<8x32xf32>
    %8 = tpu.iota {dimensions = array<i32: 0>} : vector<4x8x16xi32>
    %9 = tpu.iota {dimensions = array<i32: 1>} : vector<4x8x16xi32>
    %10 = tpu.iota {dimensions = array<i32: 2>} : vector<4x8x16xi32>
    %c1_i32 = arith.constant 1 : i32
    %11 = vector.broadcast %c1_i32 : i32 to vector<4x8x16xi32>
    %12 = arith.cmpi sge, %9, %11 : vector<4x8x16xi32>
    %c4_i32 = arith.constant 4 : i32
    %13 = vector.broadcast %c4_i32 : i32 to vector<4x8x16xi32>
    %14 = arith.cmpi sle, %9, %13 : vector<4x8x16xi32>
    %15 = arith.andi %12, %14 : vector<4x8x16xi1>
    %c4_i32_9 = arith.constant 4 : i32
    %16 = vector.broadcast %c4_i32_9 : i32 to vector<4x8x16xi32>
    %17 = arith.muli %8, %16 : vector<4x8x16xi32>
    %c1_i32_10 = arith.constant 1 : i32
    %18 = vector.broadcast %c1_i32_10 : i32 to vector<4x8x16xi32>
    %19 = arith.subi %9, %18 : vector<4x8x16xi32>
    %20 = arith.addi %17, %19 : vector<4x8x16xi32>
    %21 = arith.cmpi eq, %10, %20 : vector<4x8x16xi32>
    %22 = arith.andi %15, %21 : vector<4x8x16xi1>
    %cst_11 = arith.constant 1.000000e+00 : f32
    %cst_12 = arith.constant 0.000000e+00 : f32
    %23 = vector.broadcast %cst_11 : f32 to vector<4x8x16xf32>
    %24 = vector.broadcast %cst_12 : f32 to vector<4x8x16xf32>
    %25 = arith.select %22, %23, %24 : vector<4x8x16xi1>, vector<4x8x16xf32>
    %26 = vector.shape_cast %25 : vector<4x8x16xf32> to vector<32x16xf32>
    %cst_13 = arith.constant dense<0.000000e+00> : vector<32x32xf32>
    %27 = tpu.matmul %26, %5, %cst_13 {dimension_numbers = #tpu.dot_dimension_numbers<[1], [0], [0], [1], [0, 0, 1, 1], [], []>} : vector<32x16xf32>, vector<16x32xf32>, vector<32x32xf32> -> vector<32x32xf32>
    %28 = vector.shape_cast %27 : vector<32x32xf32> to vector<4x8x32xf32>
    %29 = tpu.iota {dimensions = array<i32: 1>} : vector<1x8x1xi32>
    %c0_i32 = arith.constant 0 : i32
    %30 = vector.broadcast %c0_i32 : i32 to vector<1x8x1xi32>
    %31 = arith.cmpi eq, %29, %30 : vector<1x8x1xi32>
    %cst_14 = arith.constant 1.000000e+00 : f32
    %cst_15 = arith.constant 0.000000e+00 : f32
    %32 = vector.broadcast %cst_14 : f32 to vector<1x8x1xf32>
    %33 = vector.broadcast %cst_15 : f32 to vector<1x8x1xf32>
    %34 = arith.select %31, %32, %33 : vector<1x8x1xi1>, vector<1x8x1xf32>
    %35 = vector.shape_cast %6 : vector<1x32xf32> to vector<1x1x32xf32>
    %36 = vector.broadcast %34 : vector<1x8x1xf32> to vector<1x8x32xf32>
    %37 = vector.broadcast %35 : vector<1x1x32xf32> to vector<1x8x32xf32>
    %38 = arith.mulf %36, %37 : vector<1x8x32xf32>
    %39 = vector.broadcast %38 : vector<1x8x32xf32> to vector<4x8x32xf32>
    %40 = arith.addf %28, %39 : vector<4x8x32xf32>
    %41 = vector.shape_cast %7 : vector<8x32xf32> to vector<1x8x32xf32>
    %42 = vector.broadcast %41 : vector<1x8x32xf32> to vector<4x8x32xf32>
    %43 = arith.addf %40, %42 : vector<4x8x32xf32>
    %44 = vector.shape_cast %43 : vector<4x8x32xf32> to vector<32x32xf32>
    %c0_16 = arith.constant 0 : index
    %c0_17 = arith.constant 0 : index
    %45 = vector.load %arg5[%c0_16, %c0_17] : memref<1x32xf32, #tpu.memory_space<vmem>>, vector<1x32xf32>
    %c0_18 = arith.constant 0 : index
    %c0_19 = arith.constant 0 : index
    %46 = vector.load %arg6[%c0_18, %c0_19] : memref<1x32xf32, #tpu.memory_space<vmem>>, vector<1x32xf32>
    %cst_20 = arith.constant dense<0.000000e+00> : vector<32xf32>
    %47 = vector.multi_reduction <add>, %44, %cst_20 [1] : vector<32x32xf32> to vector<32xf32>
    %48 = vector.shape_cast %47 : vector<32xf32> to vector<32x1xf32>
    %cst_21 = arith.constant 3.200000e+01 : f32
    %49 = vector.broadcast %cst_21 : f32 to vector<32x1xf32>
    %50 = arith.divf %48, %49 : vector<32x1xf32>
    %51 = vector.broadcast %50 : vector<32x1xf32> to vector<32x32xf32>
    %52 = arith.subf %44, %51 : vector<32x32xf32>
    %53 = arith.mulf %52, %52 : vector<32x32xf32>
    %cst_22 = arith.constant dense<0.000000e+00> : vector<32xf32>
    %54 = vector.multi_reduction <add>, %53, %cst_22 [1] : vector<32x32xf32> to vector<32xf32>
    %55 = vector.shape_cast %54 : vector<32xf32> to vector<32x1xf32>
    %cst_23 = arith.constant 3.200000e+01 : f32
    %56 = vector.broadcast %cst_23 : f32 to vector<32x1xf32>
    %57 = arith.divf %55, %56 : vector<32x1xf32>
    %58 = vector.broadcast %50 : vector<32x1xf32> to vector<32x32xf32>
    %59 = arith.subf %44, %58 : vector<32x32xf32>
    %cst_24 = arith.constant 9.99999997E-7 : f32
    %60 = vector.broadcast %cst_24 : f32 to vector<32x1xf32>
    %61 = arith.addf %57, %60 : vector<32x1xf32>
    %62 = math.rsqrt %61 : vector<32x1xf32>
    %63 = vector.broadcast %62 : vector<32x1xf32> to vector<32x32xf32>
    %64 = arith.mulf %59, %63 : vector<32x32xf32>
    %65 = vector.broadcast %45 : vector<1x32xf32> to vector<32x32xf32>
    %66 = arith.mulf %64, %65 : vector<32x32xf32>
    %67 = vector.broadcast %46 : vector<1x32xf32> to vector<32x32xf32>
    %68 = arith.addf %66, %67 : vector<32x32xf32>
    %c0_25 = arith.constant 0 : index
    %c0_26 = arith.constant 0 : index
    %69 = vector.load %arg7[%c0_25, %c0_26] : memref<32x96xf32, #tpu.memory_space<vmem>>, vector<32x96xf32>
    %cst_27 = arith.constant dense<0.000000e+00> : vector<32x96xf32>
    %70 = tpu.matmul %68, %69, %cst_27 {dimension_numbers = #tpu.dot_dimension_numbers<[1], [0], [0], [1], [0, 0, 1, 1], [], []>} : vector<32x32xf32>, vector<32x96xf32>, vector<32x96xf32> -> vector<32x96xf32>
    %c0_28 = arith.constant 0 : index
    %c0_29 = arith.constant 0 : index
    %71 = vector.load %arg8[%c0_28, %c0_29] : memref<1x96xf32, #tpu.memory_space<vmem>>, vector<1x96xf32>
    %72 = vector.broadcast %71 : vector<1x96xf32> to vector<32x96xf32>
    %73 = arith.addf %70, %72 : vector<32x96xf32>
    %74 = vector.shape_cast %73 : vector<32x96xf32> to vector<4x8x96xf32>
    %75 = tpu.iota {dimensions = array<i32: 2>} : vector<1x1x8xi32>
    %c5_i32 = arith.constant 5 : i32
    %76 = vector.broadcast %c5_i32 : i32 to vector<1x1x8xi32>
    %77 = arith.cmpi slt, %75, %76 : vector<1x1x8xi32>
    %cst_30 = arith.constant 0.000000e+00 : f32
    %78 = vector.broadcast %cst_30 : f32 to vector<32x32xf32>
    %79 = vector.extract_strided_slice %74 {offsets = [0, 0, 0], sizes = [4, 8, 8], strides = [1, 1, 1]} : vector<4x8x96xf32> to vector<4x8x8xf32>
    %80 = vector.extract_strided_slice %74 {offsets = [0, 0, 32], sizes = [4, 8, 8], strides = [1, 1, 1]} : vector<4x8x96xf32> to vector<4x8x8xf32>
    %81 = vector.extract_strided_slice %74 {offsets = [0, 0, 64], sizes = [4, 8, 8], strides = [1, 1, 1]} : vector<4x8x96xf32> to vector<4x8x8xf32>
    "tpu.trace_start"() <{level = 10 : i32, message = "bqd,bkd->bqk"}> : () -> ()
    %cst_31 = arith.constant dense<0.000000e+00> : vector<4x8x8xf32>
    %82 = tpu.matmul %79, %80, %cst_31 {dimension_numbers = #tpu.dot_dimension_numbers<[2], [2], [1], [1], [0, 0, 0, 1, 1, 1], [0], [0]>} : vector<4x8x8xf32>, vector<4x8x8xf32>, vector<4x8x8xf32> -> vector<4x8x8xf32>
    "tpu.trace_stop"() : () -> ()
    %cst_32 = arith.constant 0.353553385 : f32
    %83 = vector.broadcast %cst_32 : f32 to vector<4x8x8xf32>
    %84 = arith.mulf %82, %83 : vector<4x8x8xf32>
    %cst_33 = arith.constant -1.000000e+30 : f32
    %85 = vector.shape_cast %77 : vector<1x1x8xi1> to vector<1x1x8xi1>
    %86 = vector.broadcast %85 : vector<1x1x8xi1> to vector<4x8x8xi1>
    %87 = vector.broadcast %cst_33 : f32 to vector<4x8x8xf32>
    %88 = arith.select %86, %84, %87 : vector<4x8x8xi1>, vector<4x8x8xf32>
    %cst_34 = arith.constant dense<0xFF800000> : vector<4x8xf32>
    %89 = vector.multi_reduction <maximumf>, %88, %cst_34 [2] : vector<4x8x8xf32> to vector<4x8xf32>
    %90 = vector.shape_cast %89 : vector<4x8xf32> to vector<4x8x1xf32>
    %91 = vector.broadcast %90 : vector<4x8x1xf32> to vector<4x8x8xf32>
    %92 = arith.subf %88, %91 : vector<4x8x8xf32>
    %93 = math.exp %92 : vector<4x8x8xf32>
    %cst_35 = arith.constant dense<0.000000e+00> : vector<4x8xf32>
    %94 = vector.multi_reduction <add>, %93, %cst_35 [2] : vector<4x8x8xf32> to vector<4x8xf32>
    %95 = vector.shape_cast %94 : vector<4x8xf32> to vector<4x8x1xf32>
    %96 = tpu.reciprocal %95 {approx = true} : vector<4x8x1xf32> -> vector<4x8x1xf32>
    %97 = vector.broadcast %96 : vector<4x8x1xf32> to vector<4x8x8xf32>
    %98 = arith.mulf %93, %97 : vector<4x8x8xf32>
    "tpu.trace_start"() <{level = 10 : i32, message = "bqk,bkd->bqd"}> : () -> ()
    %cst_36 = arith.constant dense<0.000000e+00> : vector<4x8x8xf32>
    %99 = tpu.matmul %98, %81, %cst_36 {dimension_numbers = #tpu.dot_dimension_numbers<[2], [1], [1], [2], [0, 0, 0, 1, 1, 2], [0], [0]>} : vector<4x8x8xf32>, vector<4x8x8xf32>, vector<4x8x8xf32> -> vector<4x8x8xf32>
    "tpu.trace_stop"() : () -> ()
    %100 = vector.shape_cast %99 : vector<4x8x8xf32> to vector<32x8xf32>
    %c0_37 = arith.constant 0 : index
    %c0_38 = arith.constant 0 : index
    %101 = vector.load %arg9[%c0_37, %c0_38] : memref<32x32xf32, #tpu.memory_space<vmem>>, vector<8x32xf32>
    %cst_39 = arith.constant dense<0.000000e+00> : vector<32x32xf32>
    %102 = tpu.matmul %100, %101, %cst_39 {dimension_numbers = #tpu.dot_dimension_numbers<[1], [0], [0], [1], [0, 0, 1, 1], [], []>} : vector<32x8xf32>, vector<8x32xf32>, vector<32x32xf32> -> vector<32x32xf32>
    %103 = arith.addf %78, %102 : vector<32x32xf32>
    %104 = vector.extract_strided_slice %74 {offsets = [0, 0, 8], sizes = [4, 8, 8], strides = [1, 1, 1]} : vector<4x8x96xf32> to vector<4x8x8xf32>
    %105 = vector.extract_strided_slice %74 {offsets = [0, 0, 40], sizes = [4, 8, 8], strides = [1, 1, 1]} : vector<4x8x96xf32> to vector<4x8x8xf32>
    %106 = vector.extract_strided_slice %74 {offsets = [0, 0, 72], sizes = [4, 8, 8], strides = [1, 1, 1]} : vector<4x8x96xf32> to vector<4x8x8xf32>
    "tpu.trace_start"() <{level = 10 : i32, message = "bqd,bkd->bqk"}> : () -> ()
    %cst_40 = arith.constant dense<0.000000e+00> : vector<4x8x8xf32>
    %107 = tpu.matmul %104, %105, %cst_40 {dimension_numbers = #tpu.dot_dimension_numbers<[2], [2], [1], [1], [0, 0, 0, 1, 1, 1], [0], [0]>} : vector<4x8x8xf32>, vector<4x8x8xf32>, vector<4x8x8xf32> -> vector<4x8x8xf32>
    "tpu.trace_stop"() : () -> ()
    %cst_41 = arith.constant 0.353553385 : f32
    %108 = vector.broadcast %cst_41 : f32 to vector<4x8x8xf32>
    %109 = arith.mulf %107, %108 : vector<4x8x8xf32>
    %cst_42 = arith.constant -1.000000e+30 : f32
    %110 = vector.shape_cast %77 : vector<1x1x8xi1> to vector<1x1x8xi1>
    %111 = vector.broadcast %110 : vector<1x1x8xi1> to vector<4x8x8xi1>
    %112 = vector.broadcast %cst_42 : f32 to vector<4x8x8xf32>
    %113 = arith.select %111, %109, %112 : vector<4x8x8xi1>, vector<4x8x8xf32>
    %cst_43 = arith.constant dense<0xFF800000> : vector<4x8xf32>
    %114 = vector.multi_reduction <maximumf>, %113, %cst_43 [2] : vector<4x8x8xf32> to vector<4x8xf32>
    %115 = vector.shape_cast %114 : vector<4x8xf32> to vector<4x8x1xf32>
    %116 = vector.broadcast %115 : vector<4x8x1xf32> to vector<4x8x8xf32>
    %117 = arith.subf %113, %116 : vector<4x8x8xf32>
    %118 = math.exp %117 : vector<4x8x8xf32>
    %cst_44 = arith.constant dense<0.000000e+00> : vector<4x8xf32>
    %119 = vector.multi_reduction <add>, %118, %cst_44 [2] : vector<4x8x8xf32> to vector<4x8xf32>
    %120 = vector.shape_cast %119 : vector<4x8xf32> to vector<4x8x1xf32>
    %121 = tpu.reciprocal %120 {approx = true} : vector<4x8x1xf32> -> vector<4x8x1xf32>
    %122 = vector.broadcast %121 : vector<4x8x1xf32> to vector<4x8x8xf32>
    %123 = arith.mulf %118, %122 : vector<4x8x8xf32>
    "tpu.trace_start"() <{level = 10 : i32, message = "bqk,bkd->bqd"}> : () -> ()
    %cst_45 = arith.constant dense<0.000000e+00> : vector<4x8x8xf32>
    %124 = tpu.matmul %123, %106, %cst_45 {dimension_numbers = #tpu.dot_dimension_numbers<[2], [1], [1], [2], [0, 0, 0, 1, 1, 2], [0], [0]>} : vector<4x8x8xf32>, vector<4x8x8xf32>, vector<4x8x8xf32> -> vector<4x8x8xf32>
    "tpu.trace_stop"() : () -> ()
    %125 = vector.shape_cast %124 : vector<4x8x8xf32> to vector<32x8xf32>
    %c8 = arith.constant 8 : index
    %c0_46 = arith.constant 0 : index
    %126 = vector.load %arg9[%c8, %c0_46] : memref<32x32xf32, #tpu.memory_space<vmem>>, vector<8x32xf32>
    %cst_47 = arith.constant dense<0.000000e+00> : vector<32x32xf32>
    %127 = tpu.matmul %125, %126, %cst_47 {dimension_numbers = #tpu.dot_dimension_numbers<[1], [0], [0], [1], [0, 0, 1, 1], [], []>} : vector<32x8xf32>, vector<8x32xf32>, vector<32x32xf32> -> vector<32x32xf32>
    %128 = arith.addf %103, %127 : vector<32x32xf32>
    %129 = vector.extract_strided_slice %74 {offsets = [0, 0, 16], sizes = [4, 8, 8], strides = [1, 1, 1]} : vector<4x8x96xf32> to vector<4x8x8xf32>
    %130 = vector.extract_strided_slice %74 {offsets = [0, 0, 48], sizes = [4, 8, 8], strides = [1, 1, 1]} : vector<4x8x96xf32> to vector<4x8x8xf32>
    %131 = vector.extract_strided_slice %74 {offsets = [0, 0, 80], sizes = [4, 8, 8], strides = [1, 1, 1]} : vector<4x8x96xf32> to vector<4x8x8xf32>
    "tpu.trace_start"() <{level = 10 : i32, message = "bqd,bkd->bqk"}> : () -> ()
    %cst_48 = arith.constant dense<0.000000e+00> : vector<4x8x8xf32>
    %132 = tpu.matmul %129, %130, %cst_48 {dimension_numbers = #tpu.dot_dimension_numbers<[2], [2], [1], [1], [0, 0, 0, 1, 1, 1], [0], [0]>} : vector<4x8x8xf32>, vector<4x8x8xf32>, vector<4x8x8xf32> -> vector<4x8x8xf32>
    "tpu.trace_stop"() : () -> ()
    %cst_49 = arith.constant 0.353553385 : f32
    %133 = vector.broadcast %cst_49 : f32 to vector<4x8x8xf32>
    %134 = arith.mulf %132, %133 : vector<4x8x8xf32>
    %cst_50 = arith.constant -1.000000e+30 : f32
    %135 = vector.shape_cast %77 : vector<1x1x8xi1> to vector<1x1x8xi1>
    %136 = vector.broadcast %135 : vector<1x1x8xi1> to vector<4x8x8xi1>
    %137 = vector.broadcast %cst_50 : f32 to vector<4x8x8xf32>
    %138 = arith.select %136, %134, %137 : vector<4x8x8xi1>, vector<4x8x8xf32>
    %cst_51 = arith.constant dense<0xFF800000> : vector<4x8xf32>
    %139 = vector.multi_reduction <maximumf>, %138, %cst_51 [2] : vector<4x8x8xf32> to vector<4x8xf32>
    %140 = vector.shape_cast %139 : vector<4x8xf32> to vector<4x8x1xf32>
    %141 = vector.broadcast %140 : vector<4x8x1xf32> to vector<4x8x8xf32>
    %142 = arith.subf %138, %141 : vector<4x8x8xf32>
    %143 = math.exp %142 : vector<4x8x8xf32>
    %cst_52 = arith.constant dense<0.000000e+00> : vector<4x8xf32>
    %144 = vector.multi_reduction <add>, %143, %cst_52 [2] : vector<4x8x8xf32> to vector<4x8xf32>
    %145 = vector.shape_cast %144 : vector<4x8xf32> to vector<4x8x1xf32>
    %146 = tpu.reciprocal %145 {approx = true} : vector<4x8x1xf32> -> vector<4x8x1xf32>
    %147 = vector.broadcast %146 : vector<4x8x1xf32> to vector<4x8x8xf32>
    %148 = arith.mulf %143, %147 : vector<4x8x8xf32>
    "tpu.trace_start"() <{level = 10 : i32, message = "bqk,bkd->bqd"}> : () -> ()
    %cst_53 = arith.constant dense<0.000000e+00> : vector<4x8x8xf32>
    %149 = tpu.matmul %148, %131, %cst_53 {dimension_numbers = #tpu.dot_dimension_numbers<[2], [1], [1], [2], [0, 0, 0, 1, 1, 2], [0], [0]>} : vector<4x8x8xf32>, vector<4x8x8xf32>, vector<4x8x8xf32> -> vector<4x8x8xf32>
    "tpu.trace_stop"() : () -> ()
    %150 = vector.shape_cast %149 : vector<4x8x8xf32> to vector<32x8xf32>
    %c16 = arith.constant 16 : index
    %c0_54 = arith.constant 0 : index
    %151 = vector.load %arg9[%c16, %c0_54] : memref<32x32xf32, #tpu.memory_space<vmem>>, vector<8x32xf32>
    %cst_55 = arith.constant dense<0.000000e+00> : vector<32x32xf32>
    %152 = tpu.matmul %150, %151, %cst_55 {dimension_numbers = #tpu.dot_dimension_numbers<[1], [0], [0], [1], [0, 0, 1, 1], [], []>} : vector<32x8xf32>, vector<8x32xf32>, vector<32x32xf32> -> vector<32x32xf32>
    %153 = arith.addf %128, %152 : vector<32x32xf32>
    %154 = vector.extract_strided_slice %74 {offsets = [0, 0, 24], sizes = [4, 8, 8], strides = [1, 1, 1]} : vector<4x8x96xf32> to vector<4x8x8xf32>
    %155 = vector.extract_strided_slice %74 {offsets = [0, 0, 56], sizes = [4, 8, 8], strides = [1, 1, 1]} : vector<4x8x96xf32> to vector<4x8x8xf32>
    %156 = vector.extract_strided_slice %74 {offsets = [0, 0, 88], sizes = [4, 8, 8], strides = [1, 1, 1]} : vector<4x8x96xf32> to vector<4x8x8xf32>
    "tpu.trace_start"() <{level = 10 : i32, message = "bqd,bkd->bqk"}> : () -> ()
    %cst_56 = arith.constant dense<0.000000e+00> : vector<4x8x8xf32>
    %157 = tpu.matmul %154, %155, %cst_56 {dimension_numbers = #tpu.dot_dimension_numbers<[2], [2], [1], [1], [0, 0, 0, 1, 1, 1], [0], [0]>} : vector<4x8x8xf32>, vector<4x8x8xf32>, vector<4x8x8xf32> -> vector<4x8x8xf32>
    "tpu.trace_stop"() : () -> ()
    %cst_57 = arith.constant 0.353553385 : f32
    %158 = vector.broadcast %cst_57 : f32 to vector<4x8x8xf32>
    %159 = arith.mulf %157, %158 : vector<4x8x8xf32>
    %cst_58 = arith.constant -1.000000e+30 : f32
    %160 = vector.shape_cast %77 : vector<1x1x8xi1> to vector<1x1x8xi1>
    %161 = vector.broadcast %160 : vector<1x1x8xi1> to vector<4x8x8xi1>
    %162 = vector.broadcast %cst_58 : f32 to vector<4x8x8xf32>
    %163 = arith.select %161, %159, %162 : vector<4x8x8xi1>, vector<4x8x8xf32>
    %cst_59 = arith.constant dense<0xFF800000> : vector<4x8xf32>
    %164 = vector.multi_reduction <maximumf>, %163, %cst_59 [2] : vector<4x8x8xf32> to vector<4x8xf32>
    %165 = vector.shape_cast %164 : vector<4x8xf32> to vector<4x8x1xf32>
    %166 = vector.broadcast %165 : vector<4x8x1xf32> to vector<4x8x8xf32>
    %167 = arith.subf %163, %166 : vector<4x8x8xf32>
    %168 = math.exp %167 : vector<4x8x8xf32>
    %cst_60 = arith.constant dense<0.000000e+00> : vector<4x8xf32>
    %169 = vector.multi_reduction <add>, %168, %cst_60 [2] : vector<4x8x8xf32> to vector<4x8xf32>
    %170 = vector.shape_cast %169 : vector<4x8xf32> to vector<4x8x1xf32>
    %171 = tpu.reciprocal %170 {approx = true} : vector<4x8x1xf32> -> vector<4x8x1xf32>
    %172 = vector.broadcast %171 : vector<4x8x1xf32> to vector<4x8x8xf32>
    %173 = arith.mulf %168, %172 : vector<4x8x8xf32>
    "tpu.trace_start"() <{level = 10 : i32, message = "bqk,bkd->bqd"}> : () -> ()
    %cst_61 = arith.constant dense<0.000000e+00> : vector<4x8x8xf32>
    %174 = tpu.matmul %173, %156, %cst_61 {dimension_numbers = #tpu.dot_dimension_numbers<[2], [1], [1], [2], [0, 0, 0, 1, 1, 2], [0], [0]>} : vector<4x8x8xf32>, vector<4x8x8xf32>, vector<4x8x8xf32> -> vector<4x8x8xf32>
    "tpu.trace_stop"() : () -> ()
    %175 = vector.shape_cast %174 : vector<4x8x8xf32> to vector<32x8xf32>
    %c24 = arith.constant 24 : index
    %c0_62 = arith.constant 0 : index
    %176 = vector.load %arg9[%c24, %c0_62] : memref<32x32xf32, #tpu.memory_space<vmem>>, vector<8x32xf32>
    %cst_63 = arith.constant dense<0.000000e+00> : vector<32x32xf32>
    %177 = tpu.matmul %175, %176, %cst_63 {dimension_numbers = #tpu.dot_dimension_numbers<[1], [0], [0], [1], [0, 0, 1, 1], [], []>} : vector<32x8xf32>, vector<8x32xf32>, vector<32x32xf32> -> vector<32x32xf32>
    %178 = arith.addf %153, %177 : vector<32x32xf32>
    %179 = arith.addf %44, %178 : vector<32x32xf32>
    %c0_64 = arith.constant 0 : index
    %c0_65 = arith.constant 0 : index
    %180 = vector.load %arg10[%c0_64, %c0_65] : memref<1x32xf32, #tpu.memory_space<vmem>>, vector<1x32xf32>
    %181 = vector.broadcast %180 : vector<1x32xf32> to vector<32x32xf32>
    %182 = arith.addf %179, %181 : vector<32x32xf32>
    %c0_66 = arith.constant 0 : index
    %c0_67 = arith.constant 0 : index
    %183 = vector.load %arg11[%c0_66, %c0_67] : memref<1x32xf32, #tpu.memory_space<vmem>>, vector<1x32xf32>
    %c0_68 = arith.constant 0 : index
    %c0_69 = arith.constant 0 : index
    %184 = vector.load %arg12[%c0_68, %c0_69] : memref<1x32xf32, #tpu.memory_space<vmem>>, vector<1x32xf32>
    %cst_70 = arith.constant dense<0.000000e+00> : vector<32xf32>
    %185 = vector.multi_reduction <add>, %182, %cst_70 [1] : vector<32x32xf32> to vector<32xf32>
    %186 = vector.shape_cast %185 : vector<32xf32> to vector<32x1xf32>
    %cst_71 = arith.constant 3.200000e+01 : f32
    %187 = vector.broadcast %cst_71 : f32 to vector<32x1xf32>
    %188 = arith.divf %186, %187 : vector<32x1xf32>
    %189 = vector.broadcast %188 : vector<32x1xf32> to vector<32x32xf32>
    %190 = arith.subf %182, %189 : vector<32x32xf32>
    %191 = arith.mulf %190, %190 : vector<32x32xf32>
    %cst_72 = arith.constant dense<0.000000e+00> : vector<32xf32>
    %192 = vector.multi_reduction <add>, %191, %cst_72 [1] : vector<32x32xf32> to vector<32xf32>
    %193 = vector.shape_cast %192 : vector<32xf32> to vector<32x1xf32>
    %cst_73 = arith.constant 3.200000e+01 : f32
    %194 = vector.broadcast %cst_73 : f32 to vector<32x1xf32>
    %195 = arith.divf %193, %194 : vector<32x1xf32>
    %196 = vector.broadcast %188 : vector<32x1xf32> to vector<32x32xf32>
    %197 = arith.subf %182, %196 : vector<32x32xf32>
    %cst_74 = arith.constant 9.99999997E-7 : f32
    %198 = vector.broadcast %cst_74 : f32 to vector<32x1xf32>
    %199 = arith.addf %195, %198 : vector<32x1xf32>
    %200 = math.rsqrt %199 : vector<32x1xf32>
    %201 = vector.broadcast %200 : vector<32x1xf32> to vector<32x32xf32>
    %202 = arith.mulf %197, %201 : vector<32x32xf32>
    %203 = vector.broadcast %183 : vector<1x32xf32> to vector<32x32xf32>
    %204 = arith.mulf %202, %203 : vector<32x32xf32>
    %205 = vector.broadcast %184 : vector<1x32xf32> to vector<32x32xf32>
    %206 = arith.addf %204, %205 : vector<32x32xf32>
    %c0_75 = arith.constant 0 : index
    %c0_76 = arith.constant 0 : index
    %207 = vector.load %arg13[%c0_75, %c0_76] : memref<32x128xf32, #tpu.memory_space<vmem>>, vector<32x128xf32>
    %cst_77 = arith.constant dense<0.000000e+00> : vector<32x128xf32>
    %208 = tpu.matmul %206, %207, %cst_77 {dimension_numbers = #tpu.dot_dimension_numbers<[1], [0], [0], [1], [0, 0, 1, 1], [], []>} : vector<32x32xf32>, vector<32x128xf32>, vector<32x128xf32> -> vector<32x128xf32>
    %c0_78 = arith.constant 0 : index
    %c0_79 = arith.constant 0 : index
    %209 = vector.load %arg14[%c0_78, %c0_79] : memref<1x128xf32, #tpu.memory_space<vmem>>, vector<1x128xf32>
    %210 = vector.broadcast %209 : vector<1x128xf32> to vector<32x128xf32>
    %211 = arith.addf %208, %210 : vector<32x128xf32>
    %cst_80 = arith.constant 5.000000e-01 : f32
    %212 = vector.broadcast %cst_80 : f32 to vector<32x128xf32>
    %213 = arith.mulf %212, %211 : vector<32x128xf32>
    %cst_81 = arith.constant 4.471500e-02 : f32
    %214 = vector.broadcast %cst_81 : f32 to vector<32x128xf32>
    %215 = arith.mulf %214, %211 : vector<32x128xf32>
    %216 = arith.mulf %215, %211 : vector<32x128xf32>
    %217 = arith.mulf %216, %211 : vector<32x128xf32>
    %218 = arith.addf %211, %217 : vector<32x128xf32>
    %cst_82 = arith.constant 0.797884583 : f32
    %219 = vector.broadcast %cst_82 : f32 to vector<32x128xf32>
    %220 = arith.mulf %219, %218 : vector<32x128xf32>
    %221 = math.tanh %220 : vector<32x128xf32>
    %cst_83 = arith.constant 1.000000e+00 : f32
    %222 = vector.broadcast %cst_83 : f32 to vector<32x128xf32>
    %223 = arith.addf %222, %221 : vector<32x128xf32>
    %224 = arith.mulf %213, %223 : vector<32x128xf32>
    %c0_84 = arith.constant 0 : index
    %c0_85 = arith.constant 0 : index
    %225 = vector.load %arg15[%c0_84, %c0_85] : memref<128x32xf32, #tpu.memory_space<vmem>>, vector<128x32xf32>
    %cst_86 = arith.constant dense<0.000000e+00> : vector<32x32xf32>
    %226 = tpu.matmul %224, %225, %cst_86 {dimension_numbers = #tpu.dot_dimension_numbers<[1], [0], [0], [1], [0, 0, 1, 1], [], []>} : vector<32x128xf32>, vector<128x32xf32>, vector<32x32xf32> -> vector<32x32xf32>
    %227 = arith.addf %182, %226 : vector<32x32xf32>
    %c0_87 = arith.constant 0 : index
    %c0_88 = arith.constant 0 : index
    %228 = vector.load %arg16[%c0_87, %c0_88] : memref<1x32xf32, #tpu.memory_space<vmem>>, vector<1x32xf32>
    %229 = vector.broadcast %228 : vector<1x32xf32> to vector<32x32xf32>
    %230 = arith.addf %227, %229 : vector<32x32xf32>
    %c0_89 = arith.constant 0 : index
    %c0_90 = arith.constant 0 : index
    %231 = vector.load %arg17[%c0_89, %c0_90] : memref<1x32xf32, #tpu.memory_space<vmem>>, vector<1x32xf32>
    %c0_91 = arith.constant 0 : index
    %c0_92 = arith.constant 0 : index
    %232 = vector.load %arg18[%c0_91, %c0_92] : memref<1x32xf32, #tpu.memory_space<vmem>>, vector<1x32xf32>
    %cst_93 = arith.constant dense<0.000000e+00> : vector<32xf32>
    %233 = vector.multi_reduction <add>, %230, %cst_93 [1] : vector<32x32xf32> to vector<32xf32>
    %234 = vector.shape_cast %233 : vector<32xf32> to vector<32x1xf32>
    %cst_94 = arith.constant 3.200000e+01 : f32
    %235 = vector.broadcast %cst_94 : f32 to vector<32x1xf32>
    %236 = arith.divf %234, %235 : vector<32x1xf32>
    %237 = vector.broadcast %236 : vector<32x1xf32> to vector<32x32xf32>
    %238 = arith.subf %230, %237 : vector<32x32xf32>
    %239 = arith.mulf %238, %238 : vector<32x32xf32>
    %cst_95 = arith.constant dense<0.000000e+00> : vector<32xf32>
    %240 = vector.multi_reduction <add>, %239, %cst_95 [1] : vector<32x32xf32> to vector<32xf32>
    %241 = vector.shape_cast %240 : vector<32xf32> to vector<32x1xf32>
    %cst_96 = arith.constant 3.200000e+01 : f32
    %242 = vector.broadcast %cst_96 : f32 to vector<32x1xf32>
    %243 = arith.divf %241, %242 : vector<32x1xf32>
    %244 = vector.broadcast %236 : vector<32x1xf32> to vector<32x32xf32>
    %245 = arith.subf %230, %244 : vector<32x32xf32>
    %cst_97 = arith.constant 9.99999997E-7 : f32
    %246 = vector.broadcast %cst_97 : f32 to vector<32x1xf32>
    %247 = arith.addf %243, %246 : vector<32x1xf32>
    %248 = math.rsqrt %247 : vector<32x1xf32>
    %249 = vector.broadcast %248 : vector<32x1xf32> to vector<32x32xf32>
    %250 = arith.mulf %245, %249 : vector<32x32xf32>
    %251 = vector.broadcast %231 : vector<1x32xf32> to vector<32x32xf32>
    %252 = arith.mulf %250, %251 : vector<32x32xf32>
    %253 = vector.broadcast %232 : vector<1x32xf32> to vector<32x32xf32>
    %254 = arith.addf %252, %253 : vector<32x32xf32>
    %c0_98 = arith.constant 0 : index
    %c0_99 = arith.constant 0 : index
    %255 = vector.load %arg19[%c0_98, %c0_99] : memref<32x96xf32, #tpu.memory_space<vmem>>, vector<32x96xf32>
    %cst_100 = arith.constant dense<0.000000e+00> : vector<32x96xf32>
    %256 = tpu.matmul %254, %255, %cst_100 {dimension_numbers = #tpu.dot_dimension_numbers<[1], [0], [0], [1], [0, 0, 1, 1], [], []>} : vector<32x32xf32>, vector<32x96xf32>, vector<32x96xf32> -> vector<32x96xf32>
    %c0_101 = arith.constant 0 : index
    %c0_102 = arith.constant 0 : index
    %257 = vector.load %arg20[%c0_101, %c0_102] : memref<1x96xf32, #tpu.memory_space<vmem>>, vector<1x96xf32>
    %258 = vector.broadcast %257 : vector<1x96xf32> to vector<32x96xf32>
    %259 = arith.addf %256, %258 : vector<32x96xf32>
    %260 = vector.shape_cast %259 : vector<32x96xf32> to vector<4x8x96xf32>
    %261 = tpu.iota {dimensions = array<i32: 2>} : vector<1x1x8xi32>
    %c5_i32_103 = arith.constant 5 : i32
    %262 = vector.broadcast %c5_i32_103 : i32 to vector<1x1x8xi32>
    %263 = arith.cmpi slt, %261, %262 : vector<1x1x8xi32>
    %cst_104 = arith.constant 0.000000e+00 : f32
    %264 = vector.broadcast %cst_104 : f32 to vector<32x32xf32>
    %265 = vector.extract_strided_slice %260 {offsets = [0, 0, 0], sizes = [4, 8, 8], strides = [1, 1, 1]} : vector<4x8x96xf32> to vector<4x8x8xf32>
    %266 = vector.extract_strided_slice %260 {offsets = [0, 0, 32], sizes = [4, 8, 8], strides = [1, 1, 1]} : vector<4x8x96xf32> to vector<4x8x8xf32>
    %267 = vector.extract_strided_slice %260 {offsets = [0, 0, 64], sizes = [4, 8, 8], strides = [1, 1, 1]} : vector<4x8x96xf32> to vector<4x8x8xf32>
    "tpu.trace_start"() <{level = 10 : i32, message = "bqd,bkd->bqk"}> : () -> ()
    %cst_105 = arith.constant dense<0.000000e+00> : vector<4x8x8xf32>
    %268 = tpu.matmul %265, %266, %cst_105 {dimension_numbers = #tpu.dot_dimension_numbers<[2], [2], [1], [1], [0, 0, 0, 1, 1, 1], [0], [0]>} : vector<4x8x8xf32>, vector<4x8x8xf32>, vector<4x8x8xf32> -> vector<4x8x8xf32>
    "tpu.trace_stop"() : () -> ()
    %cst_106 = arith.constant 0.353553385 : f32
    %269 = vector.broadcast %cst_106 : f32 to vector<4x8x8xf32>
    %270 = arith.mulf %268, %269 : vector<4x8x8xf32>
    %cst_107 = arith.constant -1.000000e+30 : f32
    %271 = vector.shape_cast %263 : vector<1x1x8xi1> to vector<1x1x8xi1>
    %272 = vector.broadcast %271 : vector<1x1x8xi1> to vector<4x8x8xi1>
    %273 = vector.broadcast %cst_107 : f32 to vector<4x8x8xf32>
    %274 = arith.select %272, %270, %273 : vector<4x8x8xi1>, vector<4x8x8xf32>
    %cst_108 = arith.constant dense<0xFF800000> : vector<4x8xf32>
    %275 = vector.multi_reduction <maximumf>, %274, %cst_108 [2] : vector<4x8x8xf32> to vector<4x8xf32>
    %276 = vector.shape_cast %275 : vector<4x8xf32> to vector<4x8x1xf32>
    %277 = vector.broadcast %276 : vector<4x8x1xf32> to vector<4x8x8xf32>
    %278 = arith.subf %274, %277 : vector<4x8x8xf32>
    %279 = math.exp %278 : vector<4x8x8xf32>
    %cst_109 = arith.constant dense<0.000000e+00> : vector<4x8xf32>
    %280 = vector.multi_reduction <add>, %279, %cst_109 [2] : vector<4x8x8xf32> to vector<4x8xf32>
    %281 = vector.shape_cast %280 : vector<4x8xf32> to vector<4x8x1xf32>
    %282 = tpu.reciprocal %281 {approx = true} : vector<4x8x1xf32> -> vector<4x8x1xf32>
    %283 = vector.broadcast %282 : vector<4x8x1xf32> to vector<4x8x8xf32>
    %284 = arith.mulf %279, %283 : vector<4x8x8xf32>
    "tpu.trace_start"() <{level = 10 : i32, message = "bqk,bkd->bqd"}> : () -> ()
    %cst_110 = arith.constant dense<0.000000e+00> : vector<4x8x8xf32>
    %285 = tpu.matmul %284, %267, %cst_110 {dimension_numbers = #tpu.dot_dimension_numbers<[2], [1], [1], [2], [0, 0, 0, 1, 1, 2], [0], [0]>} : vector<4x8x8xf32>, vector<4x8x8xf32>, vector<4x8x8xf32> -> vector<4x8x8xf32>
    "tpu.trace_stop"() : () -> ()
    %286 = vector.shape_cast %285 : vector<4x8x8xf32> to vector<32x8xf32>
    %c0_111 = arith.constant 0 : index
    %c0_112 = arith.constant 0 : index
    %287 = vector.load %arg21[%c0_111, %c0_112] : memref<32x32xf32, #tpu.memory_space<vmem>>, vector<8x32xf32>
    %cst_113 = arith.constant dense<0.000000e+00> : vector<32x32xf32>
    %288 = tpu.matmul %286, %287, %cst_113 {dimension_numbers = #tpu.dot_dimension_numbers<[1], [0], [0], [1], [0, 0, 1, 1], [], []>} : vector<32x8xf32>, vector<8x32xf32>, vector<32x32xf32> -> vector<32x32xf32>
    %289 = arith.addf %264, %288 : vector<32x32xf32>
    %290 = vector.extract_strided_slice %260 {offsets = [0, 0, 8], sizes = [4, 8, 8], strides = [1, 1, 1]} : vector<4x8x96xf32> to vector<4x8x8xf32>
    %291 = vector.extract_strided_slice %260 {offsets = [0, 0, 40], sizes = [4, 8, 8], strides = [1, 1, 1]} : vector<4x8x96xf32> to vector<4x8x8xf32>
    %292 = vector.extract_strided_slice %260 {offsets = [0, 0, 72], sizes = [4, 8, 8], strides = [1, 1, 1]} : vector<4x8x96xf32> to vector<4x8x8xf32>
    "tpu.trace_start"() <{level = 10 : i32, message = "bqd,bkd->bqk"}> : () -> ()
    %cst_114 = arith.constant dense<0.000000e+00> : vector<4x8x8xf32>
    %293 = tpu.matmul %290, %291, %cst_114 {dimension_numbers = #tpu.dot_dimension_numbers<[2], [2], [1], [1], [0, 0, 0, 1, 1, 1], [0], [0]>} : vector<4x8x8xf32>, vector<4x8x8xf32>, vector<4x8x8xf32> -> vector<4x8x8xf32>
    "tpu.trace_stop"() : () -> ()
    %cst_115 = arith.constant 0.353553385 : f32
    %294 = vector.broadcast %cst_115 : f32 to vector<4x8x8xf32>
    %295 = arith.mulf %293, %294 : vector<4x8x8xf32>
    %cst_116 = arith.constant -1.000000e+30 : f32
    %296 = vector.shape_cast %263 : vector<1x1x8xi1> to vector<1x1x8xi1>
    %297 = vector.broadcast %296 : vector<1x1x8xi1> to vector<4x8x8xi1>
    %298 = vector.broadcast %cst_116 : f32 to vector<4x8x8xf32>
    %299 = arith.select %297, %295, %298 : vector<4x8x8xi1>, vector<4x8x8xf32>
    %cst_117 = arith.constant dense<0xFF800000> : vector<4x8xf32>
    %300 = vector.multi_reduction <maximumf>, %299, %cst_117 [2] : vector<4x8x8xf32> to vector<4x8xf32>
    %301 = vector.shape_cast %300 : vector<4x8xf32> to vector<4x8x1xf32>
    %302 = vector.broadcast %301 : vector<4x8x1xf32> to vector<4x8x8xf32>
    %303 = arith.subf %299, %302 : vector<4x8x8xf32>
    %304 = math.exp %303 : vector<4x8x8xf32>
    %cst_118 = arith.constant dense<0.000000e+00> : vector<4x8xf32>
    %305 = vector.multi_reduction <add>, %304, %cst_118 [2] : vector<4x8x8xf32> to vector<4x8xf32>
    %306 = vector.shape_cast %305 : vector<4x8xf32> to vector<4x8x1xf32>
    %307 = tpu.reciprocal %306 {approx = true} : vector<4x8x1xf32> -> vector<4x8x1xf32>
    %308 = vector.broadcast %307 : vector<4x8x1xf32> to vector<4x8x8xf32>
    %309 = arith.mulf %304, %308 : vector<4x8x8xf32>
    "tpu.trace_start"() <{level = 10 : i32, message = "bqk,bkd->bqd"}> : () -> ()
    %cst_119 = arith.constant dense<0.000000e+00> : vector<4x8x8xf32>
    %310 = tpu.matmul %309, %292, %cst_119 {dimension_numbers = #tpu.dot_dimension_numbers<[2], [1], [1], [2], [0, 0, 0, 1, 1, 2], [0], [0]>} : vector<4x8x8xf32>, vector<4x8x8xf32>, vector<4x8x8xf32> -> vector<4x8x8xf32>
    "tpu.trace_stop"() : () -> ()
    %311 = vector.shape_cast %310 : vector<4x8x8xf32> to vector<32x8xf32>
    %c8_120 = arith.constant 8 : index
    %c0_121 = arith.constant 0 : index
    %312 = vector.load %arg21[%c8_120, %c0_121] : memref<32x32xf32, #tpu.memory_space<vmem>>, vector<8x32xf32>
    %cst_122 = arith.constant dense<0.000000e+00> : vector<32x32xf32>
    %313 = tpu.matmul %311, %312, %cst_122 {dimension_numbers = #tpu.dot_dimension_numbers<[1], [0], [0], [1], [0, 0, 1, 1], [], []>} : vector<32x8xf32>, vector<8x32xf32>, vector<32x32xf32> -> vector<32x32xf32>
    %314 = arith.addf %289, %313 : vector<32x32xf32>
    %315 = vector.extract_strided_slice %260 {offsets = [0, 0, 16], sizes = [4, 8, 8], strides = [1, 1, 1]} : vector<4x8x96xf32> to vector<4x8x8xf32>
    %316 = vector.extract_strided_slice %260 {offsets = [0, 0, 48], sizes = [4, 8, 8], strides = [1, 1, 1]} : vector<4x8x96xf32> to vector<4x8x8xf32>
    %317 = vector.extract_strided_slice %260 {offsets = [0, 0, 80], sizes = [4, 8, 8], strides = [1, 1, 1]} : vector<4x8x96xf32> to vector<4x8x8xf32>
    "tpu.trace_start"() <{level = 10 : i32, message = "bqd,bkd->bqk"}> : () -> ()
    %cst_123 = arith.constant dense<0.000000e+00> : vector<4x8x8xf32>
    %318 = tpu.matmul %315, %316, %cst_123 {dimension_numbers = #tpu.dot_dimension_numbers<[2], [2], [1], [1], [0, 0, 0, 1, 1, 1], [0], [0]>} : vector<4x8x8xf32>, vector<4x8x8xf32>, vector<4x8x8xf32> -> vector<4x8x8xf32>
    "tpu.trace_stop"() : () -> ()
    %cst_124 = arith.constant 0.353553385 : f32
    %319 = vector.broadcast %cst_124 : f32 to vector<4x8x8xf32>
    %320 = arith.mulf %318, %319 : vector<4x8x8xf32>
    %cst_125 = arith.constant -1.000000e+30 : f32
    %321 = vector.shape_cast %263 : vector<1x1x8xi1> to vector<1x1x8xi1>
    %322 = vector.broadcast %321 : vector<1x1x8xi1> to vector<4x8x8xi1>
    %323 = vector.broadcast %cst_125 : f32 to vector<4x8x8xf32>
    %324 = arith.select %322, %320, %323 : vector<4x8x8xi1>, vector<4x8x8xf32>
    %cst_126 = arith.constant dense<0xFF800000> : vector<4x8xf32>
    %325 = vector.multi_reduction <maximumf>, %324, %cst_126 [2] : vector<4x8x8xf32> to vector<4x8xf32>
    %326 = vector.shape_cast %325 : vector<4x8xf32> to vector<4x8x1xf32>
    %327 = vector.broadcast %326 : vector<4x8x1xf32> to vector<4x8x8xf32>
    %328 = arith.subf %324, %327 : vector<4x8x8xf32>
    %329 = math.exp %328 : vector<4x8x8xf32>
    %cst_127 = arith.constant dense<0.000000e+00> : vector<4x8xf32>
    %330 = vector.multi_reduction <add>, %329, %cst_127 [2] : vector<4x8x8xf32> to vector<4x8xf32>
    %331 = vector.shape_cast %330 : vector<4x8xf32> to vector<4x8x1xf32>
    %332 = tpu.reciprocal %331 {approx = true} : vector<4x8x1xf32> -> vector<4x8x1xf32>
    %333 = vector.broadcast %332 : vector<4x8x1xf32> to vector<4x8x8xf32>
    %334 = arith.mulf %329, %333 : vector<4x8x8xf32>
    "tpu.trace_start"() <{level = 10 : i32, message = "bqk,bkd->bqd"}> : () -> ()
    %cst_128 = arith.constant dense<0.000000e+00> : vector<4x8x8xf32>
    %335 = tpu.matmul %334, %317, %cst_128 {dimension_numbers = #tpu.dot_dimension_numbers<[2], [1], [1], [2], [0, 0, 0, 1, 1, 2], [0], [0]>} : vector<4x8x8xf32>, vector<4x8x8xf32>, vector<4x8x8xf32> -> vector<4x8x8xf32>
    "tpu.trace_stop"() : () -> ()
    %336 = vector.shape_cast %335 : vector<4x8x8xf32> to vector<32x8xf32>
    %c16_129 = arith.constant 16 : index
    %c0_130 = arith.constant 0 : index
    %337 = vector.load %arg21[%c16_129, %c0_130] : memref<32x32xf32, #tpu.memory_space<vmem>>, vector<8x32xf32>
    %cst_131 = arith.constant dense<0.000000e+00> : vector<32x32xf32>
    %338 = tpu.matmul %336, %337, %cst_131 {dimension_numbers = #tpu.dot_dimension_numbers<[1], [0], [0], [1], [0, 0, 1, 1], [], []>} : vector<32x8xf32>, vector<8x32xf32>, vector<32x32xf32> -> vector<32x32xf32>
    %339 = arith.addf %314, %338 : vector<32x32xf32>
    %340 = vector.extract_strided_slice %260 {offsets = [0, 0, 24], sizes = [4, 8, 8], strides = [1, 1, 1]} : vector<4x8x96xf32> to vector<4x8x8xf32>
    %341 = vector.extract_strided_slice %260 {offsets = [0, 0, 56], sizes = [4, 8, 8], strides = [1, 1, 1]} : vector<4x8x96xf32> to vector<4x8x8xf32>
    %342 = vector.extract_strided_slice %260 {offsets = [0, 0, 88], sizes = [4, 8, 8], strides = [1, 1, 1]} : vector<4x8x96xf32> to vector<4x8x8xf32>
    "tpu.trace_start"() <{level = 10 : i32, message = "bqd,bkd->bqk"}> : () -> ()
    %cst_132 = arith.constant dense<0.000000e+00> : vector<4x8x8xf32>
    %343 = tpu.matmul %340, %341, %cst_132 {dimension_numbers = #tpu.dot_dimension_numbers<[2], [2], [1], [1], [0, 0, 0, 1, 1, 1], [0], [0]>} : vector<4x8x8xf32>, vector<4x8x8xf32>, vector<4x8x8xf32> -> vector<4x8x8xf32>
    "tpu.trace_stop"() : () -> ()
    %cst_133 = arith.constant 0.353553385 : f32
    %344 = vector.broadcast %cst_133 : f32 to vector<4x8x8xf32>
    %345 = arith.mulf %343, %344 : vector<4x8x8xf32>
    %cst_134 = arith.constant -1.000000e+30 : f32
    %346 = vector.shape_cast %263 : vector<1x1x8xi1> to vector<1x1x8xi1>
    %347 = vector.broadcast %346 : vector<1x1x8xi1> to vector<4x8x8xi1>
    %348 = vector.broadcast %cst_134 : f32 to vector<4x8x8xf32>
    %349 = arith.select %347, %345, %348 : vector<4x8x8xi1>, vector<4x8x8xf32>
    %cst_135 = arith.constant dense<0xFF800000> : vector<4x8xf32>
    %350 = vector.multi_reduction <maximumf>, %349, %cst_135 [2] : vector<4x8x8xf32> to vector<4x8xf32>
    %351 = vector.shape_cast %350 : vector<4x8xf32> to vector<4x8x1xf32>
    %352 = vector.broadcast %351 : vector<4x8x1xf32> to vector<4x8x8xf32>
    %353 = arith.subf %349, %352 : vector<4x8x8xf32>
    %354 = math.exp %353 : vector<4x8x8xf32>
    %cst_136 = arith.constant dense<0.000000e+00> : vector<4x8xf32>
    %355 = vector.multi_reduction <add>, %354, %cst_136 [2] : vector<4x8x8xf32> to vector<4x8xf32>
    %356 = vector.shape_cast %355 : vector<4x8xf32> to vector<4x8x1xf32>
    %357 = tpu.reciprocal %356 {approx = true} : vector<4x8x1xf32> -> vector<4x8x1xf32>
    %358 = vector.broadcast %357 : vector<4x8x1xf32> to vector<4x8x8xf32>
    %359 = arith.mulf %354, %358 : vector<4x8x8xf32>
    "tpu.trace_start"() <{level = 10 : i32, message = "bqk,bkd->bqd"}> : () -> ()
    %cst_137 = arith.constant dense<0.000000e+00> : vector<4x8x8xf32>
    %360 = tpu.matmul %359, %342, %cst_137 {dimension_numbers = #tpu.dot_dimension_numbers<[2], [1], [1], [2], [0, 0, 0, 1, 1, 2], [0], [0]>} : vector<4x8x8xf32>, vector<4x8x8xf32>, vector<4x8x8xf32> -> vector<4x8x8xf32>
    "tpu.trace_stop"() : () -> ()
    %361 = vector.shape_cast %360 : vector<4x8x8xf32> to vector<32x8xf32>
    %c24_138 = arith.constant 24 : index
    %c0_139 = arith.constant 0 : index
    %362 = vector.load %arg21[%c24_138, %c0_139] : memref<32x32xf32, #tpu.memory_space<vmem>>, vector<8x32xf32>
    %cst_140 = arith.constant dense<0.000000e+00> : vector<32x32xf32>
    %363 = tpu.matmul %361, %362, %cst_140 {dimension_numbers = #tpu.dot_dimension_numbers<[1], [0], [0], [1], [0, 0, 1, 1], [], []>} : vector<32x8xf32>, vector<8x32xf32>, vector<32x32xf32> -> vector<32x32xf32>
    %364 = arith.addf %339, %363 : vector<32x32xf32>
    %365 = arith.addf %230, %364 : vector<32x32xf32>
    %c0_141 = arith.constant 0 : index
    %c0_142 = arith.constant 0 : index
    %366 = vector.load %arg22[%c0_141, %c0_142] : memref<1x32xf32, #tpu.memory_space<vmem>>, vector<1x32xf32>
    %367 = vector.broadcast %366 : vector<1x32xf32> to vector<32x32xf32>
    %368 = arith.addf %365, %367 : vector<32x32xf32>
    %c0_143 = arith.constant 0 : index
    %c0_144 = arith.constant 0 : index
    %369 = vector.load %arg23[%c0_143, %c0_144] : memref<1x32xf32, #tpu.memory_space<vmem>>, vector<1x32xf32>
    %c0_145 = arith.constant 0 : index
    %c0_146 = arith.constant 0 : index
    %370 = vector.load %arg24[%c0_145, %c0_146] : memref<1x32xf32, #tpu.memory_space<vmem>>, vector<1x32xf32>
    %cst_147 = arith.constant dense<0.000000e+00> : vector<32xf32>
    %371 = vector.multi_reduction <add>, %368, %cst_147 [1] : vector<32x32xf32> to vector<32xf32>
    %372 = vector.shape_cast %371 : vector<32xf32> to vector<32x1xf32>
    %cst_148 = arith.constant 3.200000e+01 : f32
    %373 = vector.broadcast %cst_148 : f32 to vector<32x1xf32>
    %374 = arith.divf %372, %373 : vector<32x1xf32>
    %375 = vector.broadcast %374 : vector<32x1xf32> to vector<32x32xf32>
    %376 = arith.subf %368, %375 : vector<32x32xf32>
    %377 = arith.mulf %376, %376 : vector<32x32xf32>
    %cst_149 = arith.constant dense<0.000000e+00> : vector<32xf32>
    %378 = vector.multi_reduction <add>, %377, %cst_149 [1] : vector<32x32xf32> to vector<32xf32>
    %379 = vector.shape_cast %378 : vector<32xf32> to vector<32x1xf32>
    %cst_150 = arith.constant 3.200000e+01 : f32
    %380 = vector.broadcast %cst_150 : f32 to vector<32x1xf32>
    %381 = arith.divf %379, %380 : vector<32x1xf32>
    %382 = vector.broadcast %374 : vector<32x1xf32> to vector<32x32xf32>
    %383 = arith.subf %368, %382 : vector<32x32xf32>
    %cst_151 = arith.constant 9.99999997E-7 : f32
    %384 = vector.broadcast %cst_151 : f32 to vector<32x1xf32>
    %385 = arith.addf %381, %384 : vector<32x1xf32>
    %386 = math.rsqrt %385 : vector<32x1xf32>
    %387 = vector.broadcast %386 : vector<32x1xf32> to vector<32x32xf32>
    %388 = arith.mulf %383, %387 : vector<32x32xf32>
    %389 = vector.broadcast %369 : vector<1x32xf32> to vector<32x32xf32>
    %390 = arith.mulf %388, %389 : vector<32x32xf32>
    %391 = vector.broadcast %370 : vector<1x32xf32> to vector<32x32xf32>
    %392 = arith.addf %390, %391 : vector<32x32xf32>
    %c0_152 = arith.constant 0 : index
    %c0_153 = arith.constant 0 : index
    %393 = vector.load %arg25[%c0_152, %c0_153] : memref<32x128xf32, #tpu.memory_space<vmem>>, vector<32x128xf32>
    %cst_154 = arith.constant dense<0.000000e+00> : vector<32x128xf32>
    %394 = tpu.matmul %392, %393, %cst_154 {dimension_numbers = #tpu.dot_dimension_numbers<[1], [0], [0], [1], [0, 0, 1, 1], [], []>} : vector<32x32xf32>, vector<32x128xf32>, vector<32x128xf32> -> vector<32x128xf32>
    %c0_155 = arith.constant 0 : index
    %c0_156 = arith.constant 0 : index
    %395 = vector.load %arg26[%c0_155, %c0_156] : memref<1x128xf32, #tpu.memory_space<vmem>>, vector<1x128xf32>
    %396 = vector.broadcast %395 : vector<1x128xf32> to vector<32x128xf32>
    %397 = arith.addf %394, %396 : vector<32x128xf32>
    %cst_157 = arith.constant 5.000000e-01 : f32
    %398 = vector.broadcast %cst_157 : f32 to vector<32x128xf32>
    %399 = arith.mulf %398, %397 : vector<32x128xf32>
    %cst_158 = arith.constant 4.471500e-02 : f32
    %400 = vector.broadcast %cst_158 : f32 to vector<32x128xf32>
    %401 = arith.mulf %400, %397 : vector<32x128xf32>
    %402 = arith.mulf %401, %397 : vector<32x128xf32>
    %403 = arith.mulf %402, %397 : vector<32x128xf32>
    %404 = arith.addf %397, %403 : vector<32x128xf32>
    %cst_159 = arith.constant 0.797884583 : f32
    %405 = vector.broadcast %cst_159 : f32 to vector<32x128xf32>
    %406 = arith.mulf %405, %404 : vector<32x128xf32>
    %407 = math.tanh %406 : vector<32x128xf32>
    %cst_160 = arith.constant 1.000000e+00 : f32
    %408 = vector.broadcast %cst_160 : f32 to vector<32x128xf32>
    %409 = arith.addf %408, %407 : vector<32x128xf32>
    %410 = arith.mulf %399, %409 : vector<32x128xf32>
    %c0_161 = arith.constant 0 : index
    %c0_162 = arith.constant 0 : index
    %411 = vector.load %arg27[%c0_161, %c0_162] : memref<128x32xf32, #tpu.memory_space<vmem>>, vector<128x32xf32>
    %cst_163 = arith.constant dense<0.000000e+00> : vector<32x32xf32>
    %412 = tpu.matmul %410, %411, %cst_163 {dimension_numbers = #tpu.dot_dimension_numbers<[1], [0], [0], [1], [0, 0, 1, 1], [], []>} : vector<32x128xf32>, vector<128x32xf32>, vector<32x32xf32> -> vector<32x32xf32>
    %413 = arith.addf %368, %412 : vector<32x32xf32>
    %c0_164 = arith.constant 0 : index
    %c0_165 = arith.constant 0 : index
    %414 = vector.load %arg28[%c0_164, %c0_165] : memref<1x32xf32, #tpu.memory_space<vmem>>, vector<1x32xf32>
    %415 = vector.broadcast %414 : vector<1x32xf32> to vector<32x32xf32>
    %416 = arith.addf %413, %415 : vector<32x32xf32>
    %417 = vector.shape_cast %416 : vector<32x32xf32> to vector<4x8x32xf32>
    %418 = vector.extract_strided_slice %417 {offsets = [0, 0, 0], sizes = [4, 1, 32], strides = [1, 1, 1]} : vector<4x8x32xf32> to vector<4x1x32xf32>
    %419 = vector.shape_cast %418 : vector<4x1x32xf32> to vector<4x32xf32>
    %c0_166 = arith.constant 0 : index
    %c0_167 = arith.constant 0 : index
    %420 = vector.load %arg29[%c0_166, %c0_167] : memref<1x32xf32, #tpu.memory_space<vmem>>, vector<1x32xf32>
    %c0_168 = arith.constant 0 : index
    %c0_169 = arith.constant 0 : index
    %421 = vector.load %arg30[%c0_168, %c0_169] : memref<1x32xf32, #tpu.memory_space<vmem>>, vector<1x32xf32>
    %cst_170 = arith.constant dense<0.000000e+00> : vector<4xf32>
    %422 = vector.multi_reduction <add>, %419, %cst_170 [1] : vector<4x32xf32> to vector<4xf32>
    %423 = vector.shape_cast %422 : vector<4xf32> to vector<4x1xf32>
    %cst_171 = arith.constant 3.200000e+01 : f32
    %424 = vector.broadcast %cst_171 : f32 to vector<4x1xf32>
    %425 = arith.divf %423, %424 : vector<4x1xf32>
    %426 = vector.broadcast %425 : vector<4x1xf32> to vector<4x32xf32>
    %427 = arith.subf %419, %426 : vector<4x32xf32>
    %428 = arith.mulf %427, %427 : vector<4x32xf32>
    %cst_172 = arith.constant dense<0.000000e+00> : vector<4xf32>
    %429 = vector.multi_reduction <add>, %428, %cst_172 [1] : vector<4x32xf32> to vector<4xf32>
    %430 = vector.shape_cast %429 : vector<4xf32> to vector<4x1xf32>
    %cst_173 = arith.constant 3.200000e+01 : f32
    %431 = vector.broadcast %cst_173 : f32 to vector<4x1xf32>
    %432 = arith.divf %430, %431 : vector<4x1xf32>
    %433 = vector.broadcast %425 : vector<4x1xf32> to vector<4x32xf32>
    %434 = arith.subf %419, %433 : vector<4x32xf32>
    %cst_174 = arith.constant 9.99999997E-7 : f32
    %435 = vector.broadcast %cst_174 : f32 to vector<4x1xf32>
    %436 = arith.addf %432, %435 : vector<4x1xf32>
    %437 = math.rsqrt %436 : vector<4x1xf32>
    %438 = vector.broadcast %437 : vector<4x1xf32> to vector<4x32xf32>
    %439 = arith.mulf %434, %438 : vector<4x32xf32>
    %440 = vector.broadcast %420 : vector<1x32xf32> to vector<4x32xf32>
    %441 = arith.mulf %439, %440 : vector<4x32xf32>
    %442 = vector.broadcast %421 : vector<1x32xf32> to vector<4x32xf32>
    %443 = arith.addf %441, %442 : vector<4x32xf32>
    %c0_175 = arith.constant 0 : index
    %c0_176 = arith.constant 0 : index
    %444 = vector.load %arg31[%c0_175, %c0_176] : memref<32x32xf32, #tpu.memory_space<vmem>>, vector<32x32xf32>
    %cst_177 = arith.constant dense<0.000000e+00> : vector<4x32xf32>
    %445 = tpu.matmul %443, %444, %cst_177 {dimension_numbers = #tpu.dot_dimension_numbers<[1], [0], [0], [1], [0, 0, 1, 1], [], []>} : vector<4x32xf32>, vector<32x32xf32>, vector<4x32xf32> -> vector<4x32xf32>
    %c0_178 = arith.constant 0 : index
    %c0_179 = arith.constant 0 : index
    %446 = vector.load %arg32[%c0_178, %c0_179] : memref<1x32xf32, #tpu.memory_space<vmem>>, vector<1x32xf32>
    %c0_180 = arith.constant 0 : index
    %c0_181 = arith.constant 0 : index
    %447 = vector.load %arg33[%c0_180, %c0_181] : memref<1x32xf32, #tpu.memory_space<vmem>>, vector<1x32xf32>
    %448 = vector.shape_cast %445 : vector<4x32xf32> to vector<2x2x32xf32>
    %cst_182 = arith.constant dense<0.000000e+00> : vector<2x32xf32>
    %449 = vector.multi_reduction <add>, %448, %cst_182 [1] : vector<2x2x32xf32> to vector<2x32xf32>
    %450 = vector.shape_cast %449 : vector<2x32xf32> to vector<2x1x32xf32>
    %cst_183 = arith.constant 2.000000e+00 : f32
    %451 = vector.broadcast %cst_183 : f32 to vector<2x1x32xf32>
    %452 = arith.divf %450, %451 : vector<2x1x32xf32>
    %453 = vector.broadcast %452 : vector<2x1x32xf32> to vector<2x2x32xf32>
    %454 = arith.subf %448, %453 : vector<2x2x32xf32>
    %455 = arith.mulf %454, %454 : vector<2x2x32xf32>
    %cst_184 = arith.constant dense<0.000000e+00> : vector<2x32xf32>
    %456 = vector.multi_reduction <add>, %455, %cst_184 [1] : vector<2x2x32xf32> to vector<2x32xf32>
    %457 = vector.shape_cast %456 : vector<2x32xf32> to vector<2x1x32xf32>
    %cst_185 = arith.constant 2.000000e+00 : f32
    %458 = vector.broadcast %cst_185 : f32 to vector<2x1x32xf32>
    %459 = arith.divf %457, %458 : vector<2x1x32xf32>
    %460 = vector.broadcast %452 : vector<2x1x32xf32> to vector<2x2x32xf32>
    %461 = arith.subf %448, %460 : vector<2x2x32xf32>
    %cst_186 = arith.constant 9.99999974E-6 : f32
    %462 = vector.broadcast %cst_186 : f32 to vector<2x1x32xf32>
    %463 = arith.addf %459, %462 : vector<2x1x32xf32>
    %464 = math.rsqrt %463 : vector<2x1x32xf32>
    %465 = vector.broadcast %464 : vector<2x1x32xf32> to vector<2x2x32xf32>
    %466 = arith.mulf %461, %465 : vector<2x2x32xf32>
    %467 = vector.shape_cast %466 : vector<2x2x32xf32> to vector<4x32xf32>
    %468 = vector.broadcast %446 : vector<1x32xf32> to vector<4x32xf32>
    %469 = arith.mulf %467, %468 : vector<4x32xf32>
    %470 = vector.broadcast %447 : vector<1x32xf32> to vector<4x32xf32>
    %471 = arith.addf %469, %470 : vector<4x32xf32>
    %cst_187 = arith.constant 0.000000e+00 : f32
    %472 = vector.broadcast %cst_187 : f32 to vector<4x32xf32>
    %473 = arith.maximumf %471, %472 : vector<4x32xf32>
    %c0_188 = arith.constant 0 : index
    %c0_189 = arith.constant 0 : index
    %474 = vector.load %arg34[%c0_188, %c0_189] : memref<32x32xf32, #tpu.memory_space<vmem>>, vector<32x32xf32>
    %cst_190 = arith.constant dense<0.000000e+00> : vector<4x32xf32>
    %475 = tpu.matmul %473, %474, %cst_190 {dimension_numbers = #tpu.dot_dimension_numbers<[1], [0], [0], [1], [0, 0, 1, 1], [], []>} : vector<4x32xf32>, vector<32x32xf32>, vector<4x32xf32> -> vector<4x32xf32>
    %c0_191 = arith.constant 0 : index
    %c0_192 = arith.constant 0 : index
    %476 = vector.load %arg35[%c0_191, %c0_192] : memref<1x32xf32, #tpu.memory_space<vmem>>, vector<1x32xf32>
    %c0_193 = arith.constant 0 : index
    %c0_194 = arith.constant 0 : index
    %477 = vector.load %arg36[%c0_193, %c0_194] : memref<1x32xf32, #tpu.memory_space<vmem>>, vector<1x32xf32>
    %478 = vector.shape_cast %475 : vector<4x32xf32> to vector<2x2x32xf32>
    %cst_195 = arith.constant dense<0.000000e+00> : vector<2x32xf32>
    %479 = vector.multi_reduction <add>, %478, %cst_195 [1] : vector<2x2x32xf32> to vector<2x32xf32>
    %480 = vector.shape_cast %479 : vector<2x32xf32> to vector<2x1x32xf32>
    %cst_196 = arith.constant 2.000000e+00 : f32
    %481 = vector.broadcast %cst_196 : f32 to vector<2x1x32xf32>
    %482 = arith.divf %480, %481 : vector<2x1x32xf32>
    %483 = vector.broadcast %482 : vector<2x1x32xf32> to vector<2x2x32xf32>
    %484 = arith.subf %478, %483 : vector<2x2x32xf32>
    %485 = arith.mulf %484, %484 : vector<2x2x32xf32>
    %cst_197 = arith.constant dense<0.000000e+00> : vector<2x32xf32>
    %486 = vector.multi_reduction <add>, %485, %cst_197 [1] : vector<2x2x32xf32> to vector<2x32xf32>
    %487 = vector.shape_cast %486 : vector<2x32xf32> to vector<2x1x32xf32>
    %cst_198 = arith.constant 2.000000e+00 : f32
    %488 = vector.broadcast %cst_198 : f32 to vector<2x1x32xf32>
    %489 = arith.divf %487, %488 : vector<2x1x32xf32>
    %490 = vector.broadcast %482 : vector<2x1x32xf32> to vector<2x2x32xf32>
    %491 = arith.subf %478, %490 : vector<2x2x32xf32>
    %cst_199 = arith.constant 9.99999974E-6 : f32
    %492 = vector.broadcast %cst_199 : f32 to vector<2x1x32xf32>
    %493 = arith.addf %489, %492 : vector<2x1x32xf32>
    %494 = math.rsqrt %493 : vector<2x1x32xf32>
    %495 = vector.broadcast %494 : vector<2x1x32xf32> to vector<2x2x32xf32>
    %496 = arith.mulf %491, %495 : vector<2x2x32xf32>
    %497 = vector.shape_cast %496 : vector<2x2x32xf32> to vector<4x32xf32>
    %498 = vector.broadcast %476 : vector<1x32xf32> to vector<4x32xf32>
    %499 = arith.mulf %497, %498 : vector<4x32xf32>
    %500 = vector.broadcast %477 : vector<1x32xf32> to vector<4x32xf32>
    %501 = arith.addf %499, %500 : vector<4x32xf32>
    %cst_200 = arith.constant 0.000000e+00 : f32
    %502 = vector.broadcast %cst_200 : f32 to vector<4x32xf32>
    %503 = arith.maximumf %501, %502 : vector<4x32xf32>
    %c0_201 = arith.constant 0 : index
    %c0_202 = arith.constant 0 : index
    %504 = vector.load %arg37[%c0_201, %c0_202] : memref<32x16xf32, #tpu.memory_space<vmem>>, vector<32x16xf32>
    %cst_203 = arith.constant dense<0.000000e+00> : vector<4x16xf32>
    %505 = tpu.matmul %503, %504, %cst_203 {dimension_numbers = #tpu.dot_dimension_numbers<[1], [0], [0], [1], [0, 0, 1, 1], [], []>} : vector<4x32xf32>, vector<32x16xf32>, vector<4x16xf32> -> vector<4x16xf32>
    %506 = vector.shape_cast %505 : vector<4x16xf32> to vector<2x2x16xf32>
    %cst_204 = arith.constant dense<0.000000e+00> : vector<2x16xf32>
    %507 = vector.multi_reduction <add>, %506, %cst_204 [1] : vector<2x2x16xf32> to vector<2x16xf32>
    %508 = vector.shape_cast %507 : vector<2x16xf32> to vector<2x1x16xf32>
    %cst_205 = arith.constant 2.000000e+00 : f32
    %509 = vector.broadcast %cst_205 : f32 to vector<2x1x16xf32>
    %510 = arith.divf %508, %509 : vector<2x1x16xf32>
    %511 = vector.broadcast %510 : vector<2x1x16xf32> to vector<2x2x16xf32>
    %512 = arith.subf %506, %511 : vector<2x2x16xf32>
    %513 = arith.mulf %512, %512 : vector<2x2x16xf32>
    %cst_206 = arith.constant dense<0.000000e+00> : vector<2x16xf32>
    %514 = vector.multi_reduction <add>, %513, %cst_206 [1] : vector<2x2x16xf32> to vector<2x16xf32>
    %515 = vector.shape_cast %514 : vector<2x16xf32> to vector<2x1x16xf32>
    %cst_207 = arith.constant 2.000000e+00 : f32
    %516 = vector.broadcast %cst_207 : f32 to vector<2x1x16xf32>
    %517 = arith.divf %515, %516 : vector<2x1x16xf32>
    %518 = vector.broadcast %510 : vector<2x1x16xf32> to vector<2x2x16xf32>
    %519 = arith.subf %506, %518 : vector<2x2x16xf32>
    %cst_208 = arith.constant 9.99999974E-6 : f32
    %520 = vector.broadcast %cst_208 : f32 to vector<2x1x16xf32>
    %521 = arith.addf %517, %520 : vector<2x1x16xf32>
    %522 = math.rsqrt %521 : vector<2x1x16xf32>
    %523 = vector.broadcast %522 : vector<2x1x16xf32> to vector<2x2x16xf32>
    %524 = arith.mulf %519, %523 : vector<2x2x16xf32>
    %525 = vector.shape_cast %524 : vector<2x2x16xf32> to vector<4x16xf32>
    %c0_209 = arith.constant 0 : index
    %c0_210 = arith.constant 0 : index
    %526 = vector.load %arg38[%c0_209, %c0_210] : memref<16x8xf32, #tpu.memory_space<vmem>>, vector<16x8xf32>
    %cst_211 = arith.constant dense<0.000000e+00> : vector<4x8xf32>
    %527 = tpu.matmul %525, %526, %cst_211 {dimension_numbers = #tpu.dot_dimension_numbers<[1], [0], [0], [1], [0, 0, 1, 1], [], []>} : vector<4x16xf32>, vector<16x8xf32>, vector<4x8xf32> -> vector<4x8xf32>
    %c0_212 = arith.constant 0 : index
    %c0_213 = arith.constant 0 : index
    %528 = vector.load %arg39[%c0_212, %c0_213] : memref<1x8xf32, #tpu.memory_space<vmem>>, vector<1x8xf32>
    %c0_214 = arith.constant 0 : index
    %c0_215 = arith.constant 0 : index
    %529 = vector.load %arg40[%c0_214, %c0_215] : memref<1x8xf32, #tpu.memory_space<vmem>>, vector<1x8xf32>
    %530 = vector.shape_cast %527 : vector<4x8xf32> to vector<2x2x8xf32>
    %cst_216 = arith.constant dense<0.000000e+00> : vector<2x8xf32>
    %531 = vector.multi_reduction <add>, %530, %cst_216 [1] : vector<2x2x8xf32> to vector<2x8xf32>
    %532 = vector.shape_cast %531 : vector<2x8xf32> to vector<2x1x8xf32>
    %cst_217 = arith.constant 2.000000e+00 : f32
    %533 = vector.broadcast %cst_217 : f32 to vector<2x1x8xf32>
    %534 = arith.divf %532, %533 : vector<2x1x8xf32>
    %535 = vector.broadcast %534 : vector<2x1x8xf32> to vector<2x2x8xf32>
    %536 = arith.subf %530, %535 : vector<2x2x8xf32>
    %537 = arith.mulf %536, %536 : vector<2x2x8xf32>
    %cst_218 = arith.constant dense<0.000000e+00> : vector<2x8xf32>
    %538 = vector.multi_reduction <add>, %537, %cst_218 [1] : vector<2x2x8xf32> to vector<2x8xf32>
    %539 = vector.shape_cast %538 : vector<2x8xf32> to vector<2x1x8xf32>
    %cst_219 = arith.constant 2.000000e+00 : f32
    %540 = vector.broadcast %cst_219 : f32 to vector<2x1x8xf32>
    %541 = arith.divf %539, %540 : vector<2x1x8xf32>
    %542 = vector.broadcast %534 : vector<2x1x8xf32> to vector<2x2x8xf32>
    %543 = arith.subf %530, %542 : vector<2x2x8xf32>
    %cst_220 = arith.constant 9.99999974E-6 : f32
    %544 = vector.broadcast %cst_220 : f32 to vector<2x1x8xf32>
    %545 = arith.addf %541, %544 : vector<2x1x8xf32>
    %546 = math.rsqrt %545 : vector<2x1x8xf32>
    %547 = vector.broadcast %546 : vector<2x1x8xf32> to vector<2x2x8xf32>
    %548 = arith.mulf %543, %547 : vector<2x2x8xf32>
    %549 = vector.shape_cast %548 : vector<2x2x8xf32> to vector<4x8xf32>
    %550 = vector.broadcast %528 : vector<1x8xf32> to vector<4x8xf32>
    %551 = arith.mulf %549, %550 : vector<4x8xf32>
    %552 = vector.broadcast %529 : vector<1x8xf32> to vector<4x8xf32>
    %553 = arith.addf %551, %552 : vector<4x8xf32>
    %cst_221 = arith.constant 0.000000e+00 : f32
    %554 = vector.broadcast %cst_221 : f32 to vector<4x8xf32>
    %555 = arith.maximumf %553, %554 : vector<4x8xf32>
    %c0_222 = arith.constant 0 : index
    %c0_223 = arith.constant 0 : index
    %556 = vector.load %arg41[%c0_222, %c0_223] : memref<8x16xf32, #tpu.memory_space<vmem>>, vector<8x16xf32>
    %cst_224 = arith.constant dense<0.000000e+00> : vector<4x16xf32>
    %557 = tpu.matmul %555, %556, %cst_224 {dimension_numbers = #tpu.dot_dimension_numbers<[1], [0], [0], [1], [0, 0, 1, 1], [], []>} : vector<4x8xf32>, vector<8x16xf32>, vector<4x16xf32> -> vector<4x16xf32>
    %c0_225 = arith.constant 0 : index
    %c0_226 = arith.constant 0 : index
    %558 = vector.load %arg42[%c0_225, %c0_226] : memref<1x16xf32, #tpu.memory_space<vmem>>, vector<1x16xf32>
    %559 = vector.broadcast %558 : vector<1x16xf32> to vector<4x16xf32>
    %560 = arith.addf %557, %559 : vector<4x16xf32>
    %c0_227 = arith.constant 0 : index
    %c0_228 = arith.constant 0 : index
    %561 = vector.load %arg43[%c0_227, %c0_228] : memref<4x32xf32, #tpu.memory_space<vmem>>, vector<4x16xf32>
    tpu.vector_store %arg43[%c0_227, %c0_228], %525 {strides = array<i32>} : memref<4x32xf32, #tpu.memory_space<vmem>>, vector<4x16xf32>,
    %c0_229 = arith.constant 0 : index
    %c16_230 = arith.constant 16 : index
    %562 = vector.load %arg43[%c0_229, %c16_230] : memref<4x32xf32, #tpu.memory_space<vmem>>, vector<4x16xf32>
    tpu.vector_store %arg43[%c0_229, %c16_230], %560 {strides = array<i32>} : memref<4x32xf32, #tpu.memory_space<vmem>>, vector<4x16xf32>,
    return
  }
}

</mosaic_0001>

<bundles_post_ra>
// kernel: simsiam_forward.1
= control target key start
LH: loop header
LB: loop body
LE: loop exit
PB: predicated region body
PF: predicated region fallthrough
CT: control target
= control target key end

     0   :  { %s10073_s6 = smov 1   ;;  %s10074_s10 = smov 2   ;;  %s11433_s0 = inlined_call_operand.smem [shape: u32[44], index: -1, kind: input, shape index: {}] }
   0x1   :  { %s10142_s5 = sld [smem:[%s11433_s0]]   ;;  %s10075_s14 = smov 3  }
   0x2   :  { %s10147_s9 = sld [smem:[%s11433_s0 + %s10073_s6]]   ;;  %s10076_s18 = smov 4  }
   0x3   :  { %s10152_s13 = sld [smem:[%s11433_s0 + %s10074_s10]]   ;;  %s10077_s22 = smov 5  }
   0x4   :  { %s10157_s17 = sld [smem:[%s11433_s0 + %s10075_s14]]   ;;  %s10078_s26 = smov 6  }
   0x5   :  { %s10162_s21 = sld [smem:[%s11433_s0 + %s10076_s18]]   ;;  %s10079_s30 = smov 7  }
   0x6   :  { %s10167_s25 = sld [smem:[%s11433_s0 + %s10077_s22]]   ;;  %s10080_s4 = smov 8  }
   0x7   :  { %s10172_s29 = sld [smem:[%s11433_s0 + %s10078_s26]]   ;;  %s10081_s10 = smov 9  }
   0x8   :  { %s10177_s3 = sld [smem:[%s11433_s0 + %s10079_s30]]   ;;  %s10082_s15 = smov 10  }
   0x9   :  { %s10182_s8 = sld [smem:[%s11433_s0 + %s10080_s4]]   ;;  %s10083_s20 = smov 11  }
   0xa   :  { %s10187_s14 = sld [smem:[%s11433_s0 + %s10081_s10]]   ;;  %s10084_s26 = smov 12  }
   0xb   :  { %s10192_s19 = sld [smem:[%s11433_s0 + %s10082_s15]]   ;;  %s10085_s1 = smov 13  }
   0xc   :  { %s10197_s24 = sld [smem:[%s11433_s0 + %s10083_s20]]   ;;  %s10086_s7 = smov 14  }
   0xd   :  { %s10202_s30 = sld [smem:[%s11433_s0 + %s10084_s26]]   ;;  %s10087_s15 = smov 15  }
   0xe   :  { %s10207_s6 = sld [smem:[%s11433_s0 + %s10085_s1]]   ;;  %s10088_s22 = smov 16  }
   0xf   :  { %s10212_s12 = sld [smem:[%s11433_s0 + %s10086_s7]]   ;;  %s10089_s28 = smov 17  }
  0x10   :  { %s10217_s20 = sld [smem:[%s11433_s0 + %s10087_s15]]   ;;  %s10090_s7 = smov 18  }
  0x11   :  { %s10222_s27 = sld [smem:[%s11433_s0 + %s10088_s22]]   ;;  %s10091_s15 = smov 19  }
  0x12   :  { %s10227_s4 = sld [smem:[%s11433_s0 + %s10089_s28]]   ;;  %s10092_s22 = smov 20  }
  0x13   :  { %11442 = sst [smem:[#allocation8_spill]] %s10202_s30  ;;  %s10093_s28 = smov 21  }
  0x14   :  { %s10237_s30 = sld [smem:[%s11433_s0 + %s10091_s15]]   ;;  %s10095_s15 = smov 23  }
  0x15   :  { %11443 = sst [smem:[#allocation9_spill]] %s10212_s12  ;;  %s10113_s1 = smov 41  }
  0x16   :  { %s10232_s12 = sld [smem:[%s11433_s0 + %s10090_s7]]   ;;  %s10094_s7 = smov 22  }
  0x17   :  { %11444 = sst [smem:[#allocation10_spill]] %s10222_s27  ;;  %s10114_s10 = smov 42  }
  0x18   :  { %11445 = sst [smem:[#allocation11_spill]] %s10227_s4  ;;  %s10115_s16 = smov 43  }
  0x19   :  { %s10242_s27 = sld [smem:[%s11433_s0 + %s10092_s22]]   ;;  %s10096_s22 = smov 24  }
  0x1a   :  { %11447 = sst [smem:[#allocation13_spill]] %s10237_s30 }
  0x1b   :  { %s10247_s4 = sld [smem:[%s11433_s0 + %s10093_s28]]   ;;  %s10097_s28 = smov 25  }
  0x1c   :  { %11446 = sst [smem:[#allocation12_spill]] %s10232_s12 }
  0x1d   :  { %s10252_s12 = sld [smem:[%s11433_s0 + %s10094_s7]]   ;;  %s10098_s7 = smov 26  }
  0x1e   :  { %s10257_s30 = sld [smem:[%s11433_s0 + %s10095_s15]]   ;;  %s10099_s15 = smov 27  }
  0x1f   :  { %11448 = sst [smem:[#allocation14_spill]] %s10242_s27 }
  0x20   :  { %s10262_s27 = sld [smem:[%s11433_s0 + %s10096_s22]]   ;;  %s10100_s22 = smov 28  }
  0x21   :  { %11449 = sst [smem:[#allocation15_spill]] %s10247_s4 }
  0x22   :  { %s10267_s4 = sld [smem:[%s11433_s0 + %s10097_s28]]   ;;  %s10101_s28 = smov 29  }
  0x23   :  { %11450 = sst [smem:[#allocation16_spill]] %s10252_s12 }
  0x24   :  { %11451 = sst [smem:[#allocation17_spill]] %s10257_s30 }
  0x25   :  { %s10272_s12 = sld [smem:[%s11433_s0 + %s10098_s7]]   ;;  %s10102_s7 = smov 30  }
  0x26   :  { %11452 = sst [smem:[#allocation18_spill]] %s10262_s27 }
  0x27   :  { %s10277_s30 = sld [smem:[%s11433_s0 + %s10099_s15]]   ;;  %s10103_s15 = smov 31  }
  0x28   :  { %11453 = sst [smem:[#allocation19_spill]] %s10267_s4 }
  0x29   :  { %s10282_s27 = sld [smem:[%s11433_s0 + %s10100_s22]]   ;;  %s10104_s22 = smov 32  }
  0x2a   :  { %s10287_s4 = sld [smem:[%s11433_s0 + %s10101_s28]]   ;;  %s10105_s28 = smov 33  }
  0x2b   :  { %11454 = sst [smem:[#allocation20_spill]] %s10272_s12 }
  0x2c   :  { %s10292_s12 = sld [smem:[%s11433_s0 + %s10102_s7]]   ;;  %s10106_s7 = smov 34  }
  0x2d   :  { %11455 = sst [smem:[#allocation21_spill]] %s10277_s30 }
  0x2e   :  { %s10297_s30 = sld [smem:[%s11433_s0 + %s10103_s15]]   ;;  %s10107_s15 = smov 35  }
  0x2f   :  { %11456 = sst [smem:[#allocation22_spill]] %s10282_s27 }
  0x30   :  { %11457 = sst [smem:[#allocation23_spill]] %s10287_s4 }
  0x31   :  { %s10302_s27 = sld [smem:[%s11433_s0 + %s10104_s22]]   ;;  %s10108_s22 = smov 36  }
  0x32   :  { %11458 = sst [smem:[#allocation24_spill]] %s10292_s12 }
  0x33   :  { %s10307_s4 = sld [smem:[%s11433_s0 + %s10105_s28]]   ;;  %s10109_s28 = smov 37  }
  0x34   :  { %11459 = sst [smem:[#allocation25_spill]] %s10297_s30 }
  0x35   :  { %s10312_s12 = sld [smem:[%s11433_s0 + %s10106_s7]]   ;;  %s10110_s7 = smov 38  }
  0x36   :  { %s10317_s30 = sld [smem:[%s11433_s0 + %s10107_s15]]   ;;  %s10111_s15 = smov 39  }
  0x37   :  { %11460 = sst [smem:[#allocation26_spill]] %s10302_s27 }
  0x38   :  { %s10322_s27 = sld [smem:[%s11433_s0 + %s10108_s22]]   ;;  %s10112_s22 = smov 40  }
  0x39   :  { %11461 = sst [smem:[#allocation27_spill]] %s10307_s4 }
  0x3a   :  { %s10327_s4 = sld [smem:[%s11433_s0 + %s10109_s28]]  }
  0x3b   :  { %11462 = sst [smem:[#allocation28_spill]] %s10312_s12 }
  0x3c   :  { %11463 = sst [smem:[#allocation29_spill]] %s10317_s30 }
  0x3d   :  { %s10332_s12 = sld [smem:[%s11433_s0 + %s10110_s7]]  }
  0x3e   :  { %11464 = sst [smem:[#allocation30_spill]] %s10322_s27 }
  0x3f   :  { %s10337_s30 = sld [smem:[%s11433_s0 + %s10111_s15]]  }
  0x40   :  { %11465 = sst [smem:[#allocation31_spill]] %s10327_s4 }
  0x41   :  { %s8565_s27 = sld [smem:[%s11433_s0 + %s10112_s22]]  }
  0x42   :  { %s10345_s4 = sld [smem:[%s11433_s0 + %s10113_s1]]  }
  0x43   :  { %11466 = sst [smem:[#allocation32_spill]] %s10332_s12 }
  0x44   :  { %s10350_s12 = sld [smem:[%s11433_s0 + %s10114_s10]]  }
  0x45   :  { %11467 = sst [smem:[#allocation33_spill]] %s10337_s30 }
  0x46   :  { %s10355_s30 = sld [smem:[%s11433_s0 + %s10115_s16]]  }
  0x47   :  { %92 = vsyncpa [#allocation3], 0 }
  0x48   :  { %93 = vsyncpa [#allocation5], 0  ;;  %s10116_s22 = smov [#allocation2]   ;;  %s10117_s26 = smov [#allocation4]  }
  0x49   :  { %s180_s23 = sshll.u32 %s10116_s22, 4  ;;  %s192_s28 = sshll.u32 %s10117_s26, 4  ;;  %s181_s23 = int_to_ptr.vmem [resolvable:$true] %s180_s23  ;;  %s193_s28 = int_to_ptr.vmem [resolvable:$true] %s192_s28 }
  0x4a   :  { %s10025_s1 = scalar_lea.hbm %s8565_s27, 16 }
  0x4b   :  { %p10026_p0 = scmp.ne.s32.totalorder %s8565_s27, %s10025_s1  ;;  %p10029_p1 = scmp.lt.u32.totalorder %s10025_s1, %s8565_s27 }
  0x4d   :  { %p10031_p2 = pnand %p10029_p1, %p10026_p0 }
  0x4f   :  { %10034 = shalt.err (!%p10031_p2)
}
  0x50   :  { %s10035_s2 = scalar_lea.vmem %s181_s23, 16  ;;  %s10039_s10 = scalar_lea.vmem %s181_s23, 32 }
  0x51   :  { %p10036_p3 = scmp.ne.s32.totalorder %s181_s23, %s10035_s2  ;;  %p10040_p4 = scmp.lt.s32.totalorder %s181_s23, %s181_s23 }
  0x52   :  { %p10041_p5 = scmp.lt.s32.totalorder %s10039_s10, %s10035_s2 }
  0x54   :  { %p10042_p6 = por %p10041_p5, %p10040_p4 }
  0x56   :  { %p10043_p7 = pnand %p10042_p6, %p10036_p3 }
  0x58   :  { %10046 = shalt.err (!%p10043_p7)
}
  0x59   :  { %183 = dma.hbm_to_vmem [thread:$0]  %s8565_s27, 16, %s181_s23, [#allocation3]  }
  0x5a   :  { %s10047_s0 = scalar_lea.hbm %s10350_s12, 16 }
  0x5b   :  { %p10048_p8 = scmp.ne.s32.totalorder %s10350_s12, %s10047_s0  ;;  %p10051_p9 = scmp.lt.u32.totalorder %s10047_s0, %s10350_s12 }
  0x5d   :  { %p10053_p10 = pnand %p10051_p9, %p10048_p8 }
  0x5f   :  { %10056 = shalt.err (!%p10053_p10)
}
  0x60   :  { %s10057_s7 = scalar_lea.vmem %s193_s28, 16  ;;  %s10061_s11 = scalar_lea.vmem %s193_s28, 32 }
  0x61   :  { %p10058_p11 = scmp.ne.s32.totalorder %s193_s28, %s10057_s7  ;;  %p10062_p12 = scmp.lt.s32.totalorder %s193_s28, %s193_s28 }
  0x62   :  { %p10063_p13 = scmp.lt.s32.totalorder %s10061_s11, %s10057_s7 }
  0x64   :  { %p10064_p0 = por %p10063_p13, %p10062_p12 }
  0x66   :  { %p10065_p1 = pnand %p10064_p0, %p10058_p11 }
  0x68   :  { %10068 = shalt.err (!%p10065_p1)
}
  0x69   :  { %195 = dma.hbm_to_vmem [thread:$0]  %s10350_s12, 16, %s193_s28, [#allocation5]  }
  0x6a   :  { %10069 = dma.done.wait [#allocation3], 16  }
  0x6b   :  { %10070 = vsyncadd [#allocation3], 4294967280 }
  0x6c   :  { %10071 = dma.done.wait [#allocation5], 16  }
  0x6d   :  { %10072 = vsyncadd [#allocation5], 4294967280  ;;  %v10118_v0 = vmov 0.0|0.0   ;;  %v206_v1 = vld [vmem:[%s10147_s9] sm:$0xff]  ;;  %v207_v2 = vld [vmem:[%s10147_s9 + $0x8] sm:$0xff]  ;;  %vm237_vm0 = vcmask 523264   ;;  %v321_v41 = vlaneseq }
  0x6e   :  { %9589 = vmatprep.subr.bf16.mxu0 %v10118_v0  ;;  %v208_v3 = vld [vmem:[%s10147_s9 + $0x10] sm:$0xff]  ;;  %v9590_v4 = vpack.c.bf16 %v207_v2, %v206_v1  ;;  %v209_v5 = vld [vmem:[%s10147_s9 + $0x18] sm:$0xff]  ;;  %v210_v7 = vld [vmem:[%s10147_s9 + $0x20] sm:$0xff]  ;;  %vm344_vm6 = vcmask 130048   ;;  %v10119_v47 = vmov 0.0   ;;  %vm461_vm14 = vcmask 261120  }
  0x6f   :  { %v9593_v6 = vpack.c.bf16 %v209_v5, %v208_v3  ;;  %v211_v8 = vld [vmem:[%s10147_s9 + $0x28] sm:$0xff]  ;;  %v212_v10 = vld [vmem:[%s10147_s9 + $0x30] sm:$0xff]  ;;  %v213_v11 = vld [vmem:[%s10147_s9 + $0x38] sm:$0xff]  ;;  %v10403_v42 = vshrl.u32 %v321_v41, 7  ;;  %v10406_v44 = vand.u32 127, %v321_v41  ;;  %vm10120_vm15 = vmmov 0  }
  0x70   :  { %9591 = vmatpush1.bf16.msra.mxu0 %v9590_v4  ;;  %v9596_v9 = vpack.c.bf16 %v211_v8, %v210_v7  ;;  %v203_v12 = vld [vmem:[%s10142_s5 + $0x8] sm:$0xff]  ;;  %v9599_v13 = vpack.c.bf16 %v213_v11, %v212_v10  ;;  %v214_v14 = vld [vmem:[%s10147_s9 + $0x40] sm:$0xff]  ;;  %v216_v17 = vld [vmem:[%s10147_s9 + $0x50] sm:$0xff]  ;;  %s10130_s12 = smov 104   ;;  %s10131_s27 = smov 40  }
  0x71   :  { %9592 = vmatprep.subr.bf16.mxu0 %v10118_v0  ;;  %8570 = vmatprep.mubr.msk.f32.mxu0 %vm237_vm0, %v203_v12  ;;  %v215_v15 = vld [vmem:[%s10147_s9 + $0x48] sm:$0xff]  ;;  %v217_v18 = vld [vmem:[%s10147_s9 + $0x58] sm:$0xff]  ;;  %v218_v20 = vld [vmem:[%s10147_s9 + $0x60] sm:$0xff]  ;;  %v8572_v43 = vadd.s32 4294967295, %v10403_v42  ;;  %vm325_vm1 = vcmp.ge.s32.totalorder %v10403_v42, 1  ;;  %vm326_vm2 = vcmp.le.s32.totalorder %v10403_v42, 4 }
  0x72   :  { %v9602_v16 = vpack.c.bf16 %v215_v15, %v214_v14  ;;  %v9605_v19 = vpack.c.bf16 %v217_v18, %v216_v17  ;;  %v219_v21 = vld [vmem:[%s10147_s9 + $0x68] sm:$0xff]  ;;  %v220_v23 = vld [vmem:[%s10147_s9 + $0x70] sm:$0xff]  ;;  %v221_v24 = vld [vmem:[%s10147_s9 + $0x78] sm:$0xff]  ;;  %vm442_vm13 = vcmp.eq.s32.totalorder %v10403_v42, 0  ;;  %s11477_s16 = sld [smem:[#allocation12_spill]]  ;;  %s11478_s15 = sld [smem:[#allocation14_spill]] }
  0x73   :  { %v9608_v22 = vpack.c.bf16 %v219_v21, %v218_v20  ;;  %v9611_v25 = vpack.c.bf16 %v221_v24, %v220_v23  ;;  %v222_v26 = vld [vmem:[%s10147_s9 + $0x80] sm:$0xff]  ;;  %v223_v27 = vld [vmem:[%s10147_s9 + $0x88] sm:$0xff]  ;;  %v224_v29 = vld [vmem:[%s10147_s9 + $0x90] sm:$0xff]  ;;  %v329_v45 = vadd.s32 4, %v8572_v43  ;;  %vm332_vm4 = vcmp.eq.s32.totalorder %v10406_v44, %v8572_v43  ;;  %s11479_s18 = sld [smem:[#allocation15_spill]]  ;;  %s11480_s22 = sld [smem:[#allocation16_spill]] }
  0x74   :  { %9594 = vmatpush1.bf16.msra.mxu0 %v9593_v6  ;;  %v9614_v28 = vpack.c.bf16 %v223_v27, %v222_v26  ;;  %v225_v30 = vld [vmem:[%s10147_s9 + $0x98] sm:$0xff]  ;;  %v226_v32 = vld [vmem:[%s10147_s9 + $0xa0] sm:$0xff]  ;;  %v227_v33 = vld [vmem:[%s10147_s9 + $0xa8] sm:$0xff]  ;;  %v330_v49 = vadd.s32 8, %v8572_v43  ;;  %v331_v51 = vadd.s32 12, %v8572_v43  ;;  %v443_v1 = vsel %vm442_vm13, 1.0, %v10119_v47 }
  0x75   :  { %9595 = vmatprep.subr.bf16.mxu0 %v10118_v0  ;;  %v9617_v31 = vpack.c.bf16 %v225_v30, %v224_v29  ;;  %v9620_v34 = vpack.c.bf16 %v227_v33, %v226_v32  ;;  %v228_v35 = vld [vmem:[%s10147_s9 + $0xb0] sm:$0xff]  ;;  %v229_v36 = vld [vmem:[%s10147_s9 + $0xb8] sm:$0xff]  ;;  %v202_v38 = vld [vmem:[%s10142_s5] sm:$0xff]  ;;  %vm333_vm7 = vcmp.eq.s32.totalorder %v10406_v44, %v329_v45  ;;  %s10122_s9 = smov 88   ;;  %s11481_s23 = sld [smem:[#allocation19_spill]] }
  0x76   :  { %v9623_v37 = vpack.c.bf16 %v229_v36, %v228_v35  ;;  %v205_v39 = vld [vmem:[%s10142_s5 + $0x18] sm:$0xff]  ;;  %v204_v40 = vld [vmem:[%s10142_s5 + $0x10] sm:$0xff]  ;;  %vm10410_vm3 = vmand %vm325_vm1, %vm326_vm2  ;;  %vm334_vm9 = vcmp.eq.s32.totalorder %v10406_v44, %v330_v49  ;;  %vm335_vm11 = vcmp.eq.s32.totalorder %v10406_v44, %v331_v51  ;;  %s10121_s5 = smov 96   ;;  %vm643_vm1 = vcmp.lt.s32.totalorder %v10406_v44, 5  ;;  %s11482_s26 = sld [smem:[#allocation21_spill]] }
  0x77   :  { %vm336_vm5 = vmand %vm10410_vm3, %vm332_vm4  ;;  %v8569_v54 = vld [vmem:[%s10152_s13] ss:$0 sm:$0xff]  ;;  %v536_v41 = vld [vmem:[%s10177_s3 + $0x8] sm:$0xff]  ;;  %s10123_s13 = smov 120   ;;  %s11483_s28 = sld [smem:[#allocation17_spill]]  ;;  %vm7670_vm2 = vcmask 1041409  }
  0x78   :  { %9597 = vmatpush1.bf16.msra.mxu0 %v9596_v9  ;;  %v340_v48 = vsel %vm336_vm5, 1.0, %v10119_v47  ;;  %vm10423_vm8 = vmand %vm10410_vm3, %vm333_vm7  ;;  %v8577_v63 = vld [vmem:[%s10157_s17] ss:$0 sm:$0xff]  ;;  %v537_v45 = vld [vmem:[%s10177_s3 + $0x10] sm:$0xff]  ;;  %s10124_s17 = smov 64   ;;  %s11484_s1 = sld [smem:[#allocation18_spill]] }
  0x79   :  { %9598 = vmatprep.subr.bf16.mxu0 %v10118_v0  ;;  %9022 = vmatprep.mubr.msk.f32.mxu1 %vm344_vm6, %v340_v48  ;;  %vm338_vm10 = vmand %vm10410_vm3, %vm334_vm9  ;;  %v341_v60 = vsel %vm10423_vm8, 1.0, %v10119_v47  ;;  %v450_v2 = vmul.f32 %v8577_v63, %v443_v1  ;;  %v320_v4 = vld [vmem:[%s10162_s21] sm:$0xff]  ;;  %v538_v46 = vld [vmem:[%s10177_s3 + $0x18] sm:$0xff]  ;;  %s10125_s21 = smov 56   ;;  %s11485_s2 = sld [smem:[#allocation20_spill]]  ;;  %vm7676_vm4 = vcmask 1043459  }
  0x7a   :  { %vm339_vm12 = vmand %vm10410_vm3, %vm335_vm11  ;;  %v342_v61 = vsel %vm338_vm10, 1.0, %v10119_v47  ;;  %v9633_v48 = vpack.c.bf16 %v538_v46, %v537_v45  ;;  %v8579_v1 = vld [vmem:[%s10172_s29] ss:$0 sm:$0xff]  ;;  %s10127_s29 = smov 112   ;;  %s11486_s10 = sld [smem:[#allocation22_spill]]  ;;  %vm7673_vm3 = vcmask 1042434  }
  0x7b   :  { %v343_v62 = vsel %vm339_vm12, 1.0, %v10119_v47  ;;  %vm7679_vm5 = vcmask 257024   ;;  %s11487_s0 = sld [smem:[#allocation25_spill]]  ;;  %s11488_s7 = sld [smem:[#allocation23_spill]]  ;;  %vm7848_vm7 = vcmask 254976   ;;  %vm8202_vm8 = vcmask 123904  }
  0x7c   :  { %9600 = vmatpush1.bf16.msra.mxu0 %v9599_v13  ;;  %s11489_s11 = sld [smem:[#allocation24_spill]]  ;;  %vm8512_vm9 = vcmask 125952   ;;  %vm8342_vm10 = vcmask 58368  }
  0x7d   :  { %9601 = vmatprep.subr.bf16.mxu0 %v10118_v0 }
  0x80   :  { %9603 = vmatpush1.bf16.msra.mxu0 %v9602_v16 }
  0x81   :  { %9604 = vmatprep.subr.bf16.mxu0 %v10118_v0 }
  0x84   :  { %9606 = vmatpush1.bf16.msra.mxu0 %v9605_v19 }
  0x85   :  { %9607 = vmatprep.subr.bf16.mxu0 %v10118_v0 }
  0x88   :  { %9609 = vmatpush1.bf16.msra.mxu0 %v9608_v22 }
  0x89   :  { %9610 = vmatprep.subr.bf16.mxu0 %v10118_v0 }
  0x8c   :  { %9612 = vmatpush1.bf16.msra.mxu0 %v9611_v25 }
  0x8d   :  { %9613 = vmatprep.subr.bf16.mxu0 %v10118_v0 }
  0x90   :  { %9615 = vmatpush1.bf16.msra.mxu0 %v9614_v28 }
  0x91   :  { %9616 = vmatprep.subr.bf16.mxu0 %v10118_v0 }
  0x94   :  { %9618 = vmatpush1.bf16.msra.mxu0 %v9617_v31 }
  0x95   :  { %9619 = vmatprep.subr.bf16.mxu0 %v10118_v0 }
  0x98   :  { %9621 = vmatpush1.bf16.msra.mxu0 %v9620_v34 }
  0x99   :  { %9622 = vmatprep.subr.bf16.mxu0 %v10118_v0 }
  0x9c   :  { %9624 = vmatpush1.bf16.msra.mxu0 %v9623_v37 }
  0x9d   :  { %9087 = vmatprep.subr.mxu0 %v10119_v47 }
  0x9f   :  { %309 = vmatmul.mubr.f32.vlgmr.msra.gmra.mrb[0].mxu0 %v202_v38 }
  0xa0   :  { %8571 = vmatprep.mubr.msk.f32.mxu0 %vm237_vm0, %v205_v39  ;;  %vm647_vm0 = vcmask 64512  }
  0xa3   :  { %314 = vmatmul.mubr.f32.gmra.mrb[2].mxu0 %v204_v40  ;;  %v535_v40 = vld [vmem:[%s10177_s3] sm:$0xff]  ;;  %s10128_s3 = smov 48  }
  0xa4   :  { %v9629_v43 = vpack.c.bf16 %v536_v41, %v535_v40  ;;  %9089 = vmatprep.mubr.msk.f32.mxu0 %vm10120_vm15, %v10119_v47 }
 0x172   :  { %v310_v52 = vpop.f32.mrb[0].mxu0 }
 0x173   :  { %v312_v53 = vpop.f32.mrb[1].mxu0  ;;  %v311_v56 = vadd.f32 %v8569_v54, %v310_v52 }
 0x176   :  { %v315_v55 = vpop.f32.mrb[2].mxu0 }
 0x177   :  { %v316_v57 = vadd.f32 %v8569_v54, %v315_v55  ;;  %v317_v58 = vpop.f32.mrb[3].mxu0 }
 0x179   :  { %v9625_v59 = vpack.c.bf16 %v316_v57, %v311_v56 }
 0x17b   :  { %9626 = vmatprep.subr.bf16.mxu1 %v9625_v59 }
 0x17c   :  { %9628 = vmatpush3.bf16.msra.mxu1 %v9625_v59 }
 0x17d   :  { %9630 = vmatprep.subr.bf16.mxu1 %v9629_v43 }
 0x17f   :  { %9023 = vmatmul.mubr.msk.f32.vlgmr.msra.gmra.mrb[0].mxu1 %vm344_vm6, %v341_v60 }
 0x180   :  { %9025 = vmatprep.mubr.msk.f32.mxu1 %vm344_vm6, %v342_v61  ;;  %9632 = vmatpush3.bf16.msra.mxu1 %v9629_v43 }
 0x181   :  { %9634 = vmatprep.subr.bf16.mxu1 %v9633_v48 }
 0x183   :  { %9026 = vmatmul.mubr.msk.f32.gmra.mrb[2].mxu1 %vm344_vm6, %v343_v62  ;;  %v8578_v62 = vld [vmem:[%s10167_s25] ss:$0 sm:$0xff]  ;;  %s10126_s25 = smov 80  }
 0x184   :  { %9636 = vmatpush3.bf16.msra.mxu1 %v9633_v48 }
 0x185   :  { %9042 = vmatprep.subr.mxu1 %v10119_v47 }
 0x252   :  { %v9024_v3 = vpop.f32.mrb[0].mxu1 }
 0x253   :  { %v423_v5 = vpop.f32.mrb[1].mxu1  ;;  %v452_v6 = vadd.f32 %v9024_v3, %v450_v2 }
 0x254   :  { %v451_v7 = vadd.f32 %v450_v2, %v423_v5 }
 0x255   :  { %v10448_v12 = vadd.f32 %v452_v6, %v320_v4 }
 0x256   :  { %v10446_v8 = vadd.f32 %v451_v7, %v320_v4  ;;  %v9027_v9 = vpop.f32.mrb[2].mxu1 }
 0x257   :  { %v454_v10 = vadd.f32 %v9027_v9, %v450_v2  ;;  %v433_v11 = vpop.f32.mrb[3].mxu1  ;;  %v465_v17 = vsel %vm461_vm14, %v10448_v12, 0.0 }
 0x258   :  { %v453_v13 = vadd.f32 %v450_v2, %v433_v11  ;;  %v462_v14 = vsel %vm461_vm14, %v10446_v8, 0.0 }
 0x259   :  { %463 = vadd.xlane.f32.xlu0 %v462_v14  ;;  %v10452_v15 = vadd.f32 %v454_v10, %v320_v4 }
 0x25a   :  { %v10454_v16 = vadd.f32 %v453_v13, %v320_v4 }
 0x25b   :  { %v471_v19 = vsel %vm461_vm14, %v10452_v15, 0.0 }
 0x25c   :  { %v468_v18 = vsel %vm461_vm14, %v10454_v16, 0.0 }
 0x25d   :  { %466 = vadd.xlane.f32.xlu0 %v465_v17  ;;  %469 = vadd.xlane.f32.xlu1 %v468_v18 }
 0x261   :  { %472 = vadd.xlane.f32.xlu1 %v471_v19 }
 0x2e6   :  { %v464_v20 = vpop.xlane.xlu0 %463 }
 0x2e7   :  { %v475_v21 = vmul.f32 0.03125, %v464_v20  ;;  %v8580_v20 = vld [vmem:[%s10182_s8] ss:$0 sm:$0xff]  ;;  %s10129_s8 = smov 72  }
 0x2e9   :  { %v479_v22 = vsub.f32 %v10446_v8, %v475_v21 }
 0x2ea   :  { %v467_v23 = vpop.xlane.xlu0 %466  ;;  %v470_v24 = vpop.xlane.xlu1 %469 }
 0x2eb   :  { %v476_v25 = vmul.f32 0.03125, %v467_v23  ;;  %v477_v26 = vmul.f32 0.03125, %v470_v24  ;;  %v483_v27 = vmul.f32 %v479_v22, %v479_v22 }
 0x2ed   :  { %v480_v28 = vsub.f32 %v10448_v12, %v476_v25  ;;  %v481_v29 = vsub.f32 %v10454_v16, %v477_v26  ;;  %v487_v30 = vsel %vm461_vm14, %v483_v27, 0.0 }
 0x2ee   :  { %488 = vadd.xlane.f32.xlu0 %v487_v30  ;;  %v473_v31 = vpop.xlane.xlu1 %472 }
 0x2ef   :  { %v478_v32 = vmul.f32 0.03125, %v473_v31  ;;  %v484_v33 = vmul.f32 %v480_v28, %v480_v28  ;;  %v485_v34 = vmul.f32 %v481_v29, %v481_v29 }
 0x2f1   :  { %v482_v35 = vsub.f32 %v10452_v15, %v478_v32  ;;  %v490_v36 = vsel %vm461_vm14, %v484_v33, 0.0  ;;  %v493_v37 = vsel %vm461_vm14, %v485_v34, 0.0 }
 0x2f2   :  { %491 = vadd.xlane.f32.xlu1 %v490_v36  ;;  %494 = vadd.xlane.f32.xlu0 %v493_v37 }
 0x2f3   :  { %v486_v38 = vmul.f32 %v482_v35, %v482_v35 }
 0x2f5   :  { %v496_v39 = vsel %vm461_vm14, %v486_v38, 0.0 }
 0x2f6   :  { %497 = vadd.xlane.f32.xlu1 %v496_v39 }
 0x37b   :  { %v489_v49 = vpop.xlane.xlu0 %488 }
 0x37c   :  { %v499_v50 = vmul.f32 0.03125, %v489_v49 }
 0x37e   :  { %v503_v51 = vadd.f32 1e-06, %v499_v50 }
 0x37f   :  { %v495_v52 = vpop.xlane.xlu0 %494  ;;  %v492_v53 = vpop.xlane.xlu1 %491 }
 0x380   :  { %9831 = vrsqrt.f32 %v503_v51  ;;  %v501_v54 = vmul.f32 0.03125, %v495_v52  ;;  %v500_v55 = vmul.f32 0.03125, %v492_v53 }
 0x382   :  { %v505_v56 = vadd.f32 1e-06, %v501_v54  ;;  %v504_v57 = vadd.f32 1e-06, %v500_v55 }
 0x383   :  { %v498_v58 = vpop.xlane.xlu1 %497 }
 0x384   :  { %9833 = vrsqrt.f32 %v505_v56  ;;  %v502_v59 = vmul.f32 0.03125, %v498_v58 }
 0x385   :  { %9835 = vrsqrt.f32 %v504_v57 }
 0x386   :  { %v506_v60 = vadd.f32 1e-06, %v502_v59 }
 0x388   :  { %9837 = vrsqrt.f32 %v506_v60 }
 0x38a   :  { %v9832_v61 = vpop.eup %9831 }
 0x38b   :  { %v511_v63 = vmul.f32 %v9832_v61, %v479_v22 }
 0x38d   :  { %v521_v2 = vmul.f32 %v8578_v62, %v511_v63 }
 0x38e   :  { %v9834_v3 = vpop.eup %9833 }
 0x38f   :  { %v9836_v4 = vpop.eup %9835  ;;  %v531_v5 = vadd.f32 %v8579_v1, %v521_v2  ;;  %v513_v6 = vmul.f32 %v9834_v3, %v481_v29 }
 0x390   :  { %v512_v7 = vmul.f32 %v9836_v4, %v480_v28 }
 0x391   :  { %9036 = vmatprep.mubr.msk.f32.mxu1 %vm461_vm14, %v531_v5  ;;  %v523_v9 = vmul.f32 %v8578_v62, %v513_v6 }
 0x392   :  { %v9838_v10 = vpop.eup %9837  ;;  %v522_v11 = vmul.f32 %v8578_v62, %v512_v7 }
 0x393   :  { %v533_v13 = vadd.f32 %v8579_v1, %v523_v9  ;;  %v514_v14 = vmul.f32 %v9838_v10, %v482_v35 }
 0x394   :  { %v532_v17 = vadd.f32 %v8579_v1, %v522_v11 }
 0x395   :  { %v524_v18 = vmul.f32 %v8578_v62, %v514_v14 }
 0x396   :  { %9037 = vmatmul.mubr.msk.f32.vlgmr.msra.gmra.mrb[4].mxu1 %vm461_vm14, %v532_v17 }
 0x397   :  { %9039 = vmatprep.mubr.msk.f32.mxu1 %vm461_vm14, %v533_v13  ;;  %v534_v19 = vadd.f32 %v8579_v1, %v524_v18 }
 0x39a   :  { %9040 = vmatmul.mubr.msk.f32.gmra.mrb[6].mxu1 %vm461_vm14, %v534_v19 }
 0x39b   :  { %9044 = vmatprep.mubr.msk.f32.mxu1 %vm10120_vm15, %v10119_v47 }
 0x469   :  { %v9038_v21 = vpop.f32.mrb[4].mxu1 }
 0x46a   :  { %v10486_v22 = vadd.f32 %v9038_v21, %v8580_v20  ;;  %v624_v23 = vpop.f32.mrb[5].mxu1 }
 0x46b   :  { %v10488_v24 = vadd.f32 %v8580_v20, %v624_v23 }
 0x46c   :  { %723 = vrot.lane.b32.xlu1 %v10486_v22, %s10121_s5 }
 0x46d   :  { %645 = vrot.lane.b32.xlu0 %v10488_v24, %s10121_s5  ;;  %v9041_v25 = vpop.f32.mrb[6].mxu1 }
 0x46e   :  { %v634_v26 = vpop.f32.mrb[7].mxu1  ;;  %v10500_v28 = vadd.f32 %v9041_v25, %v8580_v20 }
 0x46f   :  { %v10494_v27 = vadd.f32 %v8580_v20, %v634_v26 }
 0x471   :  { %1392 = vrot.lane.b32.xlu0 %v10486_v22, %s10122_s9  ;;  %800 = vrot.lane.b32.xlu1 %v10494_v27, %s10121_s5 }
 0x475   :  { %1548 = vrot.lane.b32.xlu0 %v10500_v28, %s10122_s9  ;;  %877 = vrot.lane.b32.xlu1 %v10500_v28, %s10121_s5 }
 0x479   :  { %1390 = vrot.lane.b32.xlu1 %v10486_v22, %s10123_s13 }
 0x47d   :  { %1546 = vrot.lane.b32.xlu1 %v10500_v28, %s10123_s13 }
 0x4de   :  { %v724_v29 = vpop.permute.xlu1 %723 }
 0x4df   :  { %v646_v30 = vpop.permute.xlu0 %645 }
 0x4e0   :  { %9043 = vmatpush3.xpose.msk.msra.mxu1 %vm647_vm0, %v646_v30 }
 0x4e1   :  { %9047 = vmatprep.subr.mxu1 %v10119_v47 }
 0x4e3   :  { %v1393_v31 = vpop.permute.xlu0 %1392  ;;  %9045 = vmatmul.mubr.msk.f32.vlgmr.msra.gmra.mrb[8].mxu1 %vm647_vm0, %v10488_v24  ;;  %v801_v32 = vpop.permute.xlu1 %800 }
 0x4e4   :  { %9048 = vmatpush3.xpose.msk.msra.mxu1 %vm647_vm0, %v724_v29  ;;  %9088 = vmatpush3.xpose.msk.msra.mxu0 %vm647_vm0, %v1393_v31 }
 0x4e5   :  { %9049 = vmatprep.mubr.msk.f32.mxu1 %vm10120_vm15, %v10119_v47  ;;  %9052 = vmatprep.subr.mxu1 %v10119_v47 }
 0x4e6   :  { %9097 = vmatprep.subr.mxu0 %v10119_v47 }
 0x4e7   :  { %9050 = vmatmul.mubr.msk.f32.vlgmr.msra.gmra.mrb[10].mxu1 %vm647_vm0, %v10486_v22  ;;  %v878_v33 = vpop.permute.xlu1 %877  ;;  %v1549_v35 = vpop.permute.xlu0 %1548 }
 0x4e8   :  { %9053 = vmatpush3.xpose.msk.msra.mxu1 %vm647_vm0, %v801_v32  ;;  %9054 = vmatprep.mubr.msk.f32.mxu1 %vm10120_vm15, %v10119_v47 }
 0x4e9   :  { %9057 = vmatprep.subr.mxu1 %v10119_v47 }
 0x4eb   :  { %9055 = vmatmul.mubr.msk.f32.vlgmr.msra.gmra.mrb[12].mxu1 %vm647_vm0, %v10494_v27  ;;  %v1391_v34 = vpop.permute.xlu1 %1390 }
 0x4ec   :  { %9058 = vmatpush3.xpose.msk.msra.mxu1 %vm647_vm0, %v878_v33  ;;  %9090 = vmatmul.mubr.msk.f32.vlgmr.msra.gmra.mrb[4].mxu0 %vm647_vm0, %v1391_v34 }
 0x4ed   :  { %9098 = vmatpush3.xpose.msk.msra.mxu0 %vm647_vm0, %v1549_v35  ;;  %9059 = vmatprep.mubr.msk.f32.mxu1 %vm10120_vm15, %v10119_v47 }
 0x4ee   :  { %9099 = vmatprep.mubr.msk.f32.mxu0 %vm10120_vm15, %v10119_v47  ;;  %9062 = vmatprep.subr.mxu1 %v10119_v47 }
 0x4ef   :  { %9060 = vmatmul.mubr.msk.f32.vlgmr.msra.gmra.mrb[14].mxu1 %vm647_vm0, %v10500_v28  ;;  %v1547_v36 = vpop.permute.xlu1 %1546  ;;  %9107 = vmatprep.subr.mxu0 %v10119_v47 }
 0x4f0   :  { %9100 = vmatmul.mubr.msk.f32.vlgmr.msra.gmra.mrb[6].mxu0 %vm647_vm0, %v1547_v36  ;;  %9064 = vmatprep.mubr.msk.f32.mxu1 %vm10120_vm15, %v10119_v47 }
 0x4f1   :  { %9109 = vmatprep.mubr.msk.f32.mxu0 %vm10120_vm15, %v10119_v47 }
 0x5b6   :  { %v718_v37 = vpop.f32.mrb[8].mxu1 }
 0x5b7   :  { %v953_v38 = vmul.f32 0.35355338, %v718_v37  ;;  %v9046_v39 = vpop.f32.mrb[9].mxu1 }
 0x5b9   :  { %v959_v40 = vsel %vm643_vm1, %v953_v38, -1e+30 }
 0x5ba   :  { %v795_v41 = vpop.f32.mrb[10].mxu1  ;;  %v963_v43 = vsel %vm647_vm0, %v959_v40, -inf }
 0x5bb   :  { %v954_v45 = vmul.f32 0.35355338, %v795_v41  ;;  %964 = vmax.xlane.f32.xlu0 %v963_v43  ;;  %v9051_v46 = vpop.f32.mrb[11].mxu1 }
 0x5bd   :  { %v960_v48 = vsel %vm643_vm1, %v954_v45, -1e+30 }
 0x5be   :  { %v872_v49 = vpop.f32.mrb[12].mxu1  ;;  %v966_v50 = vsel %vm647_vm0, %v960_v48, -inf }
 0x5bf   :  { %v955_v51 = vmul.f32 0.35355338, %v872_v49  ;;  %967 = vmax.xlane.f32.xlu1 %v966_v50  ;;  %v9056_v52 = vpop.f32.mrb[13].mxu1  ;;  %v1464_v53 = vpop.f32.mrb[4].mxu0 }
 0x5c0   :  { %v9091_v54 = vpop.f32.mrb[5].mxu0  ;;  %v1625_v25 = vmul.f32 0.35355338, %v1464_v53 }
 0x5c1   :  { %v961_v55 = vsel %vm643_vm1, %v955_v51, -1e+30 }
 0x5c2   :  { %v949_v56 = vpop.f32.mrb[14].mxu1  ;;  %v969_v57 = vsel %vm647_vm0, %v961_v55, -inf  ;;  %v1629_v29 = vsel %vm643_vm1, %v1625_v25, -1e+30 }
 0x5c3   :  { %v956_v58 = vmul.f32 0.35355338, %v949_v56  ;;  %970 = vmax.xlane.f32.xlu0 %v969_v57  ;;  %v9061_v59 = vpop.f32.mrb[15].mxu1  ;;  %v1620_v60 = vpop.f32.mrb[6].mxu0  ;;  %v1635_v30 = vsel %vm647_vm0, %v1629_v29, -inf }
 0x5c4   :  { %v9101_v61 = vpop.f32.mrb[7].mxu0  ;;  %v1627_v32 = vmul.f32 0.35355338, %v1620_v60 }
 0x5c5   :  { %v962_v62 = vsel %vm643_vm1, %v956_v58, -1e+30 }
 0x5c6   :  { %v972_v63 = vsel %vm647_vm0, %v962_v62, -inf  ;;  %v10582_v33 = vsel %vm643_vm1, %v1627_v32, -1e+30 }
 0x5c7   :  { %973 = vmax.xlane.f32.xlu0 %v972_v63  ;;  %v1641_v34 = vsel %vm647_vm0, %v10582_v33, -inf }
 0x648   :  { %v965_v1 = vpop.xlane.xlu0 %964 }
 0x649   :  { %v975_v2 = vsub.f32 %v959_v40, %v965_v1 }
 0x64b   :  { %v979_v3 = vmul.f32 1.442695, %v975_v2 }
 0x64c   :  { %v968_v4 = vpop.xlane.xlu1 %967 }
 0x64d   :  { %9839 = vpow2.f32 %v979_v3  ;;  %v976_v5 = vsub.f32 %v960_v48, %v968_v4 }
 0x64f   :  { %v981_v6 = vmul.f32 1.442695, %v976_v5 }
 0x650   :  { %v971_v7 = vpop.xlane.xlu0 %970 }
 0x651   :  { %9841 = vpow2.f32 %v981_v6  ;;  %v977_v9 = vsub.f32 %v961_v55, %v971_v7 }
 0x653   :  { %v983_v10 = vmul.f32 1.442695, %v977_v9 }
 0x654   :  { %v974_v20 = vpop.xlane.xlu0 %973 }
 0x655   :  { %9843 = vpow2.f32 %v983_v10  ;;  %v978_v21 = vsub.f32 %v962_v62, %v974_v20 }
 0x657   :  { %v9840_v11 = vpop.eup %9839  ;;  %v985_v23 = vmul.f32 1.442695, %v978_v21 }
 0x658   :  { %v987_v13 = vsel %vm647_vm0, %v9840_v11, 0.0 }
 0x659   :  { %988 = vadd.xlane.f32.xlu0 %v987_v13  ;;  %9845 = vpow2.f32 %v985_v23 }
 0x65b   :  { %v9842_v14 = vpop.eup %9841 }
 0x65c   :  { %v990_v17 = vsel %vm647_vm0, %v9842_v14, 0.0 }
 0x65d   :  { %991 = vadd.xlane.f32.xlu1 %v990_v17 }
 0x65f   :  { %v9844_v18 = vpop.eup %9843 }
 0x660   :  { %v993_v19 = vsel %vm647_vm0, %v9844_v18, 0.0 }
 0x661   :  { %994 = vadd.xlane.f32.xlu0 %v993_v19 }
 0x663   :  { %v9846_v26 = vpop.eup %9845 }
 0x664   :  { %v996_v31 = vsel %vm647_vm0, %v9846_v26, 0.0 }
 0x66e   :  { %1083 = vrot.lane.b32.xlu1 %v10486_v22, %s10124_s17 }
 0x672   :  { %1159 = vrot.lane.b32.xlu1 %v10494_v27, %s10124_s17 }
 0x676   :  { %1235 = vrot.lane.b32.xlu1 %v10500_v28, %s10124_s17 }
 0x677   :  { %1007 = vrot.lane.b32.xlu0 %v10488_v24, %s10124_s17 }
 0x67a   :  { %1312 = vrot.lane.b32.xlu1 %v10488_v24, %s10123_s13 }
 0x67b   :  { %1314 = vrot.lane.b32.xlu0 %v10488_v24, %s10122_s9 }
 0x67f   :  { %1470 = vrot.lane.b32.xlu0 %v10494_v27, %s10122_s9 }
 0x69e   :  { %1636 = vmax.xlane.f32.xlu0 %v1635_v30  ;;  %997 = vadd.xlane.f32.xlu1 %v996_v31 }
 0x6af   :  { %1468 = vrot.lane.b32.xlu1 %v10494_v27, %s10123_s13 }
 0x6d3   :  { %1642 = vmax.xlane.f32.xlu1 %v1641_v34 }
 0x6e4   :  { %1904 = vrot.lane.b32.xlu1 %v10500_v28, %s10125_s21 }
 0x6e6   :  { %v989_v35 = vpop.xlane.xlu0 %988 }
 0x6e7   :  { %9847 = vrcp.f32 %v989_v35 }
 0x6e8   :  { %2177 = vrot.lane.b32.xlu1 %v10488_v24, %s10126_s25 }
 0x6ea   :  { %v992_v36 = vpop.xlane.xlu1 %991 }
 0x6eb   :  { %9849 = vrcp.f32 %v992_v36 }
 0x6ec   :  { %2175 = vrot.lane.b32.xlu1 %v10488_v24, %s10127_s29 }
 0x6ee   :  { %v995_v37 = vpop.xlane.xlu0 %994  ;;  %v1084_v38 = vpop.permute.xlu1 %1083 }
 0x6ef   :  { %9851 = vrcp.f32 %v995_v37 }
 0x6f0   :  { %2253 = vrot.lane.b32.xlu1 %v10486_v22, %s10127_s29 }
 0x6f1   :  { %v9848_v39 = vpop.eup %9847 }
 0x6f2   :  { %v1008_v40 = vpop.permute.xlu0 %1007  ;;  %v1003_v41 = vmul.f32 %v9848_v39, %v9840_v11  ;;  %v1160_v45 = vpop.permute.xlu1 %1159 }
 0x6f3   :  { %9063 = vmatpush3.msra.mxu1 %v1008_v40 }
 0x6f4   :  { %9065 = vmatmul.mubr.msk.f32.vlgmr.msra.gmra.mrb[16].mxu1 %vm647_vm0, %v1003_v41  ;;  %9067 = vmatprep.subr.mxu1 %v10119_v47 }
 0x6f5   :  { %v9850_v43 = vpop.eup %9849  ;;  %2331 = vrot.lane.b32.xlu1 %v10494_v27, %s10127_s29  ;;  %9068 = vmatpush3.msra.mxu1 %v1084_v38 }
 0x6f6   :  { %9069 = vmatprep.mubr.msk.f32.mxu1 %vm10120_vm15, %v10119_v47  ;;  %9072 = vmatprep.subr.mxu1 %v10119_v47  ;;  %v1004_v46 = vmul.f32 %v9850_v43, %v9842_v14  ;;  %v1236_v50 = vpop.permute.xlu1 %1235  ;;  %v1315_v51 = vpop.permute.xlu0 %1314 }
 0x6f8   :  { %9070 = vmatmul.mubr.msk.f32.vlgmr.msra.gmra.mrb[18].mxu1 %vm647_vm0, %v1004_v46 }
 0x6f9   :  { %v9852_v48 = vpop.eup %9851  ;;  %2409 = vrot.lane.b32.xlu1 %v10500_v28, %s10127_s29  ;;  %9073 = vmatpush3.msra.mxu1 %v1160_v45 }
 0x6fa   :  { %9074 = vmatprep.mubr.msk.f32.mxu1 %vm10120_vm15, %v10119_v47  ;;  %9077 = vmatprep.subr.mxu1 %v10119_v47  ;;  %v1005_v49 = vmul.f32 %v9852_v48, %v9844_v18  ;;  %v1471_v52 = vpop.permute.xlu0 %1470  ;;  %v1313_v53 = vpop.permute.xlu1 %1312 }
 0x6fc   :  { %9075 = vmatmul.mubr.msk.f32.vlgmr.msra.gmra.mrb[20].mxu1 %vm647_vm0, %v1005_v49 }
 0x6fd   :  { %9078 = vmatpush3.msra.mxu1 %v1236_v50  ;;  %9079 = vmatprep.mubr.msk.f32.mxu1 %vm10120_vm15, %v10119_v47 }
 0x6fe   :  { %9082 = vmatprep.subr.mxu1 %v10119_v47 }
 0x72b   :  { %v1637_v54 = vpop.xlane.xlu0 %1636  ;;  %v998_v55 = vpop.xlane.xlu1 %997 }
 0x72c   :  { %v1645_v56 = vsub.f32 %v1629_v29, %v1637_v54  ;;  %9853 = vrcp.f32 %v998_v55 }
 0x72e   :  { %v1650_v57 = vmul.f32 1.442695, %v1645_v56 }
 0x72f   :  { %v1469_v62 = vpop.permute.xlu1 %1468 }
 0x730   :  { %9855 = vpow2.f32 %v1650_v57 }
 0x736   :  { %v9854_v58 = vpop.eup %9853 }
 0x737   :  { %v1006_v59 = vmul.f32 %v9854_v58, %v9846_v26 }
 0x739   :  { %9080 = vmatmul.mubr.msk.f32.vlgmr.msra.gmra.mrb[22].mxu1 %vm647_vm0, %v1006_v59 }
 0x73a   :  { %v9856_v60 = vpop.eup %9855  ;;  %9083 = vmatpush3.xpose.msk.msra.mxu1 %vm647_vm0, %v1315_v51  ;;  %9084 = vmatprep.mubr.msk.f32.mxu1 %vm10120_vm15, %v10119_v47 }
 0x73b   :  { %v1659_v61 = vsel %vm647_vm0, %v9856_v60, 0.0  ;;  %9092 = vmatprep.subr.mxu1 %v10119_v47 }
 0x73c   :  { %1660 = vadd.xlane.f32.xlu0 %v1659_v61 }
 0x73d   :  { %9085 = vmatmul.mubr.msk.f32.vlgmr.msra.gmra.mrb[24].mxu1 %vm647_vm0, %v1313_v53 }
 0x73e   :  { %9093 = vmatpush3.xpose.msk.msra.mxu1 %vm647_vm0, %v1471_v52  ;;  %9094 = vmatprep.mubr.msk.f32.mxu1 %vm10120_vm15, %v10119_v47 }
 0x73f   :  { %9102 = vmatprep.subr.mxu1 %v10119_v47 }
 0x741   :  { %9095 = vmatmul.mubr.msk.f32.vlgmr.msra.gmra.mrb[26].mxu1 %vm647_vm0, %v1469_v62 }
 0x742   :  { %9104 = vmatprep.mubr.msk.f32.mxu1 %vm10120_vm15, %v10119_v47 }
 0x760   :  { %v1643_v63 = vpop.xlane.xlu1 %1642 }
 0x761   :  { %v1647_v1 = vsub.f32 %v10582_v33, %v1643_v63 }
 0x763   :  { %v1654_v2 = vmul.f32 1.442695, %v1647_v1 }
 0x764   :  { %v1905_v14 = vpop.permute.xlu1 %1904 }
 0x765   :  { %9857 = vpow2.f32 %v1654_v2 }
 0x768   :  { %v2178_v21 = vpop.permute.xlu1 %2177 }
 0x76c   :  { %v2176_v25 = vpop.permute.xlu1 %2175 }
 0x76f   :  { %v9858_v3 = vpop.eup %9857 }
 0x770   :  { %v1665_v4 = vsel %vm647_vm0, %v9858_v3, 0.0  ;;  %v2254_v32 = vpop.permute.xlu1 %2253 }
 0x771   :  { %1666 = vadd.xlane.f32.xlu0 %v1665_v4 }
 0x774   :  { %v2332_v40 = vpop.permute.xlu1 %2331 }
 0x778   :  { %v2410_v49 = vpop.permute.xlu1 %2409 }
 0x787   :  { %1752 = vrot.lane.b32.xlu0 %v10486_v22, %s10125_s21 }
 0x78b   :  { %2255 = vrot.lane.b32.xlu0 %v10486_v22, %s10126_s25 }
 0x78f   :  { %2333 = vrot.lane.b32.xlu0 %v10494_v27, %s10126_s25 }
 0x793   :  { %2411 = vrot.lane.b32.xlu0 %v10500_v28, %s10126_s25 }
 0x7c7   :  { %v10635_v5 = vpop.f32.mrb[16].mxu1 }
 0x7c8   :  { %v9066_v6 = vpop.f32.mrb[17].mxu1 }
 0x7c9   :  { %v1661_v13 = vpop.xlane.xlu0 %1660 }
 0x7ca   :  { %9859 = vrcp.f32 %v1661_v13 }
 0x7cb   :  { %v10637_v7 = vpop.f32.mrb[18].mxu1 }
 0x7cc   :  { %v9071_v9 = vpop.f32.mrb[19].mxu1 }
 0x7cf   :  { %v10639_v10 = vpop.f32.mrb[20].mxu1 }
 0x7d0   :  { %v9076_v11 = vpop.f32.mrb[21].mxu1 }
 0x7d4   :  { %v9860_v18 = vpop.eup %9859 }
 0x7d5   :  { %v1673_v20 = vmul.f32 %v9860_v18, %v9856_v60 }
 0x7fe   :  { %v1667_v17 = vpop.xlane.xlu0 %1666 }
 0x7ff   :  { %9861 = vrcp.f32 %v1667_v17 }
 0x802   :  { %v1753_v19 = vpop.permute.xlu0 %1752 }
 0x803   :  { %9108 = vmatpush3.msra.mxu0 %v1753_v19 }
 0x804   :  { %9110 = vmatmul.mubr.msk.f32.vlgmr.msra.gmra.mrb[8].mxu0 %vm647_vm0, %v1673_v20  ;;  %9117 = vmatprep.subr.mxu0 %v10119_v47 }
 0x805   :  { %9118 = vmatpush3.msra.mxu0 %v1905_v14  ;;  %9119 = vmatprep.mubr.msk.f32.mxu0 %vm10120_vm15, %v10119_v47 }
 0x806   :  { %9138 = vmatprep.subr.mxu0 %v10119_v47  ;;  %v2256_v29 = vpop.permute.xlu0 %2255 }
 0x809   :  { %v9862_v23 = vpop.eup %9861 }
 0x80a   :  { %v1675_v26 = vmul.f32 %v9862_v23, %v9858_v3  ;;  %v2334_v36 = vpop.permute.xlu0 %2333 }
 0x80c   :  { %v10646_v30 = vpop.f32.mrb[22].mxu1  ;;  %9120 = vmatmul.mubr.msk.f32.vlgmr.msra.gmra.mrb[10].mxu0 %vm647_vm0, %v1675_v26 }
 0x80d   :  { %9139 = vmatpush3.xpose.msk.msra.mxu0 %vm647_vm0, %v2178_v21  ;;  %v9081_v31 = vpop.f32.mrb[23].mxu1  ;;  %9140 = vmatprep.mubr.msk.f32.mxu0 %vm10120_vm15, %v10119_v47 }
 0x80e   :  { %9143 = vmatprep.subr.mxu0 %v10119_v47  ;;  %v2412_v46 = vpop.permute.xlu0 %2411 }
 0x810   :  { %v1386_v33 = vpop.f32.mrb[24].mxu1  ;;  %9141 = vmatmul.mubr.msk.f32.vlgmr.msra.gmra.mrb[12].mxu0 %vm647_vm0, %v2176_v25 }
 0x811   :  { %v1624_v34 = vmul.f32 0.35355338, %v1386_v33  ;;  %9144 = vmatpush3.xpose.msk.msra.mxu0 %vm647_vm0, %v2256_v29  ;;  %v9086_v35 = vpop.f32.mrb[25].mxu1  ;;  %9145 = vmatprep.mubr.msk.f32.mxu0 %vm10120_vm15, %v10119_v47 }
 0x812   :  { %9148 = vmatprep.subr.mxu0 %v10119_v47 }
 0x813   :  { %v1628_v37 = vsel %vm643_vm1, %v1624_v34, -1e+30 }
 0x814   :  { %v1542_v38 = vpop.f32.mrb[26].mxu1  ;;  %9146 = vmatmul.mubr.msk.f32.vlgmr.msra.gmra.mrb[14].mxu0 %vm647_vm0, %v2254_v32  ;;  %v1632_v39 = vsel %vm647_vm0, %v1628_v37, -inf }
 0x815   :  { %v1626_v41 = vmul.f32 0.35355338, %v1542_v38  ;;  %9149 = vmatpush3.xpose.msk.msra.mxu0 %vm647_vm0, %v2334_v36  ;;  %v9096_v43 = vpop.f32.mrb[27].mxu1  ;;  %1633 = vmax.xlane.f32.xlu0 %v1632_v39 }
 0x816   :  { %9150 = vmatprep.mubr.msk.f32.mxu0 %vm10120_vm15, %v10119_v47  ;;  %9153 = vmatprep.subr.mxu0 %v10119_v47 }
 0x817   :  { %v1630_v45 = vsel %vm643_vm1, %v1626_v41, -1e+30 }
 0x818   :  { %9151 = vmatmul.mubr.msk.f32.vlgmr.msra.gmra.mrb[16].mxu0 %vm647_vm0, %v2332_v40  ;;  %v1638_v48 = vsel %vm647_vm0, %v1630_v45, -inf }
 0x819   :  { %9154 = vmatpush3.xpose.msk.msra.mxu0 %vm647_vm0, %v2412_v46  ;;  %1639 = vmax.xlane.f32.xlu1 %v1638_v48 }
 0x81a   :  { %9155 = vmatprep.mubr.msk.f32.mxu0 %vm10120_vm15, %v10119_v47  ;;  %9163 = vmatprep.subr.mxu0 %v10119_v47 }
 0x81c   :  { %9156 = vmatmul.mubr.msk.f32.vlgmr.msra.gmra.mrb[18].mxu0 %vm647_vm0, %v2410_v49 }
 0x81d   :  { %9165 = vmatprep.mubr.msk.f32.mxu0 %vm10120_vm15, %v10119_v47 }
 0x82a   :  { %1828 = vrot.lane.b32.xlu1 %v10494_v27, %s10125_s21 }
 0x8a2   :  { %v1634_v50 = vpop.xlane.xlu0 %1633 }
 0x8a3   :  { %v1644_v51 = vsub.f32 %v1628_v37, %v1634_v50 }
 0x8a5   :  { %v1648_v52 = vmul.f32 1.442695, %v1644_v51 }
 0x8a6   :  { %v1640_v53 = vpop.xlane.xlu1 %1639 }
 0x8a7   :  { %9863 = vpow2.f32 %v1648_v52  ;;  %v1646_v54 = vsub.f32 %v1630_v45, %v1640_v53 }
 0x8a9   :  { %v1652_v55 = vmul.f32 1.442695, %v1646_v54 }
 0x8aa   :  { %v1829_v38 = vpop.permute.xlu1 %1828 }
 0x8ab   :  { %9865 = vpow2.f32 %v1652_v55 }
 0x8b1   :  { %v9864_v56 = vpop.eup %9863 }
 0x8b2   :  { %v1656_v57 = vsel %vm647_vm0, %v9864_v56, 0.0 }
 0x8b3   :  { %1657 = vadd.xlane.f32.xlu0 %v1656_v57 }
 0x8b5   :  { %v9866_v58 = vpop.eup %9865 }
 0x8b6   :  { %v1662_v59 = vsel %vm647_vm0, %v9866_v58, 0.0 }
 0x8b7   :  { %1663 = vadd.xlane.f32.xlu0 %v1662_v59 }
 0x8cd   :  { %1676 = vrot.lane.b32.xlu0 %v10488_v24, %s10125_s21 }
 0x8d7   :  { %v10683_v60 = vpop.f32.mrb[8].mxu0 }
 0x8d8   :  { %v9111_v61 = vpop.f32.mrb[9].mxu0 }
 0x8df   :  { %v10685_v62 = vpop.f32.mrb[10].mxu0 }
 0x8e0   :  { %v9121_v63 = vpop.f32.mrb[11].mxu0 }
 0x8e3   :  { %v2249_v1 = vpop.f32.mrb[12].mxu0 }
 0x8e4   :  { %v2487_v2 = vmul.f32 0.35355338, %v2249_v1  ;;  %v9142_v3 = vpop.f32.mrb[13].mxu0 }
 0x8e5   :  { %v1980_v3 = vld [vmem:[%s10187_s14 + $0x8] sm:$0xff] }
 0x8e6   :  { %v2491_v4 = vsel %vm643_vm1, %v2487_v2, -1e+30 }
 0x8e7   :  { %v2327_v6 = vpop.f32.mrb[14].mxu0  ;;  %v2495_v9 = vsel %vm647_vm0, %v2491_v4, -inf }
 0x8e8   :  { %v2488_v11 = vmul.f32 0.35355338, %v2327_v6  ;;  %2496 = vmax.xlane.f32.xlu1 %v2495_v9  ;;  %v9147_v13 = vpop.f32.mrb[15].mxu0 }
 0x8ea   :  { %v2492_v14 = vsel %vm643_vm1, %v2488_v11, -1e+30 }
 0x8eb   :  { %v2405_v17 = vpop.f32.mrb[16].mxu0  ;;  %v2498_v18 = vsel %vm647_vm0, %v2492_v14, -inf }
 0x8ec   :  { %v2489_v19 = vmul.f32 0.35355338, %v2405_v17  ;;  %v9152_v20 = vpop.f32.mrb[17].mxu0  ;;  %2499 = vmax.xlane.f32.xlu0 %v2498_v18 }
 0x8ee   :  { %v2493_v21 = vsel %vm643_vm1, %v2489_v19, -1e+30 }
 0x8ef   :  { %v2483_v23 = vpop.f32.mrb[18].mxu0  ;;  %v2501_v25 = vsel %vm647_vm0, %v2493_v21, -inf }
 0x8f0   :  { %v2490_v26 = vmul.f32 0.35355338, %v2483_v23  ;;  %v9157_v29 = vpop.f32.mrb[19].mxu0  ;;  %2502 = vmax.xlane.f32.xlu0 %v2501_v25 }
 0x8f2   :  { %v2494_v31 = vsel %vm643_vm1, %v2490_v26, -1e+30 }
 0x8f3   :  { %v2504_v32 = vsel %vm647_vm0, %v2494_v31, -inf }
 0x8f4   :  { %2505 = vmax.xlane.f32.xlu1 %v2504_v32 }
 0x940   :  { %v1658_v33 = vpop.xlane.xlu0 %1657 }
 0x941   :  { %9867 = vrcp.f32 %v1658_v33 }
 0x944   :  { %v1664_v34 = vpop.xlane.xlu0 %1663 }
 0x945   :  { %9869 = vrcp.f32 %v1664_v34 }
 0x948   :  { %v1677_v35 = vpop.permute.xlu0 %1676 }
 0x949   :  { %9103 = vmatpush3.msra.mxu1 %v1677_v35 }
 0x94a   :  { %9112 = vmatprep.subr.mxu1 %v10119_v47 }
 0x94b   :  { %v9868_v36 = vpop.eup %9867 }
 0x94c   :  { %v1672_v37 = vmul.f32 %v9868_v36, %v9864_v56 }
 0x94e   :  { %9105 = vmatmul.mubr.msk.f32.vlgmr.msra.gmra.mrb[28].mxu1 %vm647_vm0, %v1672_v37  ;;  %v2843_v37 = vld [vmem:[%s10187_s14 + $0x10] sm:$0xff] }
 0x94f   :  { %v9870_v39 = vpop.eup %9869  ;;  %9113 = vmatpush3.msra.mxu1 %v1829_v38  ;;  %9114 = vmatprep.mubr.msk.f32.mxu1 %vm10120_vm15, %v10119_v47 }
 0x950   :  { %v1674_v40 = vmul.f32 %v9870_v39, %v9866_v58  ;;  %9122 = vmatprep.subr.mxu1 %v1980_v3 }
 0x952   :  { %9115 = vmatmul.mubr.msk.f32.vlgmr.msra.gmra.mrb[30].mxu1 %vm647_vm0, %v1674_v40 }
 0x953   :  { %9123 = vmatpush3.msra.mxu1 %v1980_v3 }
 0x975   :  { %v2497_v41 = vpop.xlane.xlu1 %2496 }
 0x976   :  { %v2507_v43 = vsub.f32 %v2491_v4, %v2497_v41  ;;  %v1311_v4 = vld [vmem:[%s10187_s14] sm:$0xff] }
 0x977   :  { %9130 = vmatprep.subr.mxu1 %v1311_v4 }
 0x978   :  { %v2511_v45 = vmul.f32 1.442695, %v2507_v43 }
 0x979   :  { %v2500_v46 = vpop.xlane.xlu0 %2499 }
 0x97a   :  { %9871 = vpow2.f32 %v2511_v45  ;;  %v2508_v48 = vsub.f32 %v2492_v14, %v2500_v46 }
 0x97c   :  { %v2513_v49 = vmul.f32 1.442695, %v2508_v48 }
 0x97d   :  { %v2503_v50 = vpop.xlane.xlu0 %2502 }
 0x97e   :  { %9873 = vpow2.f32 %v2513_v49  ;;  %v2509_v51 = vsub.f32 %v2493_v21, %v2503_v50 }
 0x980   :  { %v2515_v52 = vmul.f32 1.442695, %v2509_v51 }
 0x981   :  { %v2506_v53 = vpop.xlane.xlu1 %2505 }
 0x982   :  { %9875 = vpow2.f32 %v2515_v52  ;;  %v2510_v54 = vsub.f32 %v2494_v31, %v2506_v53 }
 0x984   :  { %v10704_v55 = vpop.eup %9871  ;;  %v2517_v56 = vmul.f32 1.442695, %v2510_v54 }
 0x985   :  { %v2519_v57 = vsel %vm647_vm0, %v10704_v55, 0.0 }
 0x986   :  { %9877 = vpow2.f32 %v2517_v56  ;;  %2520 = vadd.xlane.f32.xlu0 %v2519_v57 }
 0x988   :  { %v9874_v58 = vpop.eup %9873 }
 0x989   :  { %v2522_v59 = vsel %vm647_vm0, %v9874_v58, 0.0 }
 0x98a   :  { %2523 = vadd.xlane.f32.xlu1 %v2522_v59 }
 0x98c   :  { %v10709_v61 = vpop.eup %9875 }
 0x98d   :  { %v2525_v63 = vsel %vm647_vm0, %v10709_v61, 0.0 }
 0x98e   :  { %2526 = vadd.xlane.f32.xlu0 %v2525_v63 }
 0x990   :  { %v9878_v1 = vpop.eup %9877 }
 0x991   :  { %v2528_v2 = vsel %vm647_vm0, %v9878_v1, 0.0 }
 0x992   :  { %2529 = vadd.xlane.f32.xlu1 %v2528_v2 }
 0x9a3   :  { %2615 = vrot.lane.b32.xlu1 %v10486_v22, %s10128_s3 }
 0x9a4   :  { %2539 = vrot.lane.b32.xlu0 %v10488_v24, %s10128_s3 }
 0x9a7   :  { %2691 = vrot.lane.b32.xlu1 %v10494_v27, %s10128_s3 }
 0x9a8   :  { %2947 = vrot.lane.b32.xlu0 %v10488_v24, %s10129_s8 }
 0x9ab   :  { %2767 = vrot.lane.b32.xlu1 %v10500_v28, %s10128_s3 }
 0x9ac   :  { %3025 = vrot.lane.b32.xlu0 %v10486_v22, %s10129_s8 }
 0x9af   :  { %2945 = vrot.lane.b32.xlu1 %v10488_v24, %s10130_s12 }
 0x9b0   :  { %3103 = vrot.lane.b32.xlu0 %v10494_v27, %s10129_s8 }
 0x9b3   :  { %3023 = vrot.lane.b32.xlu1 %v10486_v22, %s10130_s12 }
 0x9b4   :  { %3101 = vrot.lane.b32.xlu0 %v10494_v27, %s10130_s12 }
 0x9b7   :  { %3181 = vrot.lane.b32.xlu1 %v10500_v28, %s10129_s8 }
 0x9bb   :  { %3179 = vrot.lane.b32.xlu1 %v10500_v28, %s10130_s12 }
 0xa13   :  { %v2521_v11 = vpop.xlane.xlu0 %2520 }
 0xa17   :  { %v2524_v6 = vpop.xlane.xlu1 %2523 }
 0xa18   :  { %9879 = vrcp.f32 %v2524_v6 }
 0xa1b   :  { %v2527_v20 = vpop.xlane.xlu0 %2526 }
 0xa1f   :  { %v2530_v9 = vpop.xlane.xlu1 %2529  ;;  %v2540_v26 = vpop.permute.xlu0 %2539 }
 0xa20   :  { %9881 = vrcp.f32 %v2530_v9 }
 0xa21   :  { %v1748_v13 = vpop.f32.mrb[28].mxu1  ;;  %9883 = vrcp.f32 %v2521_v11 }
 0xa22   :  { %v9880_v14 = vpop.eup %9879  ;;  %v9106_v17 = vpop.f32.mrb[29].mxu1  ;;  %9124 = vmatprep.mubr.msk.f32.mxu1 %vm647_vm0, %v1748_v13  ;;  %9885 = vrcp.f32 %v2527_v20 }
 0xa23   :  { %9125 = vmatmul.mubr.msk.f32.vlgmr.msra.gmra.mrb[32].mxu1 %vm647_vm0, %v10683_v60  ;;  %v2616_v18 = vpop.permute.xlu1 %2615  ;;  %v2536_v19 = vmul.f32 %v9880_v14, %v9874_v58 }
 0xa24   :  { %9164 = vmatpush3.msra.mxu0 %v2616_v18  ;;  %9131 = vmatpush3.msra.mxu1 %v1311_v4 }
 0xa25   :  { %v1900_v21 = vpop.f32.mrb[30].mxu1  ;;  %9166 = vmatmul.mubr.msk.f32.vlgmr.msra.gmra.mrb[20].mxu0 %vm647_vm0, %v2536_v19  ;;  %9158 = vmatprep.subr.mxu1 %v10119_v47 }
 0xa26   :  { %v9116_v23 = vpop.f32.mrb[31].mxu1  ;;  %9127 = vmatprep.mubr.msk.f32.mxu1 %vm647_vm0, %v1900_v21  ;;  %9173 = vmatprep.subr.mxu0 %v10119_v47 }
 0xa27   :  { %9128 = vmatmul.mubr.msk.f32.gmra.mrb[34].mxu1 %vm647_vm0, %v10685_v62  ;;  %v2692_v60 = vpop.permute.xlu1 %2691  ;;  %9175 = vmatprep.mubr.msk.f32.mxu0 %vm10120_vm15, %v10119_v47 }
 0xa28   :  { %9132 = vmatprep.mubr.msk.f32.mxu1 %vm647_vm0, %v10635_v5 }
 0xa2a   :  { %v9882_v25 = vpop.eup %9881 }
 0xa2b   :  { %9133 = vmatmul.mubr.msk.f32.vlgmr.msra.gmra.mrb[32].mxu1 %vm647_vm0, %v10637_v7  ;;  %v2768_v29 = vpop.permute.xlu1 %2767  ;;  %v2538_v31 = vmul.f32 %v9882_v25, %v9878_v1  ;;  %v9884_v62 = vpop.eup %9883 }
 0xa2c   :  { %9159 = vmatpush3.msra.mxu1 %v2540_v26  ;;  %9135 = vmatprep.mubr.msk.f32.mxu1 %vm647_vm0, %v10639_v10  ;;  %v2535_v7 = vmul.f32 %v9884_v62, %v10704_v55  ;;  %v2948_v10 = vpop.permute.xlu0 %2947  ;;  %v9886_v32 = vpop.eup %9885 }
 0xa2d   :  { %9174 = vmatpush3.msra.mxu0 %v2768_v29  ;;  %9168 = vmatprep.subr.mxu1 %v10119_v47 }
 0xa2e   :  { %9176 = vmatmul.mubr.msk.f32.vlgmr.msra.gmra.mrb[22].mxu0 %vm647_vm0, %v2538_v31  ;;  %9186 = vmatprep.subr.mxu0 %v10119_v47 }
 0xa2f   :  { %9136 = vmatmul.mubr.msk.f32.gmra.mrb[34].mxu1 %vm647_vm0, %v10646_v30  ;;  %v2946_v5 = vpop.permute.xlu1 %2945  ;;  %9188 = vmatprep.mubr.msk.f32.mxu0 %vm10120_vm15, %v10119_v47  ;;  %v2537_v30 = vmul.f32 %v9886_v32, %v10709_v61 }
 0xa30   :  { %9160 = vmatprep.mubr.msk.f32.mxu1 %vm10120_vm15, %v10119_v47  ;;  %v3026_v34 = vpop.permute.xlu0 %3025 }
 0xa33   :  { %9161 = vmatmul.mubr.msk.f32.vlgmr.msra.gmra.mrb[36].mxu1 %vm647_vm0, %v2535_v7  ;;  %v3024_v33 = vpop.permute.xlu1 %3023 }
 0xa34   :  { %9169 = vmatpush3.msra.mxu1 %v2692_v60  ;;  %9187 = vmatpush3.xpose.msk.msra.mxu0 %vm647_vm0, %v2948_v10  ;;  %v3104_v46 = vpop.permute.xlu0 %3103 }
 0xa35   :  { %9170 = vmatprep.mubr.msk.f32.mxu1 %vm10120_vm15, %v10119_v47  ;;  %9191 = vmatprep.subr.mxu0 %v10119_v47 }
 0xa36   :  { %9178 = vmatprep.subr.mxu1 %v2843_v37 }
 0xa37   :  { %9189 = vmatmul.mubr.msk.f32.vlgmr.msra.gmra.mrb[24].mxu0 %vm647_vm0, %v2946_v5  ;;  %9171 = vmatmul.mubr.msk.f32.vlgmr.msra.gmra.mrb[38].mxu1 %vm647_vm0, %v2537_v30  ;;  %v3182_v35 = vpop.permute.xlu1 %3181 }
 0xa38   :  { %9192 = vmatpush3.xpose.msk.msra.mxu0 %vm647_vm0, %v3026_v34  ;;  %9193 = vmatprep.mubr.msk.f32.mxu0 %vm10120_vm15, %v10119_v47  ;;  %v3102_v56 = vpop.permute.xlu0 %3101 }
 0xa39   :  { %9201 = vmatprep.subr.mxu0 %v10119_v47  ;;  %9179 = vmatpush3.msra.mxu1 %v2843_v37 }
 0xa3a   :  { %9196 = vmatprep.subr.mxu1 %v10119_v47 }
 0xa3b   :  { %9194 = vmatmul.mubr.msk.f32.vlgmr.msra.gmra.mrb[26].mxu0 %vm647_vm0, %v3024_v33  ;;  %v3180_v36 = vpop.permute.xlu1 %3179 }
 0xa3c   :  { %9202 = vmatpush3.xpose.msk.msra.mxu0 %vm647_vm0, %v3182_v35  ;;  %9203 = vmatprep.mubr.msk.f32.mxu0 %vm10120_vm15, %v10119_v47 }
 0xa3d   :  { %9211 = vmatprep.subr.mxu0 %v10119_v47 }
 0xa3f   :  { %9204 = vmatmul.mubr.msk.f32.vlgmr.msra.gmra.mrb[28].mxu0 %vm647_vm0, %v3180_v36 }
 0xa40   :  { %9213 = vmatprep.mubr.msk.f32.mxu0 %vm10120_vm15, %v10119_v47 }
 0xaf8   :  { %v2687_v38 = vpop.f32.mrb[20].mxu0 }
 0xaf9   :  { %v9167_v39 = vpop.f32.mrb[21].mxu0 }
 0xb01   :  { %v2839_v40 = vpop.f32.mrb[22].mxu0 }
 0xb02   :  { %v9177_v41 = vpop.f32.mrb[23].mxu0 }
 0xb06   :  { %v2611_v43 = vpop.f32.mrb[36].mxu1 }
 0xb07   :  { %v9162_v45 = vpop.f32.mrb[37].mxu1  ;;  %9180 = vmatprep.mubr.msk.f32.mxu1 %vm647_vm0, %v2611_v43 }
 0xb08   :  { %9181 = vmatmul.mubr.msk.f32.vlgmr.msra.gmra.mrb[32].mxu1 %vm647_vm0, %v2687_v38 }
 0xb09   :  { %9197 = vmatpush3.xpose.msk.msra.mxu1 %vm647_vm0, %v3104_v46 }
 0xb0a   :  { %v3019_v48 = vpop.f32.mrb[24].mxu0  ;;  %v2763_v49 = vpop.f32.mrb[38].mxu1  ;;  %9206 = vmatprep.subr.mxu1 %v10119_v47 }
 0xb0b   :  { %v3257_v50 = vmul.f32 0.35355338, %v3019_v48  ;;  %v9190_v51 = vpop.f32.mrb[25].mxu0  ;;  %v9172_v52 = vpop.f32.mrb[39].mxu1  ;;  %9183 = vmatprep.mubr.msk.f32.mxu1 %vm647_vm0, %v2763_v49 }
 0xb0c   :  { %9184 = vmatmul.mubr.msk.f32.gmra.mrb[34].mxu1 %vm647_vm0, %v2839_v40  ;;  %v3613_v51 = vld [vmem:[%s10187_s14 + $0x18] sm:$0xff]  ;;  %s11472_s14 = sld [smem:[#allocation8_spill]] }
 0xb0d   :  { %v3261_v53 = vsel %vm643_vm1, %v3257_v50, -1e+30  ;;  %9198 = vmatprep.mubr.msk.f32.mxu1 %vm10120_vm15, %v10119_v47 }
 0xb0e   :  { %v3097_v54 = vpop.f32.mrb[26].mxu0  ;;  %v3265_v55 = vsel %vm647_vm0, %v3261_v53, -inf }
 0xb0f   :  { %v3258_v57 = vmul.f32 0.35355338, %v3097_v54  ;;  %3266 = vmax.xlane.f32.xlu0 %v3265_v55  ;;  %v9195_v58 = vpop.f32.mrb[27].mxu0 }
 0xb10   :  { %9199 = vmatmul.mubr.msk.f32.vlgmr.msra.gmra.mrb[40].mxu1 %vm647_vm0, %v3102_v56 }
 0xb11   :  { %v3262_v59 = vsel %vm643_vm1, %v3258_v57, -1e+30  ;;  %9208 = vmatprep.mubr.msk.f32.mxu1 %vm10120_vm15, %v10119_v47 }
 0xb12   :  { %v3253_v61 = vpop.f32.mrb[28].mxu0  ;;  %v3268_v63 = vsel %vm647_vm0, %v3262_v59, -inf }
 0xb13   :  { %3269 = vmax.xlane.f32.xlu1 %v3268_v63  ;;  %v9205_v1 = vpop.f32.mrb[29].mxu0  ;;  %v3260_v18 = vmul.f32 0.35355338, %v3253_v61  ;;  %v8649_v63 = vld [vmem:[%s10192_s19] ss:$0 sm:$0xff]  ;;  %s11473_s19 = sld [smem:[#allocation9_spill]] }
 0xb15   :  { %v3264_v60 = vsel %vm643_vm1, %v3260_v18, -1e+30 }
 0xb16   :  { %v3274_v25 = vsel %vm647_vm0, %v3264_v60, -inf }
 0xb9c   :  { %v3267_v11 = vpop.xlane.xlu0 %3266 }
 0xb9d   :  { %v3277_v13 = vsub.f32 %v3261_v53, %v3267_v11 }
 0xb9f   :  { %v3281_v14 = vmul.f32 1.442695, %v3277_v13 }
 0xba0   :  { %v3270_v2 = vpop.xlane.xlu1 %3269 }
 0xba1   :  { %v3278_v3 = vsub.f32 %v3262_v59, %v3270_v2 }
 0xba3   :  { %v3283_v4 = vmul.f32 1.442695, %v3278_v3 }
 0xba5   :  { %9887 = vpow2.f32 %v3283_v4 }
 0xba6   :  { %9889 = vpow2.f32 %v3281_v14 }
 0xbaf   :  { %v9888_v6 = vpop.eup %9887 }
 0xbb0   :  { %v3292_v9 = vsel %vm647_vm0, %v9888_v6, 0.0  ;;  %v9890_v26 = vpop.eup %9889 }
 0xbb1   :  { %3293 = vadd.xlane.f32.xlu1 %v3292_v9  ;;  %v3289_v29 = vsel %vm647_vm0, %v9890_v26, 0.0 }
 0xbe3   :  { %v3175_v17 = vpop.f32.mrb[40].mxu1 }
 0xbe4   :  { %v3259_v19 = vmul.f32 0.35355338, %v3175_v17  ;;  %v9200_v20 = vpop.f32.mrb[41].mxu1 }
 0xbe6   :  { %v3263_v21 = vsel %vm643_vm1, %v3259_v19, -1e+30 }
 0xbe7   :  { %v3271_v23 = vsel %vm647_vm0, %v3263_v21, -inf }
 0xbe8   :  { %3272 = vmax.xlane.f32.xlu0 %v3271_v23 }
 0xbec   :  { %3275 = vmax.xlane.f32.xlu0 %v3274_v25 }
 0xbf0   :  { %3290 = vadd.xlane.f32.xlu0 %v3289_v29 }
 0xc3e   :  { %v3294_v37 = vpop.xlane.xlu1 %3293 }
 0xc75   :  { %v3273_v31 = vpop.xlane.xlu0 %3272 }
 0xc76   :  { %v3279_v62 = vsub.f32 %v3263_v21, %v3273_v31 }
 0xc78   :  { %v3285_v5 = vmul.f32 1.442695, %v3279_v62 }
 0xc79   :  { %v3276_v7 = vpop.xlane.xlu0 %3275 }
 0xc7a   :  { %9891 = vpow2.f32 %v3285_v5  ;;  %v3280_v10 = vsub.f32 %v3264_v60, %v3276_v7 }
 0xc7c   :  { %v3287_v32 = vmul.f32 1.442695, %v3280_v10 }
 0xc7d   :  { %v3291_v36 = vpop.xlane.xlu0 %3290 }
 0xc7e   :  { %9893 = vpow2.f32 %v3287_v32 }
 0xc7f   :  { %9895 = vrcp.f32 %v3291_v36 }
 0xc80   :  { %9897 = vrcp.f32 %v3294_v37 }
 0xc84   :  { %v9892_v33 = vpop.eup %9891 }
 0xc85   :  { %v3295_v30 = vsel %vm647_vm0, %v9892_v33, 0.0 }
 0xc86   :  { %3296 = vadd.xlane.f32.xlu0 %v3295_v30 }
 0xc88   :  { %v9894_v34 = vpop.eup %9893 }
 0xc89   :  { %v3298_v35 = vsel %vm647_vm0, %v9894_v34, 0.0  ;;  %v9896_v39 = vpop.eup %9895 }
 0xc8a   :  { %3299 = vadd.xlane.f32.xlu1 %v3298_v35  ;;  %v3305_v43 = vmul.f32 %v9896_v39, %v9890_v26  ;;  %v3805_v39 = vld [vmem:[%s10207_s6 + $0x8] sm:$0xff] }
 0xc9b   :  { %3385 = vrot.lane.b32.xlu1 %v10486_v22, %s10131_s27  ;;  %v9898_v22 = vpop.eup %9897 }
 0xc9c   :  { %3309 = vrot.lane.b32.xlu0 %v10488_v24, %s10131_s27 }
 0xc9f   :  { %3461 = vrot.lane.b32.xlu1 %v10494_v27, %s10131_s27  ;;  %v3306_v27 = vmul.f32 %v9898_v22, %v9888_v6 }
 0xca3   :  { %3537 = vrot.lane.b32.xlu1 %v10500_v28, %s10131_s27 }
 0xd13   :  { %v3297_v38 = vpop.xlane.xlu0 %3296 }
 0xd14   :  { %9899 = vrcp.f32 %v3297_v38  ;;  %v3804_v38 = vld [vmem:[%s10207_s6] sm:$0xff] }
 0xd17   :  { %v3310_v40 = vpop.permute.xlu0 %3309  ;;  %v3300_v41 = vpop.xlane.xlu1 %3299 }
 0xd18   :  { %9901 = vrcp.f32 %v3300_v41  ;;  %9207 = vmatpush3.msra.mxu1 %v3310_v40  ;;  %v9637_v40 = vpack.c.bf16 %v3805_v39, %v3804_v38  ;;  %v3806_v41 = vld [vmem:[%s10207_s6 + $0x10] sm:$0xff] }
 0xd19   :  { %9209 = vmatmul.mubr.msk.f32.vlgmr.msra.gmra.mrb[42].mxu1 %vm647_vm0, %v3305_v43  ;;  %9216 = vmatprep.subr.mxu1 %v10119_v47  ;;  %v3807_v43 = vld [vmem:[%s10207_s6 + $0x18] sm:$0xff]  ;;  %v3962_v39 = vld [vmem:[%s10217_s20 + $0x70] sm:$0xff]  ;;  %s11475_s6 = sld [smem:[#allocation13_spill]] }
 0xd1a   :  { %9218 = vmatprep.mubr.msk.f32.mxu1 %vm10120_vm15, %v10119_v47  ;;  %v9641_v22 = vpack.c.bf16 %v3807_v43, %v3806_v41  ;;  %v8652_v43 = vld [vmem:[%s11473_s19] ss:$0 sm:$0xff] }
 0xd1b   :  { %v3386_v24 = vpop.permute.xlu1 %3385 }
 0xd1c   :  { %9212 = vmatpush3.msra.mxu0 %v3386_v24  ;;  %v3948_v24 = vld [vmem:[%s10217_s20] sm:$0xff] }
 0xd1d   :  { %9214 = vmatmul.mubr.msk.f32.vlgmr.msra.gmra.mrb[30].mxu0 %vm647_vm0, %v3306_v27  ;;  %9221 = vmatprep.subr.mxu0 %v10119_v47  ;;  %v3949_v27 = vld [vmem:[%s10217_s20 + $0x8] sm:$0xff] }
 0xd1e   :  { %v9900_v28 = vpop.eup %9899  ;;  %9223 = vmatprep.mubr.msk.f32.mxu0 %vm10120_vm15, %v10119_v47 }
 0xd1f   :  { %v3462_v45 = vpop.permute.xlu1 %3461  ;;  %v3307_v46 = vmul.f32 %v9900_v28, %v9892_v33  ;;  %v9645_v28 = vpack.c.bf16 %v3949_v27, %v3948_v24 }
 0xd20   :  { %9217 = vmatpush3.msra.mxu1 %v3462_v45 }
 0xd21   :  { %9219 = vmatmul.mubr.msk.f32.vlgmr.msra.gmra.mrb[44].mxu1 %vm647_vm0, %v3307_v46  ;;  %9226 = vmatprep.subr.mxu1 %v3613_v51 }
 0xd22   :  { %v9902_v48 = vpop.eup %9901  ;;  %9227 = vmatpush3.msra.mxu1 %v3613_v51 }
 0xd23   :  { %v3538_v49 = vpop.permute.xlu1 %3537  ;;  %v3308_v50 = vmul.f32 %v9902_v48, %v9894_v34  ;;  %9646 = vmatprep.subr.bf16.mxu1 %v9645_v28 }
 0xd24   :  { %9222 = vmatpush3.msra.mxu0 %v3538_v49 }
 0xd25   :  { %9224 = vmatmul.mubr.msk.f32.vlgmr.msra.gmra.mrb[32].mxu0 %vm647_vm0, %v3308_v50  ;;  %9638 = vmatprep.subr.bf16.mxu0 %v9637_v40 }
 0xd26   :  { %9640 = vmatpush3.bf16.msra.mxu0 %v9637_v40  ;;  %v3963_v40 = vld [vmem:[%s10217_s20 + $0x78] sm:$0xff] }
 0xd27   :  { %9642 = vmatprep.subr.bf16.mxu0 %v9641_v22  ;;  %v9673_v41 = vpack.c.bf16 %v3963_v40, %v3962_v39 }
 0xd2a   :  { %9644 = vmatpush3.bf16.msra.mxu0 %v9641_v22 }
 0xdec   :  { %v3381_v52 = vpop.f32.mrb[42].mxu1 }
 0xded   :  { %v9210_v53 = vpop.f32.mrb[43].mxu1  ;;  %9228 = vmatprep.mubr.msk.f32.mxu1 %vm647_vm0, %v3381_v52 }
 0xdf0   :  { %v3457_v54 = vpop.f32.mrb[30].mxu0 }
 0xdf1   :  { %v9215_v55 = vpop.f32.mrb[31].mxu0  ;;  %9229 = vmatmul.mubr.msk.f32.vlgmr.msra.gmra.mrb[32].mxu1 %vm647_vm0, %v3457_v54 }
 0xdf2   :  { %9648 = vmatpush3.bf16.msra.mxu1 %v9645_v28 }
 0xdf4   :  { %v3533_v56 = vpop.f32.mrb[44].mxu1 }
 0xdf5   :  { %v9220_v57 = vpop.f32.mrb[45].mxu1  ;;  %9231 = vmatprep.mubr.msk.f32.mxu1 %vm647_vm0, %v3533_v56 }
 0xdf8   :  { %v3609_v58 = vpop.f32.mrb[32].mxu0 }
 0xdf9   :  { %v9225_v59 = vpop.f32.mrb[33].mxu0  ;;  %9232 = vmatmul.mubr.msk.f32.gmra.mrb[34].mxu1 %vm647_vm0, %v3609_v58  ;;  %v8650_v58 = vld [vmem:[%s10197_s24] ss:$0 sm:$0xff]  ;;  %s11474_s24 = sld [smem:[#allocation10_spill]] }
 0xec4   :  { %v9230_v61 = vpop.f32.mrb[32].mxu1 }
 0xec5   :  { %v3716_v1 = vadd.f32 %v9230_v61, %v10448_v12  ;;  %v3692_v2 = vpop.f32.mrb[33].mxu1 }
 0xec6   :  { %v3715_v3 = vadd.f32 %v3692_v2, %v10446_v8  ;;  %v8651_v2 = vld [vmem:[%s11472_s14] ss:$0 sm:$0xff] }
 0xec7   :  { %v10842_v4 = vadd.f32 %v8649_v63, %v3716_v1 }
 0xec8   :  { %v10844_v6 = vadd.f32 %v8649_v63, %v3715_v3 }
 0xec9   :  { %v3735_v9 = vsel %vm461_vm14, %v10842_v4, 0.0 }
 0xeca   :  { %3736 = vadd.xlane.f32.xlu1 %v3735_v9  ;;  %v3732_v11 = vsel %vm461_vm14, %v10844_v6, 0.0 }
 0xecb   :  { %3733 = vadd.xlane.f32.xlu0 %v3732_v11 }
 0xecc   :  { %v9233_v13 = vpop.f32.mrb[34].mxu1 }
 0xecd   :  { %v3702_v14 = vpop.f32.mrb[35].mxu1  ;;  %v3718_v17 = vadd.f32 %v9233_v13, %v10452_v15 }
 0xece   :  { %v3717_v12 = vadd.f32 %v3702_v14, %v10454_v16 }
 0xecf   :  { %v10854_v8 = vadd.f32 %v8649_v63, %v3718_v17 }
 0xed0   :  { %v10852_v18 = vadd.f32 %v8649_v63, %v3717_v12 }
 0xed1   :  { %v3741_v20 = vsel %vm461_vm14, %v10854_v8, 0.0 }
 0xed2   :  { %v3738_v19 = vsel %vm461_vm14, %v10852_v18, 0.0 }
 0xed3   :  { %3739 = vadd.xlane.f32.xlu0 %v3738_v19 }
 0xed7   :  { %3742 = vadd.xlane.f32.xlu0 %v3741_v20 }
 0xf57   :  { %v3737_v21 = vpop.xlane.xlu1 %3736 }
 0xf58   :  { %v3745_v23 = vmul.f32 0.03125, %v3737_v21  ;;  %v3734_v60 = vpop.xlane.xlu0 %3733 }
 0xf59   :  { %v3744_v25 = vmul.f32 0.03125, %v3734_v60 }
 0xf5a   :  { %v3749_v15 = vsub.f32 %v10842_v4, %v3745_v23 }
 0xf5b   :  { %v3748_v16 = vsub.f32 %v10844_v6, %v3744_v25  ;;  %v3950_v25 = vld [vmem:[%s10217_s20 + $0x10] sm:$0xff] }
 0xf5c   :  { %v3753_v26 = vmul.f32 %v3749_v15, %v3749_v15 }
 0xf5d   :  { %v3752_v29 = vmul.f32 %v3748_v16, %v3748_v16 }
 0xf5e   :  { %v3759_v31 = vsel %vm461_vm14, %v3753_v26, 0.0  ;;  %v3952_v26 = vld [vmem:[%s10217_s20 + $0x20] sm:$0xff] }
 0xf5f   :  { %3760 = vadd.xlane.f32.xlu1 %v3759_v31  ;;  %v3756_v62 = vsel %vm461_vm14, %v3752_v29, 0.0  ;;  %v3953_v29 = vld [vmem:[%s10217_s20 + $0x28] sm:$0xff] }
 0xf60   :  { %3757 = vadd.xlane.f32.xlu0 %v3756_v62  ;;  %v3740_v5 = vpop.xlane.xlu0 %3739  ;;  %v9653_v31 = vpack.c.bf16 %v3953_v29, %v3952_v26  ;;  %v3954_v62 = vld [vmem:[%s10217_s20 + $0x30] sm:$0xff] }
 0xf61   :  { %v3746_v7 = vmul.f32 0.03125, %v3740_v5  ;;  %v3955_v5 = vld [vmem:[%s10217_s20 + $0x38] sm:$0xff] }
 0xf63   :  { %v3750_v10 = vsub.f32 %v10852_v18, %v3746_v7  ;;  %v9657_v7 = vpack.c.bf16 %v3955_v5, %v3954_v62 }
 0xf64   :  { %v3743_v32 = vpop.xlane.xlu0 %3742 }
 0xf65   :  { %v3747_v33 = vmul.f32 0.03125, %v3743_v32  ;;  %v3754_v30 = vmul.f32 %v3750_v10, %v3750_v10  ;;  %v3957_v32 = vld [vmem:[%s10217_s20 + $0x48] sm:$0xff] }
 0xf67   :  { %v3751_v34 = vsub.f32 %v10854_v8, %v3747_v33  ;;  %v3762_v35 = vsel %vm461_vm14, %v3754_v30, 0.0  ;;  %v3958_v30 = vld [vmem:[%s10217_s20 + $0x50] sm:$0xff] }
 0xf68   :  { %3763 = vadd.xlane.f32.xlu0 %v3762_v35 }
 0xf69   :  { %v3755_v36 = vmul.f32 %v3751_v34, %v3751_v34 }
 0xf6b   :  { %v3765_v37 = vsel %vm461_vm14, %v3755_v36, 0.0  ;;  %v3960_v36 = vld [vmem:[%s10217_s20 + $0x60] sm:$0xff] }
 0xf6c   :  { %3766 = vadd.xlane.f32.xlu1 %v3765_v37  ;;  %v3961_v37 = vld [vmem:[%s10217_s20 + $0x68] sm:$0xff] }
 0xf6d   :  { %v9669_v38 = vpack.c.bf16 %v3961_v37, %v3960_v36 }
 0xfec   :  { %v3761_v45 = vpop.xlane.xlu1 %3760 }
 0xfed   :  { %v3769_v46 = vmul.f32 0.03125, %v3761_v45  ;;  %v3758_v48 = vpop.xlane.xlu0 %3757 }
 0xfee   :  { %v3768_v49 = vmul.f32 0.03125, %v3758_v48 }
 0xfef   :  { %v3773_v50 = vadd.f32 1e-06, %v3769_v46 }
 0xff0   :  { %v3772_v51 = vadd.f32 1e-06, %v3768_v49 }
 0xff1   :  { %9903 = vrsqrt.f32 %v3773_v50 }
 0xff2   :  { %9905 = vrsqrt.f32 %v3772_v51 }
 0xff5   :  { %v3764_v52 = vpop.xlane.xlu0 %3763 }
 0xff6   :  { %v3770_v53 = vmul.f32 0.03125, %v3764_v52 }
 0xff8   :  { %v3774_v54 = vadd.f32 1e-06, %v3770_v53 }
 0xff9   :  { %v3767_v55 = vpop.xlane.xlu1 %3766 }
 0xffa   :  { %9907 = vrsqrt.f32 %v3774_v54  ;;  %v3771_v56 = vmul.f32 0.03125, %v3767_v55 }
 0xffb   :  { %v9904_v57 = vpop.eup %9903 }
 0xffc   :  { %v9906_v59 = vpop.eup %9905  ;;  %v3781_v61 = vmul.f32 %v9904_v57, %v3749_v15  ;;  %v3775_v63 = vadd.f32 1e-06, %v3771_v56  ;;  %v3951_v15 = vld [vmem:[%s10217_s20 + $0x18] sm:$0xff] }
 0xffd   :  { %v3780_v1 = vmul.f32 %v9906_v59, %v3748_v16  ;;  %v9649_v16 = vpack.c.bf16 %v3951_v15, %v3950_v25 }
 0xffe   :  { %9909 = vrsqrt.f32 %v3775_v63  ;;  %v3791_v3 = vmul.f32 %v8650_v58, %v3781_v61 }
 0xfff   :  { %v3790_v9 = vmul.f32 %v8650_v58, %v3780_v1  ;;  %9650 = vmatprep.subr.bf16.mxu1 %v9649_v16 }
0x1000   :  { %v3801_v13 = vadd.f32 %v8651_v2, %v3791_v3  ;;  %9652 = vmatpush3.bf16.msra.mxu1 %v9649_v16 }
0x1001   :  { %v3800_v11 = vadd.f32 %v8651_v2, %v3790_v9  ;;  %9654 = vmatprep.subr.bf16.mxu1 %v9653_v31 }
0x1003   :  { %9242 = vmatprep.mubr.msk.f32.mxu0 %vm461_vm14, %v3800_v11 }
0x1004   :  { %v9908_v14 = vpop.eup %9907  ;;  %9243 = vmatmul.mubr.msk.f32.vlgmr.msra.gmra.mrb[34].mxu0 %vm461_vm14, %v3801_v13  ;;  %9656 = vmatpush3.bf16.msra.mxu1 %v9653_v31 }
0x1005   :  { %v3782_v17 = vmul.f32 %v9908_v14, %v3750_v10  ;;  %9658 = vmatprep.subr.bf16.mxu1 %v9657_v7  ;;  %v3956_v10 = vld [vmem:[%s10217_s20 + $0x40] sm:$0xff] }
0x1006   :  { %v9661_v33 = vpack.c.bf16 %v3957_v32, %v3956_v10 }
0x1007   :  { %v3792_v12 = vmul.f32 %v8650_v58, %v3782_v17 }
0x1008   :  { %v9910_v19 = vpop.eup %9909  ;;  %9660 = vmatpush3.bf16.msra.mxu1 %v9657_v7 }
0x1009   :  { %v3802_v20 = vadd.f32 %v8651_v2, %v3792_v12  ;;  %v3783_v21 = vmul.f32 %v9910_v19, %v3751_v34  ;;  %9662 = vmatprep.subr.bf16.mxu1 %v9661_v33  ;;  %v3959_v34 = vld [vmem:[%s10217_s20 + $0x58] sm:$0xff]  ;;  %s11476_s20 = sld [smem:[#allocation11_spill]] }
0x100a   :  { %v9665_v35 = vpack.c.bf16 %v3959_v34, %v3958_v30 }
0x100b   :  { %9245 = vmatprep.mubr.msk.f32.mxu0 %vm461_vm14, %v3802_v20  ;;  %v3793_v23 = vmul.f32 %v8650_v58, %v3783_v21 }
0x100c   :  { %9664 = vmatpush3.bf16.msra.mxu1 %v9661_v33  ;;  %v8657_v33 = vld [vmem:[%s11474_s24] ss:$0 sm:$0xff] }
0x100d   :  { %v3803_v60 = vadd.f32 %v8651_v2, %v3793_v23  ;;  %9666 = vmatprep.subr.bf16.mxu1 %v9665_v35 }
0x100f   :  { %9246 = vmatmul.mubr.msk.f32.gmra.mrb[36].mxu0 %vm461_vm14, %v3803_v60 }
0x1010   :  { %9668 = vmatpush3.bf16.msra.mxu1 %v9665_v35 }
0x1011   :  { %9670 = vmatprep.subr.bf16.mxu1 %v9669_v38 }
0x1014   :  { %9672 = vmatpush3.bf16.msra.mxu1 %v9669_v38 }
0x1015   :  { %9674 = vmatprep.subr.bf16.mxu1 %v9673_v41 }
0x1018   :  { %9676 = vmatpush3.bf16.msra.mxu1 %v9673_v41 }
0x1019   :  { %9325 = vmatprep.subr.mxu1 %v10119_v47 }
0x10d7   :  { %v9244_v22 = vpop.f32.mrb[34].mxu0 }
0x10d8   :  { %v3899_v24 = vadd.f32 %v9244_v22, %v8652_v43  ;;  %v3893_v27 = vpop.f32.mrb[35].mxu0 }
0x10d9   :  { %v3894_v28 = vadd.f32 %v8652_v43, %v3893_v27 }
0x10da   :  { %v3917_v45 = vmul.f32 0.044715, %v3899_v24  ;;  %v3913_v60 = vmul.f32 0.5, %v3899_v24 }
0x10db   :  { %v3916_v46 = vmul.f32 0.044715, %v3894_v28  ;;  %v3912_v21 = vmul.f32 0.5, %v3894_v28 }
0x10dc   :  { %v3921_v48 = vmul.f32 %v3917_v45, %v3899_v24 }
0x10dd   :  { %v3920_v49 = vmul.f32 %v3916_v46, %v3894_v28 }
0x10de   :  { %v3925_v50 = vmul.f32 %v3921_v48, %v3899_v24 }
0x10df   :  { %v3924_v51 = vmul.f32 %v3920_v49, %v3894_v28 }
0x10e0   :  { %v3929_v52 = vadd.f32 %v3925_v50, %v3899_v24 }
0x10e1   :  { %v3928_v53 = vadd.f32 %v3924_v51, %v3894_v28 }
0x10e2   :  { %v3933_v54 = vmul.f32 0.7978846, %v3929_v52  ;;  %v9247_v55 = vpop.f32.mrb[36].mxu0 }
0x10e3   :  { %v3909_v56 = vadd.f32 %v9247_v55, %v8652_v43  ;;  %v3903_v57 = vpop.f32.mrb[37].mxu0  ;;  %v3932_v58 = vmul.f32 0.7978846, %v3928_v53 }
0x10e4   :  { %9911 = vtanh.f32 %v3933_v54  ;;  %v3904_v59 = vadd.f32 %v8652_v43, %v3903_v57 }
0x10e5   :  { %v3919_v61 = vmul.f32 0.044715, %v3909_v56  ;;  %9913 = vtanh.f32 %v3932_v58  ;;  %v3915_v5 = vmul.f32 0.5, %v3909_v56 }
0x10e6   :  { %v3918_v63 = vmul.f32 0.044715, %v3904_v59  ;;  %v3914_v31 = vmul.f32 0.5, %v3904_v59 }
0x10e7   :  { %v3923_v1 = vmul.f32 %v3919_v61, %v3909_v56 }
0x10e8   :  { %v3922_v2 = vmul.f32 %v3918_v63, %v3904_v59 }
0x10e9   :  { %v3927_v3 = vmul.f32 %v3923_v1, %v3909_v56 }
0x10ea   :  { %v3926_v9 = vmul.f32 %v3922_v2, %v3904_v59  ;;  %v4138_v2 = vld [vmem:[%s11475_s6] sm:$0xff] }
0x10eb   :  { %v3931_v11 = vadd.f32 %v3927_v3, %v3909_v56  ;;  %v4139_v3 = vld [vmem:[%s11475_s6 + $0x8] sm:$0xff] }
0x10ec   :  { %v3930_v13 = vadd.f32 %v3926_v9, %v3904_v59  ;;  %v9677_v9 = vpack.c.bf16 %v4139_v3, %v4138_v2 }
0x10ed   :  { %v3935_v14 = vmul.f32 0.7978846, %v3931_v11  ;;  %v4140_v11 = vld [vmem:[%s11475_s6 + $0x10] sm:$0xff] }
0x10ee   :  { %v9912_v17 = vpop.eup %9911  ;;  %v3934_v12 = vmul.f32 0.7978846, %v3930_v13  ;;  %9678 = vmatprep.subr.bf16.mxu0 %v9677_v9  ;;  %v4141_v13 = vld [vmem:[%s11475_s6 + $0x18] sm:$0xff] }
0x10ef   :  { %v9914_v19 = vpop.eup %9913  ;;  %v3941_v20 = vadd.f32 1.0, %v9912_v17  ;;  %9915 = vtanh.f32 %v3935_v14  ;;  %9680 = vmatpush3.bf16.msra.mxu0 %v9677_v9  ;;  %v9681_v14 = vpack.c.bf16 %v4141_v13, %v4140_v11 }
0x10f0   :  { %v3940_v23 = vadd.f32 1.0, %v9914_v19  ;;  %9917 = vtanh.f32 %v3934_v12 }
0x10f1   :  { %v3945_v15 = vmul.f32 %v3941_v20, %v3913_v60  ;;  %9682 = vmatprep.subr.bf16.mxu0 %v9681_v14 }
0x10f2   :  { %v3944_v25 = vmul.f32 %v3940_v23, %v3912_v21 }
0x10f3   :  { %9684 = vmatpush3.bf16.msra.mxu0 %v9681_v14 }
0x10f4   :  { %9280 = vmatprep.mubr.f32.mxu1 %v3944_v25  ;;  %9300 = vmatprep.subr.mxu0 %v10119_v47 }
0x10f5   :  { %9281 = vmatmul.mubr.f32.vlgmr.msra.gmra.mrb[46].mxu1 %v3945_v15 }
0x10f9   :  { %v9916_v16 = vpop.eup %9915 }
0x10fa   :  { %v9918_v26 = vpop.eup %9917  ;;  %v3943_v29 = vadd.f32 1.0, %v9916_v16 }
0x10fb   :  { %v3942_v62 = vadd.f32 1.0, %v9918_v26 }
0x10fc   :  { %v3947_v10 = vmul.f32 %v3943_v29, %v3915_v5 }
0x10fd   :  { %v3946_v7 = vmul.f32 %v3942_v62, %v3914_v31  ;;  %v8658_v62 = vld [vmem:[%s11476_s20] ss:$0 sm:$0xff] }
0x10ff   :  { %9283 = vmatprep.mubr.f32.mxu1 %v3946_v7 }
0x1100   :  { %9284 = vmatmul.mubr.f32.gmra.mrb[48].mxu1 %v3947_v10 }
0x1101   :  { %9327 = vmatprep.mubr.msk.f32.mxu1 %vm10120_vm15, %v10119_v47 }
0x11c8   :  { %v9282_v32 = vpop.f32.mrb[46].mxu1 }
0x11c9   :  { %v4050_v30 = vadd.f32 %v9282_v32, %v10842_v4  ;;  %v4030_v34 = vpop.f32.mrb[47].mxu1  ;;  %v8659_v32 = vld [vmem:[%s11477_s16] ss:$0 sm:$0xff] }
0x11ca   :  { %v4049_v35 = vadd.f32 %v4030_v34, %v10844_v6 }
0x11cb   :  { %v10901_v36 = vadd.f32 %v8657_v33, %v4050_v30 }
0x11cc   :  { %v10903_v37 = vadd.f32 %v8657_v33, %v4049_v35 }
0x11cd   :  { %v4069_v38 = vsel %vm461_vm14, %v10901_v36, 0.0 }
0x11ce   :  { %4070 = vadd.xlane.f32.xlu1 %v4069_v38  ;;  %v4066_v39 = vsel %vm461_vm14, %v10903_v37, 0.0 }
0x11cf   :  { %4067 = vadd.xlane.f32.xlu0 %v4066_v39 }
0x11d3   :  { %v9285_v40 = vpop.f32.mrb[48].mxu1 }
0x11d4   :  { %v4052_v41 = vadd.f32 %v9285_v40, %v10854_v8  ;;  %v4040_v43 = vpop.f32.mrb[49].mxu1 }
0x11d5   :  { %v4051_v4 = vadd.f32 %v4040_v43, %v10852_v18 }
0x11d6   :  { %v10911_v22 = vadd.f32 %v8657_v33, %v4052_v41 }
0x11d7   :  { %v10913_v6 = vadd.f32 %v8657_v33, %v4051_v4 }
0x11d8   :  { %v4075_v24 = vsel %vm461_vm14, %v10911_v22, 0.0 }
0x11d9   :  { %4076 = vadd.xlane.f32.xlu1 %v4075_v24  ;;  %v4072_v27 = vsel %vm461_vm14, %v10913_v6, 0.0 }
0x11da   :  { %4073 = vadd.xlane.f32.xlu0 %v4072_v27 }
0x125b   :  { %v4071_v28 = vpop.xlane.xlu1 %4070 }
0x125c   :  { %v4079_v45 = vmul.f32 0.03125, %v4071_v28  ;;  %v4068_v46 = vpop.xlane.xlu0 %4067  ;;  %v8660_v28 = vld [vmem:[%s11478_s15] ss:$0 sm:$0xff] }
0x125d   :  { %v4078_v48 = vmul.f32 0.03125, %v4068_v46 }
0x125e   :  { %v4083_v8 = vsub.f32 %v10901_v36, %v4079_v45 }
0x125f   :  { %v4082_v18 = vsub.f32 %v10903_v37, %v4078_v48 }
0x1260   :  { %v4087_v49 = vmul.f32 %v4083_v8, %v4083_v8 }
0x1261   :  { %v4086_v50 = vmul.f32 %v4082_v18, %v4082_v18 }
0x1262   :  { %v4093_v51 = vsel %vm461_vm14, %v4087_v49, 0.0 }
0x1263   :  { %4094 = vadd.xlane.f32.xlu1 %v4093_v51  ;;  %v4090_v52 = vsel %vm461_vm14, %v4086_v50, 0.0 }
0x1264   :  { %4091 = vadd.xlane.f32.xlu0 %v4090_v52 }
0x1266   :  { %v4077_v53 = vpop.xlane.xlu1 %4076 }
0x1267   :  { %v4081_v54 = vmul.f32 0.03125, %v4077_v53  ;;  %v4074_v55 = vpop.xlane.xlu0 %4073 }
0x1268   :  { %v4080_v56 = vmul.f32 0.03125, %v4074_v55 }
0x1269   :  { %v4085_v57 = vsub.f32 %v10911_v22, %v4081_v54 }
0x126a   :  { %v4084_v58 = vsub.f32 %v10913_v6, %v4080_v56 }
0x126b   :  { %v4089_v59 = vmul.f32 %v4085_v57, %v4085_v57 }
0x126c   :  { %v4088_v61 = vmul.f32 %v4084_v58, %v4084_v58 }
0x126d   :  { %v4099_v63 = vsel %vm461_vm14, %v4089_v59, 0.0 }
0x126e   :  { %4100 = vadd.xlane.f32.xlu1 %v4099_v63  ;;  %v4096_v1 = vsel %vm461_vm14, %v4088_v61, 0.0 }
0x126f   :  { %4097 = vadd.xlane.f32.xlu0 %v4096_v1 }
0x12f0   :  { %v4095_v17 = vpop.xlane.xlu1 %4094 }
0x12f1   :  { %v4103_v12 = vmul.f32 0.03125, %v4095_v17  ;;  %v4092_v19 = vpop.xlane.xlu0 %4091 }
0x12f2   :  { %v4102_v20 = vmul.f32 0.03125, %v4092_v19 }
0x12f3   :  { %v4107_v21 = vadd.f32 1e-06, %v4103_v12 }
0x12f4   :  { %v4106_v23 = vadd.f32 1e-06, %v4102_v20 }
0x12f5   :  { %9919 = vrsqrt.f32 %v4107_v21 }
0x12f6   :  { %9921 = vrsqrt.f32 %v4106_v23 }
0x12fb   :  { %v4101_v60 = vpop.xlane.xlu1 %4100 }
0x12fc   :  { %v4105_v25 = vmul.f32 0.03125, %v4101_v60  ;;  %v4098_v15 = vpop.xlane.xlu0 %4097 }
0x12fd   :  { %v4104_v16 = vmul.f32 0.03125, %v4098_v15 }
0x12fe   :  { %v4109_v26 = vadd.f32 1e-06, %v4105_v25 }
0x12ff   :  { %v9920_v29 = vpop.eup %9919  ;;  %v4108_v31 = vadd.f32 1e-06, %v4104_v16 }
0x1300   :  { %v9922_v5 = vpop.eup %9921  ;;  %v4115_v7 = vmul.f32 %v9920_v29, %v4083_v8  ;;  %9923 = vrsqrt.f32 %v4109_v26 }
0x1301   :  { %9925 = vrsqrt.f32 %v4108_v31  ;;  %v4114_v10 = vmul.f32 %v9922_v5, %v4082_v18 }
0x1302   :  { %v4125_v33 = vmul.f32 %v8658_v62, %v4115_v7 }
0x1303   :  { %v4124_v30 = vmul.f32 %v8658_v62, %v4114_v10 }
0x1304   :  { %v4135_v35 = vadd.f32 %v8659_v32, %v4125_v33 }
0x1305   :  { %v4134_v34 = vadd.f32 %v8659_v32, %v4124_v30 }
0x1307   :  { %9294 = vmatprep.mubr.msk.f32.mxu0 %vm461_vm14, %v4134_v34 }
0x1308   :  { %9295 = vmatmul.mubr.msk.f32.vlgmr.msra.gmra.mrb[38].mxu0 %vm461_vm14, %v4135_v35 }
0x130a   :  { %v9924_v38 = vpop.eup %9923 }
0x130b   :  { %v9926_v39 = vpop.eup %9925  ;;  %v4117_v40 = vmul.f32 %v9924_v38, %v4085_v57 }
0x130c   :  { %v4116_v41 = vmul.f32 %v9926_v39, %v4084_v58 }
0x130d   :  { %v4127_v43 = vmul.f32 %v8658_v62, %v4117_v40 }
0x130e   :  { %v4126_v4 = vmul.f32 %v8658_v62, %v4116_v41 }
0x130f   :  { %v4137_v27 = vadd.f32 %v8659_v32, %v4127_v43 }
0x1310   :  { %v4136_v24 = vadd.f32 %v8659_v32, %v4126_v4 }
0x1312   :  { %9297 = vmatprep.mubr.msk.f32.mxu0 %vm461_vm14, %v4136_v24 }
0x1313   :  { %9298 = vmatmul.mubr.msk.f32.gmra.mrb[40].mxu0 %vm461_vm14, %v4137_v27 }
0x1314   :  { %9302 = vmatprep.mubr.msk.f32.mxu0 %vm10120_vm15, %v10119_v47 }
0x13db   :  { %v9296_v45 = vpop.f32.mrb[38].mxu0 }
0x13dc   :  { %v10941_v46 = vadd.f32 %v9296_v45, %v8660_v28  ;;  %v4227_v48 = vpop.f32.mrb[39].mxu0 }
0x13dd   :  { %v10943_v8 = vadd.f32 %v8660_v28, %v4227_v48 }
0x13de   :  { %4324 = vrot.lane.b32.xlu1 %v10941_v46, %s10121_s5 }
0x13df   :  { %4247 = vrot.lane.b32.xlu0 %v10943_v8, %s10121_s5 }
0x13e6   :  { %v9299_v18 = vpop.f32.mrb[40].mxu0 }
0x13e7   :  { %v4237_v49 = vpop.f32.mrb[41].mxu0  ;;  %v10953_v51 = vadd.f32 %v9299_v18, %v8660_v28 }
0x13e8   :  { %v10949_v50 = vadd.f32 %v8660_v28, %v4237_v49 }
0x13ea   :  { %4401 = vrot.lane.b32.xlu1 %v10949_v50, %s10121_s5 }
0x13ee   :  { %4478 = vrot.lane.b32.xlu1 %v10953_v51, %s10121_s5  ;;  %s11490_s5 = sld [smem:[#allocation28_spill]] }
0x1450   :  { %v4325_v53 = vpop.permute.xlu1 %4324 }
0x1451   :  { %v4248_v52 = vpop.permute.xlu0 %4247 }
0x1452   :  { %9301 = vmatpush3.xpose.msk.msra.mxu0 %vm647_vm0, %v4248_v52 }
0x1453   :  { %9305 = vmatprep.subr.mxu0 %v10119_v47 }
0x1455   :  { %9303 = vmatmul.mubr.msk.f32.vlgmr.msra.gmra.mrb[42].mxu0 %vm647_vm0, %v10943_v8 }
0x1456   :  { %9306 = vmatpush3.xpose.msk.msra.mxu0 %vm647_vm0, %v4325_v53  ;;  %9307 = vmatprep.mubr.msk.f32.mxu0 %vm10120_vm15, %v10119_v47 }
0x1457   :  { %9310 = vmatprep.subr.mxu0 %v10119_v47 }
0x1459   :  { %9308 = vmatmul.mubr.msk.f32.vlgmr.msra.gmra.mrb[44].mxu0 %vm647_vm0, %v10941_v46 }
0x145a   :  { %9312 = vmatprep.mubr.msk.f32.mxu0 %vm10120_vm15, %v10119_v47 }
0x145c   :  { %v4402_v54 = vpop.permute.xlu1 %4401 }
0x145d   :  { %9311 = vmatpush3.xpose.msk.msra.mxu0 %vm647_vm0, %v4402_v54 }
0x145e   :  { %9315 = vmatprep.subr.mxu0 %v10119_v47 }
0x1460   :  { %9313 = vmatmul.mubr.msk.f32.vlgmr.msra.gmra.mrb[46].mxu0 %vm647_vm0, %v10949_v50  ;;  %v4479_v55 = vpop.permute.xlu1 %4478 }
0x1461   :  { %9316 = vmatpush3.xpose.msk.msra.mxu0 %vm647_vm0, %v4479_v55  ;;  %9317 = vmatprep.mubr.msk.f32.mxu0 %vm10120_vm15, %v10119_v47 }
0x1462   :  { %9320 = vmatprep.subr.mxu0 %v10119_v47 }
0x1464   :  { %9318 = vmatmul.mubr.msk.f32.vlgmr.msra.gmra.mrb[48].mxu0 %vm647_vm0, %v10953_v51 }
0x1465   :  { %9322 = vmatprep.mubr.msk.f32.mxu0 %vm10120_vm15, %v10119_v47 }
0x1528   :  { %v4319_v56 = vpop.f32.mrb[42].mxu0 }
0x1529   :  { %v9304_v57 = vpop.f32.mrb[43].mxu0  ;;  %v4554_v5 = vmul.f32 0.35355338, %v4319_v56 }
0x152b   :  { %v4558_v7 = vsel %vm643_vm1, %v4554_v5, -1e+30 }
0x152c   :  { %v4396_v58 = vpop.f32.mrb[44].mxu0  ;;  %v4562_v10 = vsel %vm647_vm0, %v4558_v7, -inf }
0x152d   :  { %v4555_v59 = vmul.f32 0.35355338, %v4396_v58  ;;  %v9309_v61 = vpop.f32.mrb[45].mxu0 }
0x152f   :  { %v4559_v63 = vsel %vm643_vm1, %v4555_v59, -1e+30 }
0x1530   :  { %v4565_v1 = vsel %vm647_vm0, %v4559_v63, -inf }
0x1531   :  { %4566 = vmax.xlane.f32.xlu0 %v4565_v1 }
0x1533   :  { %v4473_v2 = vpop.f32.mrb[46].mxu0 }
0x1534   :  { %v9314_v3 = vpop.f32.mrb[47].mxu0  ;;  %v4556_v12 = vmul.f32 0.35355338, %v4473_v2 }
0x1536   :  { %v4560_v19 = vsel %vm643_vm1, %v4556_v12, -1e+30 }
0x1537   :  { %v4550_v9 = vpop.f32.mrb[48].mxu0  ;;  %v4568_v20 = vsel %vm647_vm0, %v4560_v19, -inf }
0x1538   :  { %v4557_v11 = vmul.f32 0.35355338, %v4550_v9  ;;  %v9319_v13 = vpop.f32.mrb[49].mxu0 }
0x153a   :  { %v4561_v14 = vsel %vm643_vm1, %v4557_v11, -1e+30 }
0x153b   :  { %v4571_v17 = vsel %vm647_vm0, %v4561_v14, -inf }
0x153c   :  { %4572 = vmax.xlane.f32.xlu1 %v4571_v17 }
0x154d   :  { %4834 = vrot.lane.b32.xlu1 %v10953_v51, %s10124_s17 }
0x1551   :  { %4991 = vrot.lane.b32.xlu1 %v10941_v46, %s10122_s9 }
0x1555   :  { %4989 = vrot.lane.b32.xlu1 %v10941_v46, %s10123_s13 }
0x1559   :  { %5145 = vrot.lane.b32.xlu1 %v10953_v51, %s10123_s13 }
0x157d   :  { %4569 = vmax.xlane.f32.xlu1 %v4568_v20 }
0x158e   :  { %4758 = vrot.lane.b32.xlu1 %v10949_v50, %s10124_s17 }
0x1592   :  { %4913 = vrot.lane.b32.xlu1 %v10943_v8, %s10122_s9 }
0x1596   :  { %4911 = vrot.lane.b32.xlu1 %v10943_v8, %s10123_s13 }
0x159a   :  { %5067 = vrot.lane.b32.xlu1 %v10949_v50, %s10123_s13  ;;  %s11492_s13 = sld [smem:[#allocation27_spill]] }
0x15be   :  { %v4567_v21 = vpop.xlane.xlu0 %4566 }
0x15bf   :  { %v4575_v23 = vsub.f32 %v4559_v63, %v4567_v21 }
0x15c1   :  { %v4580_v60 = vmul.f32 1.442695, %v4575_v23 }
0x15c3   :  { %9927 = vpow2.f32 %v4580_v60 }
0x15c9   :  { %v4573_v25 = vpop.xlane.xlu1 %4572 }
0x15ca   :  { %v4577_v15 = vsub.f32 %v4561_v14, %v4573_v25 }
0x15cc   :  { %v4584_v16 = vmul.f32 1.442695, %v4577_v15 }
0x15cd   :  { %v9928_v26 = vpop.eup %9927  ;;  %v4835_v34 = vpop.permute.xlu1 %4834 }
0x15ce   :  { %9929 = vpow2.f32 %v4584_v16  ;;  %v4589_v29 = vsel %vm647_vm0, %v9928_v26, 0.0 }
0x15cf   :  { %4590 = vadd.xlane.f32.xlu0 %v4589_v29 }
0x15d1   :  { %v4992_v39 = vpop.permute.xlu1 %4991 }
0x15d5   :  { %v4990_v43 = vpop.permute.xlu1 %4989 }
0x15d8   :  { %v9930_v31 = vpop.eup %9929 }
0x15d9   :  { %v4595_v62 = vsel %vm647_vm0, %v9930_v31, 0.0  ;;  %v5146_v24 = vpop.permute.xlu1 %5145 }
0x15da   :  { %4596 = vadd.xlane.f32.xlu0 %v4595_v62 }
0x15f0   :  { %4682 = vrot.lane.b32.xlu0 %v10941_v46, %s10124_s17 }
0x15f4   :  { %5147 = vrot.lane.b32.xlu0 %v10953_v51, %s10122_s9 }
0x160a   :  { %v4570_v27 = vpop.xlane.xlu1 %4569 }
0x160b   :  { %v4576_v28 = vsub.f32 %v4560_v19, %v4570_v27 }
0x160d   :  { %v4582_v18 = vmul.f32 1.442695, %v4576_v28 }
0x160e   :  { %v4759_v63 = vpop.permute.xlu1 %4758 }
0x1612   :  { %v4914_v12 = vpop.permute.xlu1 %4913 }
0x1613   :  { %4563 = vmax.xlane.f32.xlu0 %v4562_v10 }
0x1616   :  { %v4912_v16 = vpop.permute.xlu1 %4911 }
0x165c   :  { %v4591_v32 = vpop.xlane.xlu0 %4590 }
0x165d   :  { %9931 = vrcp.f32 %v4591_v32 }
0x1667   :  { %v4597_v33 = vpop.xlane.xlu0 %4596  ;;  %v9932_v30 = vpop.eup %9931 }
0x1668   :  { %9933 = vrcp.f32 %v4597_v33  ;;  %v4603_v35 = vmul.f32 %v9932_v30, %v9928_v26 }
0x166b   :  { %v4683_v38 = vpop.permute.xlu0 %4682 }
0x166c   :  { %9326 = vmatpush3.msra.mxu1 %v4683_v38 }
0x166d   :  { %9328 = vmatmul.mubr.msk.f32.vlgmr.msra.gmra.mrb[50].mxu1 %vm647_vm0, %v4603_v35  ;;  %9335 = vmatprep.subr.mxu1 %v10119_v47 }
0x166e   :  { %9336 = vmatpush3.msra.mxu1 %v4835_v34  ;;  %9337 = vmatprep.mubr.msk.f32.mxu1 %vm10120_vm15, %v10119_v47 }
0x166f   :  { %9345 = vmatprep.subr.mxu1 %v10119_v47  ;;  %v5148_v4 = vpop.permute.xlu0 %5147 }
0x1672   :  { %v9934_v40 = vpop.eup %9933 }
0x1673   :  { %v4605_v41 = vmul.f32 %v9934_v40, %v9930_v31  ;;  %v5068_v31 = vpop.permute.xlu1 %5067 }
0x1675   :  { %9338 = vmatmul.mubr.msk.f32.vlgmr.msra.gmra.mrb[52].mxu1 %vm647_vm0, %v4605_v41 }
0x1676   :  { %9346 = vmatpush3.xpose.msk.msra.mxu1 %vm647_vm0, %v4992_v39  ;;  %9347 = vmatprep.mubr.msk.f32.mxu1 %vm10120_vm15, %v10119_v47 }
0x1677   :  { %9355 = vmatprep.subr.mxu1 %v10119_v47 }
0x1679   :  { %9348 = vmatmul.mubr.msk.f32.vlgmr.msra.gmra.mrb[54].mxu1 %vm647_vm0, %v4990_v43 }
0x167a   :  { %9356 = vmatpush3.xpose.msk.msra.mxu1 %vm647_vm0, %v5148_v4  ;;  %9357 = vmatprep.mubr.msk.f32.mxu1 %vm10120_vm15, %v10119_v47 }
0x167b   :  { %9365 = vmatprep.subr.mxu1 %v10119_v47 }
0x167d   :  { %9358 = vmatmul.mubr.msk.f32.vlgmr.msra.gmra.mrb[56].mxu1 %vm647_vm0, %v5146_v24 }
0x167e   :  { %9367 = vmatprep.mubr.msk.f32.mxu1 %vm10120_vm15, %v10119_v47 }
0x16a0   :  { %v4564_v45 = vpop.xlane.xlu0 %4563 }
0x16a1   :  { %v4574_v48 = vsub.f32 %v4558_v7, %v4564_v45 }
0x16a3   :  { %v4578_v49 = vmul.f32 1.442695, %v4574_v48 }
0x16a5   :  { %9935 = vpow2.f32 %v4578_v49 }
0x16a6   :  { %9937 = vpow2.f32 %v4582_v18 }
0x16af   :  { %v9936_v52 = vpop.eup %9935 }
0x16b0   :  { %v4586_v53 = vsel %vm647_vm0, %v9936_v52, 0.0  ;;  %v9938_v54 = vpop.eup %9937 }
0x16b1   :  { %4587 = vadd.xlane.f32.xlu0 %v4586_v53  ;;  %v4592_v55 = vsel %vm647_vm0, %v9938_v54, 0.0 }
0x16b5   :  { %4593 = vadd.xlane.f32.xlu0 %v4592_v55 }
0x16cb   :  { %4606 = vrot.lane.b32.xlu0 %v10943_v8, %s10124_s17  ;;  %s11493_s17 = sld [smem:[#allocation31_spill]] }
0x16cf   :  { %5069 = vrot.lane.b32.xlu0 %v10949_v50, %s10122_s9  ;;  %s11491_s9 = sld [smem:[#allocation26_spill]] }
0x173e   :  { %v4588_v56 = vpop.xlane.xlu0 %4587 }
0x173f   :  { %9939 = vrcp.f32 %v4588_v56 }
0x1740   :  { %v11039_v57 = vpop.f32.mrb[50].mxu1 }
0x1741   :  { %v9329_v58 = vpop.f32.mrb[51].mxu1 }
0x1742   :  { %v4594_v59 = vpop.xlane.xlu0 %4593 }
0x1743   :  { %9941 = vrcp.f32 %v4594_v59 }
0x1746   :  { %v4607_v61 = vpop.permute.xlu0 %4606 }
0x1747   :  { %9321 = vmatpush3.msra.mxu0 %v4607_v61 }
0x1748   :  { %v11041_v1 = vpop.f32.mrb[52].mxu1  ;;  %9330 = vmatprep.subr.mxu0 %v10119_v47 }
0x1749   :  { %v9940_v2 = vpop.eup %9939  ;;  %v9339_v3 = vpop.f32.mrb[53].mxu1 }
0x174a   :  { %v4602_v9 = vmul.f32 %v9940_v2, %v9936_v52  ;;  %v5070_v29 = vpop.permute.xlu0 %5069 }
0x174c   :  { %9323 = vmatmul.mubr.msk.f32.vlgmr.msra.gmra.mrb[50].mxu0 %vm647_vm0, %v4602_v9  ;;  %v5063_v11 = vpop.f32.mrb[54].mxu1 }
0x174d   :  { %v9942_v13 = vpop.eup %9941  ;;  %9331 = vmatpush3.msra.mxu0 %v4759_v63  ;;  %v5224_v14 = vmul.f32 0.35355338, %v5063_v11  ;;  %v9349_v17 = vpop.f32.mrb[55].mxu1  ;;  %9332 = vmatprep.mubr.msk.f32.mxu0 %vm10120_vm15, %v10119_v47 }
0x174e   :  { %v4604_v19 = vmul.f32 %v9942_v13, %v9938_v54  ;;  %9340 = vmatprep.subr.mxu0 %v10119_v47 }
0x174f   :  { %v5228_v20 = vsel %vm643_vm1, %v5224_v14, -1e+30 }
0x1750   :  { %9333 = vmatmul.mubr.msk.f32.vlgmr.msra.gmra.mrb[52].mxu0 %vm647_vm0, %v4604_v19  ;;  %v5219_v21 = vpop.f32.mrb[56].mxu1  ;;  %v5234_v23 = vsel %vm647_vm0, %v5228_v20, -inf }
0x1751   :  { %v5226_v60 = vmul.f32 0.35355338, %v5219_v21  ;;  %v9359_v25 = vpop.f32.mrb[57].mxu1  ;;  %5235 = vmax.xlane.f32.xlu0 %v5234_v23  ;;  %9342 = vmatprep.mubr.msk.f32.mxu0 %vm10120_vm15, %v10119_v47 }
0x1753   :  { %v5230_v15 = vsel %vm643_vm1, %v5226_v60, -1e+30 }
0x1754   :  { %9341 = vmatpush3.xpose.msk.msra.mxu0 %vm647_vm0, %v4914_v12  ;;  %v5240_v26 = vsel %vm647_vm0, %v5230_v15, -inf }
0x1755   :  { %5241 = vmax.xlane.f32.xlu1 %v5240_v26  ;;  %9350 = vmatprep.subr.mxu0 %v10119_v47 }
0x1757   :  { %9343 = vmatmul.mubr.msk.f32.vlgmr.msra.gmra.mrb[54].mxu0 %vm647_vm0, %v4912_v16 }
0x1758   :  { %9351 = vmatpush3.xpose.msk.msra.mxu0 %vm647_vm0, %v5070_v29  ;;  %9352 = vmatprep.mubr.msk.f32.mxu0 %vm10120_vm15, %v10119_v47 }
0x1759   :  { %9360 = vmatprep.subr.mxu0 %v10119_v47 }
0x175b   :  { %9353 = vmatmul.mubr.msk.f32.vlgmr.msra.gmra.mrb[56].mxu0 %vm647_vm0, %v5068_v31 }
0x175c   :  { %9362 = vmatprep.mubr.msk.f32.mxu0 %vm10120_vm15, %v10119_v47 }
0x1766   :  { %5503 = vrot.lane.b32.xlu1 %v10953_v51, %s10125_s21 }
0x176a   :  { %5776 = vrot.lane.b32.xlu1 %v10943_v8, %s10126_s25 }
0x176e   :  { %5774 = vrot.lane.b32.xlu1 %v10943_v8, %s10127_s29 }
0x1772   :  { %5852 = vrot.lane.b32.xlu1 %v10941_v46, %s10127_s29 }
0x1776   :  { %5930 = vrot.lane.b32.xlu1 %v10949_v50, %s10127_s29 }
0x177a   :  { %6008 = vrot.lane.b32.xlu1 %v10953_v51, %s10127_s29  ;;  %s11496_s29 = sld [smem:[#allocation32_spill]] }
0x17de   :  { %v5236_v62 = vpop.xlane.xlu0 %5235 }
0x17df   :  { %v5244_v5 = vsub.f32 %v5228_v20, %v5236_v62 }
0x17e1   :  { %v5249_v7 = vmul.f32 1.442695, %v5244_v5 }
0x17e2   :  { %v5242_v10 = vpop.xlane.xlu1 %5241 }
0x17e3   :  { %9943 = vpow2.f32 %v5249_v7  ;;  %v5246_v32 = vsub.f32 %v5230_v15, %v5242_v10 }
0x17e5   :  { %v5253_v33 = vmul.f32 1.442695, %v5246_v32 }
0x17e6   :  { %v5504_v56 = vpop.permute.xlu1 %5503 }
0x17e7   :  { %9945 = vpow2.f32 %v5253_v33 }
0x17ea   :  { %v5777_v61 = vpop.permute.xlu1 %5776 }
0x17ed   :  { %v9944_v30 = vpop.eup %9943 }
0x17ee   :  { %v5258_v34 = vsel %vm647_vm0, %v9944_v30, 0.0  ;;  %v5775_v9 = vpop.permute.xlu1 %5774 }
0x17ef   :  { %5259 = vadd.xlane.f32.xlu0 %v5258_v34 }
0x17f1   :  { %v9946_v35 = vpop.eup %9945 }
0x17f2   :  { %v5264_v38 = vsel %vm647_vm0, %v9946_v35, 0.0  ;;  %v5853_v13 = vpop.permute.xlu1 %5852 }
0x17f3   :  { %5265 = vadd.xlane.f32.xlu0 %v5264_v38 }
0x17f6   :  { %v5931_v17 = vpop.permute.xlu1 %5930 }
0x17fa   :  { %v6009_v19 = vpop.permute.xlu1 %6008 }
0x1809   :  { %5351 = vrot.lane.b32.xlu0 %v10941_v46, %s10125_s21 }
0x180d   :  { %5854 = vrot.lane.b32.xlu0 %v10941_v46, %s10126_s25 }
0x1811   :  { %5932 = vrot.lane.b32.xlu0 %v10949_v50, %s10126_s25 }
0x1815   :  { %6010 = vrot.lane.b32.xlu0 %v10953_v51, %s10126_s25  ;;  %s11495_s25 = sld [smem:[#allocation30_spill]] }
0x181f   :  { %v11089_v39 = vpop.f32.mrb[50].mxu0 }
0x1820   :  { %v9324_v40 = vpop.f32.mrb[51].mxu0 }
0x1823   :  { %v11091_v41 = vpop.f32.mrb[52].mxu0 }
0x1824   :  { %v9334_v43 = vpop.f32.mrb[53].mxu0 }
0x182a   :  { %v4985_v4 = vpop.f32.mrb[54].mxu0 }
0x182b   :  { %v9344_v24 = vpop.f32.mrb[55].mxu0  ;;  %v5223_v27 = vmul.f32 0.35355338, %v4985_v4 }
0x182d   :  { %v5227_v18 = vsel %vm643_vm1, %v5223_v27, -1e+30 }
0x182e   :  { %v5141_v28 = vpop.f32.mrb[56].mxu0  ;;  %v5231_v53 = vsel %vm647_vm0, %v5227_v18, -inf }
0x182f   :  { %v5225_v45 = vmul.f32 0.35355338, %v5141_v28  ;;  %v9354_v48 = vpop.f32.mrb[57].mxu0 }
0x1831   :  { %v5229_v49 = vsel %vm643_vm1, %v5225_v45, -1e+30 }
0x1832   :  { %v5237_v52 = vsel %vm647_vm0, %v5229_v49, -inf }
0x1833   :  { %5238 = vmax.xlane.f32.xlu1 %v5237_v52 }
0x1834   :  { %5232 = vmax.xlane.f32.xlu0 %v5231_v53 }
0x1844   :  { %5427 = vrot.lane.b32.xlu1 %v10949_v50, %s10125_s21 }
0x187c   :  { %v5260_v54 = vpop.xlane.xlu0 %5259 }
0x187d   :  { %9947 = vrcp.f32 %v5260_v54 }
0x1880   :  { %v5266_v55 = vpop.xlane.xlu0 %5265 }
0x1881   :  { %9949 = vrcp.f32 %v5266_v55 }
0x1884   :  { %v5352_v58 = vpop.permute.xlu0 %5351 }
0x1885   :  { %9366 = vmatpush3.msra.mxu1 %v5352_v58 }
0x1886   :  { %9375 = vmatprep.subr.mxu1 %v10119_v47 }
0x1887   :  { %v9948_v59 = vpop.eup %9947 }
0x1888   :  { %v5272_v63 = vmul.f32 %v9948_v59, %v9944_v30  ;;  %v5855_v11 = vpop.permute.xlu0 %5854 }
0x188a   :  { %9368 = vmatmul.mubr.msk.f32.vlgmr.msra.gmra.mrb[58].mxu1 %vm647_vm0, %v5272_v63 }
0x188b   :  { %v9950_v2 = vpop.eup %9949  ;;  %9376 = vmatpush3.msra.mxu1 %v5504_v56  ;;  %9377 = vmatprep.mubr.msk.f32.mxu1 %vm10120_vm15, %v10119_v47 }
0x188c   :  { %v5274_v3 = vmul.f32 %v9950_v2, %v9946_v35  ;;  %9396 = vmatprep.subr.mxu1 %v10119_v47  ;;  %v5933_v14 = vpop.permute.xlu0 %5932 }
0x188e   :  { %9378 = vmatmul.mubr.msk.f32.vlgmr.msra.gmra.mrb[60].mxu1 %vm647_vm0, %v5274_v3 }
0x188f   :  { %9398 = vmatprep.mubr.msk.f32.mxu1 %vm10120_vm15, %v10119_v47 }
0x1890   :  { %v6011_v12 = vpop.permute.xlu0 %6010 }
0x1892   :  { %9397 = vmatpush3.xpose.msk.msra.mxu1 %vm647_vm0, %v5777_v61 }
0x1893   :  { %9401 = vmatprep.subr.mxu1 %v10119_v47 }
0x1895   :  { %9399 = vmatmul.mubr.msk.f32.vlgmr.msra.gmra.mrb[62].mxu1 %vm647_vm0, %v5775_v9 }
0x1896   :  { %9402 = vmatpush3.xpose.msk.msra.mxu1 %vm647_vm0, %v5855_v11  ;;  %9403 = vmatprep.mubr.msk.f32.mxu1 %vm10120_vm15, %v10119_v47  ;;  %v5579_v11 = vld [vmem:[%s11479_s18 + $0x8] sm:$0xff] }
0x1897   :  { %9406 = vmatprep.subr.mxu1 %v10119_v47 }
0x1899   :  { %9404 = vmatmul.mubr.msk.f32.vlgmr.msra.gmra.mrb[64].mxu1 %vm647_vm0, %v5853_v13  ;;  %v4910_v13 = vld [vmem:[%s11479_s18] sm:$0xff] }
0x189a   :  { %9407 = vmatpush3.xpose.msk.msra.mxu1 %vm647_vm0, %v5933_v14  ;;  %9408 = vmatprep.mubr.msk.f32.mxu1 %vm10120_vm15, %v10119_v47 }
0x189b   :  { %9411 = vmatprep.subr.mxu1 %v10119_v47 }
0x189d   :  { %9409 = vmatmul.mubr.msk.f32.vlgmr.msra.gmra.mrb[66].mxu1 %vm647_vm0, %v5931_v17 }
0x189e   :  { %9412 = vmatpush3.xpose.msk.msra.mxu1 %vm647_vm0, %v6011_v12  ;;  %9413 = vmatprep.mubr.msk.f32.mxu1 %vm10120_vm15, %v10119_v47 }
0x189f   :  { %9421 = vmatprep.subr.mxu1 %v10119_v47 }
0x18a1   :  { %9414 = vmatmul.mubr.msk.f32.vlgmr.msra.gmra.mrb[68].mxu1 %vm647_vm0, %v6009_v19 }
0x18a2   :  { %9423 = vmatprep.mubr.msk.f32.mxu1 %vm10120_vm15, %v10119_v47 }
0x18c0   :  { %v5239_v20 = vpop.xlane.xlu1 %5238 }
0x18c1   :  { %v5245_v21 = vsub.f32 %v5229_v49, %v5239_v20  ;;  %v5233_v23 = vpop.xlane.xlu0 %5232 }
0x18c2   :  { %v5243_v60 = vsub.f32 %v5227_v18, %v5233_v23 }
0x18c3   :  { %v5251_v25 = vmul.f32 1.442695, %v5245_v21 }
0x18c4   :  { %v5247_v15 = vmul.f32 1.442695, %v5243_v60  ;;  %v5428_v28 = vpop.permute.xlu1 %5427 }
0x18c6   :  { %9951 = vpow2.f32 %v5247_v15 }
0x18c7   :  { %9953 = vpow2.f32 %v5251_v25 }
0x18d0   :  { %v9952_v16 = vpop.eup %9951 }
0x18d1   :  { %v5255_v26 = vsel %vm647_vm0, %v9952_v16, 0.0  ;;  %v9954_v29 = vpop.eup %9953 }
0x18d2   :  { %5256 = vadd.xlane.f32.xlu0 %v5255_v26  ;;  %v5261_v31 = vsel %vm647_vm0, %v9954_v29, 0.0 }
0x18d6   :  { %5262 = vadd.xlane.f32.xlu0 %v5261_v31 }
0x18ec   :  { %5275 = vrot.lane.b32.xlu0 %v10943_v8, %s10125_s21  ;;  %s11494_s21 = sld [smem:[#allocation29_spill]] }
0x195d   :  { %v11133_v62 = vpop.f32.mrb[58].mxu1 }
0x195e   :  { %v9369_v5 = vpop.f32.mrb[59].mxu1 }
0x195f   :  { %v5257_v7 = vpop.xlane.xlu0 %5256 }
0x1960   :  { %9955 = vrcp.f32 %v5257_v7 }
0x1961   :  { %v11135_v10 = vpop.f32.mrb[60].mxu1 }
0x1962   :  { %v9379_v32 = vpop.f32.mrb[61].mxu1 }
0x1963   :  { %v5263_v33 = vpop.xlane.xlu0 %5262 }
0x1964   :  { %9957 = vrcp.f32 %v5263_v33 }
0x1967   :  { %v5276_v30 = vpop.permute.xlu0 %5275 }
0x1968   :  { %v5848_v34 = vpop.f32.mrb[62].mxu1  ;;  %9361 = vmatpush3.msra.mxu0 %v5276_v30 }
0x1969   :  { %v6086_v35 = vmul.f32 0.35355338, %v5848_v34  ;;  %v9400_v38 = vpop.f32.mrb[63].mxu1  ;;  %9370 = vmatprep.subr.mxu0 %v10119_v47 }
0x196a   :  { %v9956_v40 = vpop.eup %9955 }
0x196b   :  { %v5271_v43 = vmul.f32 %v9956_v40, %v9952_v16  ;;  %v6090_v4 = vsel %vm643_vm1, %v6086_v35, -1e+30 }
0x196c   :  { %v5926_v24 = vpop.f32.mrb[64].mxu1  ;;  %v6094_v27 = vsel %vm647_vm0, %v6090_v4, -inf }
0x196d   :  { %v6087_v45 = vmul.f32 0.35355338, %v5926_v24  ;;  %v9405_v48 = vpop.f32.mrb[65].mxu1  ;;  %6095 = vmax.xlane.f32.xlu1 %v6094_v27  ;;  %9363 = vmatmul.mubr.msk.f32.vlgmr.msra.gmra.mrb[58].mxu0 %vm647_vm0, %v5271_v43  ;;  %v6442_v24 = vld [vmem:[%s11479_s18 + $0x10] sm:$0xff] }
0x196e   :  { %v9958_v18 = vpop.eup %9957  ;;  %9371 = vmatpush3.msra.mxu0 %v5428_v28  ;;  %9372 = vmatprep.mubr.msk.f32.mxu0 %vm10120_vm15, %v10119_v47 }
0x196f   :  { %v5273_v49 = vmul.f32 %v9958_v18, %v9954_v29  ;;  %v6091_v52 = vsel %vm643_vm1, %v6087_v45, -1e+30  ;;  %9380 = vmatprep.subr.mxu0 %v5579_v11 }
0x1970   :  { %v6004_v53 = vpop.f32.mrb[66].mxu1  ;;  %v6097_v54 = vsel %vm647_vm0, %v6091_v52, -inf }
0x1971   :  { %v6088_v55 = vmul.f32 0.35355338, %v6004_v53  ;;  %v9410_v56 = vpop.f32.mrb[67].mxu1  ;;  %6098 = vmax.xlane.f32.xlu0 %v6097_v54  ;;  %9373 = vmatmul.mubr.msk.f32.vlgmr.msra.gmra.mrb[60].mxu0 %vm647_vm0, %v5273_v49 }
0x1972   :  { %9381 = vmatpush3.msra.mxu0 %v5579_v11 }
0x1973   :  { %v6092_v58 = vsel %vm643_vm1, %v6088_v55, -1e+30  ;;  %9388 = vmatprep.subr.mxu0 %v4910_v13 }
0x1974   :  { %v6082_v59 = vpop.f32.mrb[68].mxu1  ;;  %v6100_v61 = vsel %vm647_vm0, %v6092_v58, -inf }
0x1975   :  { %v6089_v63 = vmul.f32 0.35355338, %v6082_v59  ;;  %v9415_v2 = vpop.f32.mrb[69].mxu1  ;;  %6101 = vmax.xlane.f32.xlu0 %v6100_v61 }
0x1977   :  { %v6093_v3 = vsel %vm643_vm1, %v6089_v63, -1e+30 }
0x1978   :  { %v6103_v9 = vsel %vm647_vm0, %v6093_v3, -inf }
0x1979   :  { %6104 = vmax.xlane.f32.xlu1 %v6103_v9 }
0x19fa   :  { %v6096_v14 = vpop.xlane.xlu1 %6095 }
0x19fb   :  { %v6106_v17 = vsub.f32 %v6090_v4, %v6096_v14 }
0x19fd   :  { %v6110_v12 = vmul.f32 1.442695, %v6106_v17 }
0x19fe   :  { %v6099_v19 = vpop.xlane.xlu0 %6098 }
0x19ff   :  { %9959 = vpow2.f32 %v6110_v12  ;;  %v6107_v20 = vsub.f32 %v6091_v52, %v6099_v19 }
0x1a01   :  { %v6112_v21 = vmul.f32 1.442695, %v6107_v20 }
0x1a02   :  { %v6102_v23 = vpop.xlane.xlu0 %6101 }
0x1a03   :  { %9961 = vpow2.f32 %v6112_v21  ;;  %v6108_v60 = vsub.f32 %v6092_v58, %v6102_v23 }
0x1a05   :  { %v6114_v25 = vmul.f32 1.442695, %v6108_v60 }
0x1a06   :  { %v6105_v7 = vpop.xlane.xlu1 %6104 }
0x1a07   :  { %9963 = vpow2.f32 %v6114_v25  ;;  %v6109_v32 = vsub.f32 %v6093_v3, %v6105_v7 }
0x1a09   :  { %v9960_v15 = vpop.eup %9959  ;;  %v6116_v33 = vmul.f32 1.442695, %v6109_v32 }
0x1a0a   :  { %v6118_v16 = vsel %vm647_vm0, %v9960_v15, 0.0 }
0x1a0b   :  { %6119 = vadd.xlane.f32.xlu0 %v6118_v16  ;;  %9965 = vpow2.f32 %v6116_v33 }
0x1a0d   :  { %v9962_v26 = vpop.eup %9961 }
0x1a0e   :  { %v6121_v29 = vsel %vm647_vm0, %v9962_v26, 0.0 }
0x1a0f   :  { %6122 = vadd.xlane.f32.xlu1 %v6121_v29 }
0x1a11   :  { %v9964_v31 = vpop.eup %9963 }
0x1a12   :  { %v6124_v5 = vsel %vm647_vm0, %v9964_v31, 0.0 }
0x1a13   :  { %6125 = vadd.xlane.f32.xlu0 %v6124_v5 }
0x1a15   :  { %v9966_v35 = vpop.eup %9965 }
0x1a16   :  { %v6127_v43 = vsel %vm647_vm0, %v9966_v35, 0.0 }
0x1a20   :  { %6214 = vrot.lane.b32.xlu1 %v10941_v46, %s10128_s3 }
0x1a24   :  { %6290 = vrot.lane.b32.xlu1 %v10949_v50, %s10128_s3 }
0x1a29   :  { %6138 = vrot.lane.b32.xlu0 %v10943_v8, %s10128_s3 }
0x1a2d   :  { %6546 = vrot.lane.b32.xlu0 %v10943_v8, %s10129_s8 }
0x1a31   :  { %6624 = vrot.lane.b32.xlu0 %v10941_v46, %s10129_s8 }
0x1a35   :  { %6702 = vrot.lane.b32.xlu0 %v10949_v50, %s10129_s8 }
0x1a39   :  { %6700 = vrot.lane.b32.xlu0 %v10949_v50, %s10130_s12 }
0x1a40   :  { %v5347_v30 = vpop.f32.mrb[58].mxu0 }
0x1a41   :  { %v9364_v34 = vpop.f32.mrb[59].mxu0  ;;  %9382 = vmatprep.mubr.msk.f32.mxu0 %vm647_vm0, %v5347_v30 }
0x1a42   :  { %9383 = vmatmul.mubr.msk.f32.vlgmr.msra.gmra.mrb[62].mxu0 %vm647_vm0, %v11133_v62 }
0x1a43   :  { %9389 = vmatpush3.msra.mxu0 %v4910_v13 }
0x1a44   :  { %v5499_v38 = vpop.f32.mrb[60].mxu0  ;;  %9416 = vmatprep.subr.mxu0 %v10119_v47 }
0x1a45   :  { %v9374_v40 = vpop.f32.mrb[61].mxu0  ;;  %9385 = vmatprep.mubr.msk.f32.mxu0 %vm647_vm0, %v5499_v38 }
0x1a46   :  { %9386 = vmatmul.mubr.msk.f32.gmra.mrb[64].mxu0 %vm647_vm0, %v11135_v10 }
0x1a47   :  { %9390 = vmatprep.mubr.msk.f32.mxu0 %vm647_vm0, %v11089_v39 }
0x1a48   :  { %6128 = vadd.xlane.f32.xlu1 %v6127_v43 }
0x1a4a   :  { %9391 = vmatmul.mubr.msk.f32.vlgmr.msra.gmra.mrb[62].mxu0 %vm647_vm0, %v11039_v57 }
0x1a4b   :  { %9393 = vmatprep.mubr.msk.f32.mxu0 %vm647_vm0, %v11091_v41 }
0x1a4e   :  { %9394 = vmatmul.mubr.msk.f32.gmra.mrb[64].mxu0 %vm647_vm0, %v11041_v1 }
0x1a4f   :  { %9418 = vmatprep.mubr.msk.f32.mxu0 %vm10120_vm15, %v10119_v47 }
0x1a59   :  { %6366 = vrot.lane.b32.xlu1 %v10953_v51, %s10128_s3  ;;  %s10133_s3 = smov 16  }
0x1a5d   :  { %6544 = vrot.lane.b32.xlu1 %v10943_v8, %s10130_s12 }
0x1a61   :  { %6622 = vrot.lane.b32.xlu1 %v10941_v46, %s10130_s12 }
0x1a65   :  { %6780 = vrot.lane.b32.xlu1 %v10953_v51, %s10129_s8 }
0x1a69   :  { %6778 = vrot.lane.b32.xlu1 %v10953_v51, %s10130_s12 }
0x1a98   :  { %v6120_v57 = vpop.xlane.xlu0 %6119 }
0x1a99   :  { %9967 = vrcp.f32 %v6120_v57 }
0x1a9c   :  { %v6123_v1 = vpop.xlane.xlu1 %6122 }
0x1a9d   :  { %9969 = vrcp.f32 %v6123_v1 }
0x1aa0   :  { %v6126_v39 = vpop.xlane.xlu0 %6125  ;;  %v6215_v41 = vpop.permute.xlu1 %6214 }
0x1aa1   :  { %9971 = vrcp.f32 %v6126_v39  ;;  %9422 = vmatpush3.msra.mxu1 %v6215_v41 }
0x1aa2   :  { %9431 = vmatprep.subr.mxu1 %v10119_v47 }
0x1aa3   :  { %v9968_v62 = vpop.eup %9967 }
0x1aa4   :  { %v6134_v10 = vmul.f32 %v9968_v62, %v9960_v15  ;;  %v6139_v4 = vpop.permute.xlu0 %6138  ;;  %v6291_v27 = vpop.permute.xlu1 %6290 }
0x1aa5   :  { %9417 = vmatpush3.msra.mxu0 %v6139_v4 }
0x1aa6   :  { %9419 = vmatmul.mubr.msk.f32.vlgmr.msra.gmra.mrb[66].mxu0 %vm647_vm0, %v6134_v10  ;;  %9426 = vmatprep.subr.mxu0 %v10119_v47 }
0x1aa7   :  { %v9970_v28 = vpop.eup %9969  ;;  %9427 = vmatpush3.msra.mxu0 %v6291_v27  ;;  %9428 = vmatprep.mubr.msk.f32.mxu0 %vm10120_vm15, %v10119_v47 }
0x1aa8   :  { %v6135_v45 = vmul.f32 %v9970_v28, %v9962_v26  ;;  %9436 = vmatprep.subr.mxu0 %v6442_v24  ;;  %v6547_v55 = vpop.permute.xlu0 %6546 }
0x1aaa   :  { %9424 = vmatmul.mubr.msk.f32.vlgmr.msra.gmra.mrb[70].mxu1 %vm647_vm0, %v6135_v45 }
0x1aab   :  { %v9972_v48 = vpop.eup %9971  ;;  %9433 = vmatprep.mubr.msk.f32.mxu1 %vm10120_vm15, %v10119_v47 }
0x1aac   :  { %v6136_v18 = vmul.f32 %v9972_v48, %v9964_v31  ;;  %v6625_v59 = vpop.permute.xlu0 %6624 }
0x1aae   :  { %9429 = vmatmul.mubr.msk.f32.vlgmr.msra.gmra.mrb[68].mxu0 %vm647_vm0, %v6136_v18 }
0x1aaf   :  { %9437 = vmatpush3.msra.mxu0 %v6442_v24 }
0x1ab0   :  { %9454 = vmatprep.subr.mxu0 %v10119_v47  ;;  %v6703_v11 = vpop.permute.xlu0 %6702 }
0x1ab4   :  { %v6701_v20 = vpop.permute.xlu0 %6700 }
0x1ad5   :  { %v6129_v49 = vpop.xlane.xlu1 %6128 }
0x1ad6   :  { %9973 = vrcp.f32 %v6129_v49 }
0x1ad9   :  { %v6367_v52 = vpop.permute.xlu1 %6366 }
0x1ada   :  { %9432 = vmatpush3.msra.mxu1 %v6367_v52 }
0x1adb   :  { %9444 = vmatprep.subr.mxu1 %v10119_v47 }
0x1add   :  { %v6545_v53 = vpop.permute.xlu1 %6544 }
0x1ae0   :  { %v9974_v54 = vpop.eup %9973 }
0x1ae1   :  { %v6137_v56 = vmul.f32 %v9974_v54, %v9966_v35  ;;  %v6623_v58 = vpop.permute.xlu1 %6622 }
0x1ae3   :  { %9434 = vmatmul.mubr.msk.f32.vlgmr.msra.gmra.mrb[72].mxu1 %vm647_vm0, %v6137_v56 }
0x1ae4   :  { %9445 = vmatpush3.xpose.msk.msra.mxu1 %vm647_vm0, %v6547_v55  ;;  %9446 = vmatprep.mubr.msk.f32.mxu1 %vm10120_vm15, %v10119_v47 }
0x1ae5   :  { %9449 = vmatprep.subr.mxu1 %v10119_v47  ;;  %v6781_v61 = vpop.permute.xlu1 %6780 }
0x1ae7   :  { %9447 = vmatmul.mubr.msk.f32.vlgmr.msra.gmra.mrb[74].mxu1 %vm647_vm0, %v6545_v53 }
0x1ae8   :  { %9450 = vmatpush3.xpose.msk.msra.mxu1 %vm647_vm0, %v6625_v59  ;;  %9451 = vmatprep.mubr.msk.f32.mxu1 %vm10120_vm15, %v10119_v47 }
0x1ae9   :  { %9459 = vmatprep.subr.mxu1 %v10119_v47  ;;  %v6779_v63 = vpop.permute.xlu1 %6778 }
0x1aeb   :  { %9452 = vmatmul.mubr.msk.f32.vlgmr.msra.gmra.mrb[76].mxu1 %vm647_vm0, %v6623_v58 }
0x1aec   :  { %9460 = vmatpush3.xpose.msk.msra.mxu1 %vm647_vm0, %v6781_v61  ;;  %9461 = vmatprep.mubr.msk.f32.mxu1 %vm10120_vm15, %v10119_v47 }
0x1aed   :  { %9469 = vmatprep.subr.mxu1 %v10119_v47 }
0x1aef   :  { %9462 = vmatmul.mubr.msk.f32.vlgmr.msra.gmra.mrb[78].mxu1 %vm647_vm0, %v6779_v63 }
0x1af0   :  { %9471 = vmatprep.mubr.msk.f32.mxu1 %vm10120_vm15, %v10119_v47 }
0x1b79   :  { %v6210_v2 = vpop.f32.mrb[66].mxu0 }
0x1b7a   :  { %v9420_v3 = vpop.f32.mrb[67].mxu0  ;;  %9438 = vmatprep.mubr.msk.f32.mxu0 %vm647_vm0, %v6210_v2 }
0x1b7d   :  { %v6286_v9 = vpop.f32.mrb[70].mxu1 }
0x1b7e   :  { %v9425_v13 = vpop.f32.mrb[71].mxu1  ;;  %9439 = vmatmul.mubr.msk.f32.vlgmr.msra.gmra.mrb[62].mxu0 %vm647_vm0, %v6286_v9 }
0x1b7f   :  { %9455 = vmatpush3.xpose.msk.msra.mxu0 %vm647_vm0, %v6703_v11 }
0x1b80   :  { %9464 = vmatprep.subr.mxu0 %v10119_v47 }
0x1b81   :  { %v6362_v14 = vpop.f32.mrb[68].mxu0 }
0x1b82   :  { %v9430_v17 = vpop.f32.mrb[69].mxu0  ;;  %9441 = vmatprep.mubr.msk.f32.mxu0 %vm647_vm0, %v6362_v14 }
0x1bb6   :  { %v6438_v12 = vpop.f32.mrb[72].mxu1 }
0x1bb7   :  { %v9435_v19 = vpop.f32.mrb[73].mxu1  ;;  %9442 = vmatmul.mubr.msk.f32.gmra.mrb[64].mxu0 %vm647_vm0, %v6438_v12 }
0x1bb8   :  { %9456 = vmatprep.mubr.msk.f32.mxu0 %vm10120_vm15, %v10119_v47 }
0x1bba   :  { %v6618_v21 = vpop.f32.mrb[74].mxu1 }
0x1bbb   :  { %v6856_v23 = vmul.f32 0.35355338, %v6618_v21  ;;  %v9448_v60 = vpop.f32.mrb[75].mxu1  ;;  %9457 = vmatmul.mubr.msk.f32.vlgmr.msra.gmra.mrb[70].mxu0 %vm647_vm0, %v6701_v20  ;;  %v7212_v20 = vld [vmem:[%s11479_s18 + $0x18] sm:$0xff] }
0x1bbc   :  { %9466 = vmatprep.mubr.msk.f32.mxu0 %vm10120_vm15, %v10119_v47 }
0x1bbd   :  { %v6860_v25 = vsel %vm643_vm1, %v6856_v23, -1e+30 }
0x1bbe   :  { %v6696_v15 = vpop.f32.mrb[76].mxu1  ;;  %v6864_v16 = vsel %vm647_vm0, %v6860_v25, -inf }
0x1bbf   :  { %v6857_v26 = vmul.f32 0.35355338, %v6696_v15  ;;  %6865 = vmax.xlane.f32.xlu0 %v6864_v16  ;;  %v9453_v29 = vpop.f32.mrb[77].mxu1 }
0x1bc1   :  { %v6861_v31 = vsel %vm643_vm1, %v6857_v26, -1e+30 }
0x1bc2   :  { %v6852_v5 = vpop.f32.mrb[78].mxu1  ;;  %v6867_v7 = vsel %vm647_vm0, %v6861_v31, -inf }
0x1bc3   :  { %6868 = vmax.xlane.f32.xlu1 %v6867_v7  ;;  %v9463_v32 = vpop.f32.mrb[79].mxu1  ;;  %v6859_v39 = vmul.f32 0.35355338, %v6852_v5  ;;  %v8729_v5 = vld [vmem:[%s11480_s22] ss:$0 sm:$0xff] }
0x1bc5   :  { %v6863_v24 = vsel %vm643_vm1, %v6859_v39, -1e+30 }
0x1bc6   :  { %v6873_v27 = vsel %vm647_vm0, %v6863_v24, -inf }
0x1c4c   :  { %v6866_v40 = vpop.xlane.xlu0 %6865 }
0x1c4d   :  { %v6876_v43 = vsub.f32 %v6860_v25, %v6866_v40 }
0x1c4f   :  { %v6880_v57 = vmul.f32 1.442695, %v6876_v43 }
0x1c50   :  { %v6869_v33 = vpop.xlane.xlu1 %6868 }
0x1c51   :  { %v6877_v30 = vsub.f32 %v6861_v31, %v6869_v33 }
0x1c53   :  { %v6882_v34 = vmul.f32 1.442695, %v6877_v30 }
0x1c55   :  { %9975 = vpow2.f32 %v6882_v34 }
0x1c56   :  { %9977 = vpow2.f32 %v6880_v57 }
0x1c5f   :  { %v9976_v35 = vpop.eup %9975 }
0x1c60   :  { %v6891_v38 = vsel %vm647_vm0, %v9976_v35, 0.0  ;;  %v9978_v28 = vpop.eup %9977 }
0x1c61   :  { %6892 = vadd.xlane.f32.xlu1 %v6891_v38  ;;  %v6888_v45 = vsel %vm647_vm0, %v9978_v28, 0.0 }
0x1c8e   :  { %v6774_v1 = vpop.f32.mrb[70].mxu0 }
0x1c8f   :  { %v6858_v41 = vmul.f32 0.35355338, %v6774_v1  ;;  %v9458_v62 = vpop.f32.mrb[71].mxu0 }
0x1c91   :  { %v6862_v10 = vsel %vm643_vm1, %v6858_v41, -1e+30 }
0x1c92   :  { %v6870_v4 = vsel %vm647_vm0, %v6862_v10, -inf }
0x1c93   :  { %6871 = vmax.xlane.f32.xlu0 %v6870_v4 }
0x1c97   :  { %6874 = vmax.xlane.f32.xlu0 %v6873_v27 }
0x1c9b   :  { %6889 = vadd.xlane.f32.xlu0 %v6888_v45 }
0x1cee   :  { %v6893_v61 = vpop.xlane.xlu1 %6892 }
0x1d20   :  { %v6872_v48 = vpop.xlane.xlu0 %6871 }
0x1d21   :  { %v6878_v18 = vsub.f32 %v6862_v10, %v6872_v48 }
0x1d23   :  { %v6884_v49 = vmul.f32 1.442695, %v6878_v18 }
0x1d24   :  { %v6875_v52 = vpop.xlane.xlu0 %6874 }
0x1d25   :  { %9979 = vpow2.f32 %v6884_v49  ;;  %v6879_v53 = vsub.f32 %v6863_v24, %v6875_v52 }
0x1d27   :  { %v6886_v54 = vmul.f32 1.442695, %v6879_v53 }
0x1d28   :  { %v6890_v59 = vpop.xlane.xlu0 %6889 }
0x1d29   :  { %9981 = vpow2.f32 %v6886_v54 }
0x1d2a   :  { %9983 = vrcp.f32 %v6890_v59 }
0x1d2b   :  { %9985 = vrcp.f32 %v6893_v61  ;;  %v7403_v61 = vld [vmem:[%s11481_s23] sm:$0xff] }
0x1d2f   :  { %v9980_v55 = vpop.eup %9979 }
0x1d30   :  { %v6894_v44 = vsel %vm647_vm0, %v9980_v55, 0.0 }
0x1d31   :  { %6895 = vadd.xlane.f32.xlu0 %v6894_v44 }
0x1d33   :  { %v9982_v56 = vpop.eup %9981 }
0x1d34   :  { %v6897_v58 = vsel %vm647_vm0, %v9982_v56, 0.0  ;;  %v9984_v2 = vpop.eup %9983 }
0x1d35   :  { %6898 = vadd.xlane.f32.xlu1 %v6897_v58  ;;  %v6904_v3 = vmul.f32 %v9984_v2, %v9978_v28 }
0x1d46   :  { %6984 = vrot.lane.b32.xlu1 %v10941_v46, %s10131_s27  ;;  %v9986_v46 = vpop.eup %9985 }
0x1d47   :  { %6908 = vrot.lane.b32.xlu0 %v10943_v8, %s10131_s27  ;;  %v6905_v8 = vmul.f32 %v9986_v46, %v9976_v35  ;;  %v7547_v46 = vld [vmem:[%s11482_s26] sm:$0xff] }
0x1d4a   :  { %7060 = vrot.lane.b32.xlu1 %v10949_v50, %s10131_s27 }
0x1d4e   :  { %7136 = vrot.lane.b32.xlu1 %v10953_v51, %s10131_s27 }
0x1dbe   :  { %v6896_v63 = vpop.xlane.xlu0 %6895 }
0x1dbf   :  { %9987 = vrcp.f32 %v6896_v63  ;;  %v7404_v63 = vld [vmem:[%s11481_s23 + $0x8] sm:$0xff] }
0x1dc0   :  { %v9685_v2 = vpack.c.bf16 %v7404_v63, %v7403_v61  ;;  %v7561_v61 = vld [vmem:[%s11482_s26 + $0x70] sm:$0xff]  ;;  %v7562_v63 = vld [vmem:[%s11482_s26 + $0x78] sm:$0xff] }
0x1dc2   :  { %v6899_v9 = vpop.xlane.xlu1 %6898  ;;  %v6909_v11 = vpop.permute.xlu0 %6908 }
0x1dc3   :  { %9989 = vrcp.f32 %v6899_v9  ;;  %9465 = vmatpush3.msra.mxu0 %v6909_v11  ;;  %v7406_v9 = vld [vmem:[%s11481_s23 + $0x18] sm:$0xff] }
0x1dc4   :  { %9467 = vmatmul.mubr.msk.f32.vlgmr.msra.gmra.mrb[72].mxu0 %vm647_vm0, %v6904_v3  ;;  %9474 = vmatprep.subr.mxu0 %v10119_v47  ;;  %v7405_v3 = vld [vmem:[%s11481_s23 + $0x10] sm:$0xff] }
0x1dc5   :  { %9476 = vmatprep.mubr.msk.f32.mxu0 %vm10120_vm15, %v10119_v47  ;;  %v9689_v11 = vpack.c.bf16 %v7406_v9, %v7405_v3  ;;  %v8732_v3 = vld [vmem:[%s11485_s2] ss:$0 sm:$0xff] }
0x1dc6   :  { %v6985_v50 = vpop.permute.xlu1 %6984 }
0x1dc7   :  { %9470 = vmatpush3.msra.mxu1 %v6985_v50 }
0x1dc8   :  { %9472 = vmatmul.mubr.msk.f32.vlgmr.msra.gmra.mrb[80].mxu1 %vm647_vm0, %v6905_v8  ;;  %9479 = vmatprep.subr.mxu1 %v10119_v47  ;;  %v7548_v8 = vld [vmem:[%s11482_s26 + $0x8] sm:$0xff] }
0x1dc9   :  { %v9988_v51 = vpop.eup %9987  ;;  %9481 = vmatprep.mubr.msk.f32.mxu1 %vm10120_vm15, %v10119_v47  ;;  %v9693_v50 = vpack.c.bf16 %v7548_v8, %v7547_v46 }
0x1dca   :  { %v6906_v13 = vmul.f32 %v9988_v51, %v9980_v55  ;;  %v7061_v14 = vpop.permute.xlu1 %7060 }
0x1dcb   :  { %9475 = vmatpush3.msra.mxu0 %v7061_v14 }
0x1dcc   :  { %9477 = vmatmul.mubr.msk.f32.vlgmr.msra.gmra.mrb[74].mxu0 %vm647_vm0, %v6906_v13  ;;  %9484 = vmatprep.subr.mxu0 %v7212_v20 }
0x1dcd   :  { %v9990_v17 = vpop.eup %9989  ;;  %9485 = vmatpush3.msra.mxu0 %v7212_v20 }
0x1dce   :  { %v6907_v12 = vmul.f32 %v9990_v17, %v9982_v56  ;;  %v7137_v19 = vpop.permute.xlu1 %7136  ;;  %9694 = vmatprep.subr.bf16.mxu0 %v9693_v50 }
0x1dcf   :  { %9480 = vmatpush3.msra.mxu1 %v7137_v19 }
0x1dd0   :  { %9482 = vmatmul.mubr.msk.f32.vlgmr.msra.gmra.mrb[82].mxu1 %vm647_vm0, %v6907_v12  ;;  %9686 = vmatprep.subr.bf16.mxu1 %v9685_v2 }
0x1dd1   :  { %9688 = vmatpush3.bf16.msra.mxu1 %v9685_v2  ;;  %v9721_v2 = vpack.c.bf16 %v7562_v63, %v7561_v61 }
0x1dd2   :  { %9690 = vmatprep.subr.bf16.mxu1 %v9689_v11 }
0x1dd5   :  { %9692 = vmatpush3.bf16.msra.mxu1 %v9689_v11 }
0x1dd6   :  { %9725 = vmatprep.subr.bf16.mxu1 %v10118_v0 }
0x1e97   :  { %v6980_v21 = vpop.f32.mrb[72].mxu0 }
0x1e98   :  { %v9468_v23 = vpop.f32.mrb[73].mxu0  ;;  %9486 = vmatprep.mubr.msk.f32.mxu0 %vm647_vm0, %v6980_v21 }
0x1e9b   :  { %v7056_v60 = vpop.f32.mrb[80].mxu1 }
0x1e9c   :  { %v9473_v25 = vpop.f32.mrb[81].mxu1  ;;  %9487 = vmatmul.mubr.msk.f32.vlgmr.msra.gmra.mrb[62].mxu0 %vm647_vm0, %v7056_v60 }
0x1e9d   :  { %9696 = vmatpush3.bf16.msra.mxu0 %v9693_v50 }
0x1e9f   :  { %v7132_v15 = vpop.f32.mrb[74].mxu0 }
0x1ea0   :  { %v9478_v16 = vpop.f32.mrb[75].mxu0  ;;  %9489 = vmatprep.mubr.msk.f32.mxu0 %vm647_vm0, %v7132_v15 }
0x1ea1   :  { %v8730_v16 = vld [vmem:[%s11483_s28] ss:$0 sm:$0xff] }
0x1ea3   :  { %v7208_v26 = vpop.f32.mrb[82].mxu1 }
0x1ea4   :  { %v9483_v29 = vpop.f32.mrb[83].mxu1  ;;  %9490 = vmatmul.mubr.msk.f32.gmra.mrb[64].mxu0 %vm647_vm0, %v7208_v26 }
0x1f6f   :  { %v9488_v31 = vpop.f32.mrb[62].mxu0 }
0x1f70   :  { %v7315_v7 = vadd.f32 %v9488_v31, %v10901_v36  ;;  %v7291_v32 = vpop.f32.mrb[63].mxu0 }
0x1f71   :  { %v7314_v33 = vadd.f32 %v7291_v32, %v10903_v37 }
0x1f72   :  { %v11284_v30 = vadd.f32 %v8729_v5, %v7315_v7  ;;  %v8731_v7 = vld [vmem:[%s11484_s1] ss:$0 sm:$0xff] }
0x1f73   :  { %v11286_v34 = vadd.f32 %v8729_v5, %v7314_v33 }
0x1f74   :  { %v7334_v35 = vsel %vm461_vm14, %v11284_v30, 0.0 }
0x1f75   :  { %7335 = vadd.xlane.f32.xlu1 %v7334_v35  ;;  %v7331_v38 = vsel %vm461_vm14, %v11286_v34, 0.0 }
0x1f76   :  { %7332 = vadd.xlane.f32.xlu0 %v7331_v38 }
0x1f77   :  { %v9491_v40 = vpop.f32.mrb[64].mxu0 }
0x1f78   :  { %v7301_v43 = vpop.f32.mrb[65].mxu0  ;;  %v7317_v57 = vadd.f32 %v9491_v40, %v10911_v22 }
0x1f79   :  { %v7316_v36 = vadd.f32 %v7301_v43, %v10913_v6 }
0x1f7a   :  { %v11296_v37 = vadd.f32 %v8729_v5, %v7317_v57 }
0x1f7b   :  { %v11294_v1 = vadd.f32 %v8729_v5, %v7316_v36 }
0x1f7c   :  { %v7340_v41 = vsel %vm461_vm14, %v11296_v37, 0.0 }
0x1f7d   :  { %v7337_v39 = vsel %vm461_vm14, %v11294_v1, 0.0 }
0x1f7e   :  { %7338 = vadd.xlane.f32.xlu0 %v7337_v39 }
0x1f82   :  { %7341 = vadd.xlane.f32.xlu0 %v7340_v41 }
0x2002   :  { %v7336_v62 = vpop.xlane.xlu1 %7335 }
0x2003   :  { %v7344_v10 = vmul.f32 0.03125, %v7336_v62  ;;  %v7333_v4 = vpop.xlane.xlu0 %7332 }
0x2004   :  { %v7343_v24 = vmul.f32 0.03125, %v7333_v4  ;;  %v7549_v4 = vld [vmem:[%s11482_s26 + $0x10] sm:$0xff] }
0x2005   :  { %v7348_v22 = vsub.f32 %v11284_v30, %v7344_v10 }
0x2006   :  { %v7347_v6 = vsub.f32 %v11286_v34, %v7343_v24  ;;  %v7550_v24 = vld [vmem:[%s11482_s26 + $0x18] sm:$0xff] }
0x2007   :  { %v7352_v27 = vmul.f32 %v7348_v22, %v7348_v22 }
0x2008   :  { %v7351_v28 = vmul.f32 %v7347_v6, %v7347_v6 }
0x2009   :  { %v7358_v45 = vsel %vm461_vm14, %v7352_v27, 0.0  ;;  %v7552_v27 = vld [vmem:[%s11482_s26 + $0x28] sm:$0xff] }
0x200a   :  { %7359 = vadd.xlane.f32.xlu1 %v7358_v45  ;;  %v7355_v48 = vsel %vm461_vm14, %v7351_v28, 0.0  ;;  %v7553_v45 = vld [vmem:[%s11482_s26 + $0x30] sm:$0xff] }
0x200b   :  { %7356 = vadd.xlane.f32.xlu0 %v7355_v48  ;;  %v7339_v18 = vpop.xlane.xlu0 %7338  ;;  %v7554_v48 = vld [vmem:[%s11482_s26 + $0x38] sm:$0xff] }
0x200c   :  { %v7345_v49 = vmul.f32 0.03125, %v7339_v18  ;;  %v9705_v18 = vpack.c.bf16 %v7554_v48, %v7553_v45 }
0x200e   :  { %v7349_v52 = vsub.f32 %v11294_v1, %v7345_v49  ;;  %v7555_v49 = vld [vmem:[%s11482_s26 + $0x40] sm:$0xff] }
0x200f   :  { %v7342_v53 = vpop.xlane.xlu0 %7341 }
0x2010   :  { %v7346_v54 = vmul.f32 0.03125, %v7342_v53  ;;  %v7353_v55 = vmul.f32 %v7349_v52, %v7349_v52 }
0x2012   :  { %v7350_v44 = vsub.f32 %v11296_v37, %v7346_v54  ;;  %v7361_v56 = vsel %vm461_vm14, %v7353_v55, 0.0  ;;  %v7557_v54 = vld [vmem:[%s11482_s26 + $0x50] sm:$0xff]  ;;  %v7558_v55 = vld [vmem:[%s11482_s26 + $0x58] sm:$0xff] }
0x2013   :  { %7362 = vadd.xlane.f32.xlu0 %v7361_v56  ;;  %v7559_v56 = vld [vmem:[%s11482_s26 + $0x60] sm:$0xff] }
0x2014   :  { %v7354_v58 = vmul.f32 %v7350_v44, %v7350_v44 }
0x2016   :  { %v7364_v59 = vsel %vm461_vm14, %v7354_v58, 0.0  ;;  %v7560_v58 = vld [vmem:[%s11482_s26 + $0x68] sm:$0xff] }
0x2017   :  { %7365 = vadd.xlane.f32.xlu1 %v7364_v59  ;;  %v9717_v59 = vpack.c.bf16 %v7560_v58, %v7559_v56 }
0x2097   :  { %v7360_v51 = vpop.xlane.xlu1 %7359 }
0x2098   :  { %v7368_v13 = vmul.f32 0.03125, %v7360_v51  ;;  %v7357_v14 = vpop.xlane.xlu0 %7356 }
0x2099   :  { %v7367_v17 = vmul.f32 0.03125, %v7357_v14 }
0x209a   :  { %v7372_v12 = vadd.f32 1e-06, %v7368_v13 }
0x209b   :  { %v7371_v19 = vadd.f32 1e-06, %v7367_v17 }
0x209c   :  { %9991 = vrsqrt.f32 %v7372_v12 }
0x209d   :  { %9993 = vrsqrt.f32 %v7371_v19 }
0x20a0   :  { %v7363_v20 = vpop.xlane.xlu0 %7362 }
0x20a1   :  { %v7369_v21 = vmul.f32 0.03125, %v7363_v20 }
0x20a3   :  { %v7373_v23 = vadd.f32 1e-06, %v7369_v21 }
0x20a4   :  { %v7366_v60 = vpop.xlane.xlu1 %7365 }
0x20a5   :  { %9995 = vrsqrt.f32 %v7373_v23  ;;  %v7370_v25 = vmul.f32 0.03125, %v7366_v60 }
0x20a6   :  { %v9992_v15 = vpop.eup %9991 }
0x20a7   :  { %v9994_v26 = vpop.eup %9993  ;;  %v7380_v29 = vmul.f32 %v9992_v15, %v7348_v22  ;;  %v7374_v31 = vadd.f32 1e-06, %v7370_v25  ;;  %v9697_v22 = vpack.c.bf16 %v7550_v24, %v7549_v4 }
0x20a8   :  { %v7379_v5 = vmul.f32 %v9994_v26, %v7347_v6  ;;  %v7551_v6 = vld [vmem:[%s11482_s26 + $0x20] sm:$0xff] }
0x20a9   :  { %9997 = vrsqrt.f32 %v7374_v31  ;;  %v7390_v32 = vmul.f32 %v8730_v16, %v7380_v29  ;;  %9698 = vmatprep.subr.bf16.mxu0 %v9697_v22  ;;  %v9701_v28 = vpack.c.bf16 %v7552_v27, %v7551_v6 }
0x20aa   :  { %v7389_v33 = vmul.f32 %v8730_v16, %v7379_v5  ;;  %9700 = vmatpush3.bf16.msra.mxu0 %v9697_v22 }
0x20ab   :  { %v7400_v38 = vadd.f32 %v8731_v7, %v7390_v32  ;;  %9702 = vmatprep.subr.bf16.mxu0 %v9701_v28 }
0x20ac   :  { %v7399_v35 = vadd.f32 %v8731_v7, %v7389_v33 }
0x20ae   :  { %9500 = vmatprep.mubr.msk.f32.mxu1 %vm461_vm14, %v7399_v35  ;;  %9704 = vmatpush3.bf16.msra.mxu0 %v9701_v28 }
0x20af   :  { %v9996_v40 = vpop.eup %9995  ;;  %9501 = vmatmul.mubr.msk.f32.vlgmr.msra.gmra.mrb[84].mxu1 %vm461_vm14, %v7400_v38  ;;  %9706 = vmatprep.subr.bf16.mxu0 %v9705_v18 }
0x20b0   :  { %v7381_v43 = vmul.f32 %v9996_v40, %v7349_v52  ;;  %v7556_v52 = vld [vmem:[%s11482_s26 + $0x48] sm:$0xff] }
0x20b1   :  { %v9709_v53 = vpack.c.bf16 %v7556_v52, %v7555_v49 }
0x20b2   :  { %v7391_v57 = vmul.f32 %v8730_v16, %v7381_v43  ;;  %9708 = vmatpush3.bf16.msra.mxu0 %v9705_v18 }
0x20b3   :  { %v9998_v36 = vpop.eup %9997  ;;  %9710 = vmatprep.subr.bf16.mxu0 %v9709_v53 }
0x20b4   :  { %v7401_v39 = vadd.f32 %v8731_v7, %v7391_v57  ;;  %v7382_v41 = vmul.f32 %v9998_v36, %v7350_v44  ;;  %v9713_v44 = vpack.c.bf16 %v7558_v55, %v7557_v54  ;;  %v8737_v54 = vld [vmem:[%s11486_s10] ss:$0 sm:$0xff] }
0x20b6   :  { %9503 = vmatprep.mubr.msk.f32.mxu1 %vm461_vm14, %v7401_v39  ;;  %v7392_v62 = vmul.f32 %v8730_v16, %v7382_v41  ;;  %9712 = vmatpush3.bf16.msra.mxu0 %v9709_v53 }
0x20b7   :  { %9714 = vmatprep.subr.bf16.mxu0 %v9713_v44 }
0x20b8   :  { %v7402_v10 = vadd.f32 %v8731_v7, %v7392_v62 }
0x20ba   :  { %9504 = vmatmul.mubr.msk.f32.gmra.mrb[86].mxu1 %vm461_vm14, %v7402_v10  ;;  %9716 = vmatpush3.bf16.msra.mxu0 %v9713_v44 }
0x20bb   :  { %9552 = vmatprep.mubr.msk.f32.mxu1 %vm10120_vm15, %v10119_v47  ;;  %9718 = vmatprep.subr.bf16.mxu0 %v9717_v59 }
0x20be   :  { %9720 = vmatpush3.bf16.msra.mxu0 %v9717_v59 }
0x20bf   :  { %9722 = vmatprep.subr.bf16.mxu0 %v9721_v2 }
0x20c2   :  { %9724 = vmatpush3.bf16.msra.mxu0 %v9721_v2 }
0x2182   :  { %v9502_v9 = vpop.f32.mrb[84].mxu1 }
0x2183   :  { %v7498_v11 = vadd.f32 %v9502_v9, %v8732_v3  ;;  %v7492_v46 = vpop.f32.mrb[85].mxu1 }
0x2184   :  { %v7493_v8 = vadd.f32 %v8732_v3, %v7492_v46 }
0x2185   :  { %v7516_v50 = vmul.f32 0.044715, %v7498_v11  ;;  %v7512_v62 = vmul.f32 0.5, %v7498_v11 }
0x2186   :  { %v7515_v51 = vmul.f32 0.044715, %v7493_v8  ;;  %v7511_v39 = vmul.f32 0.5, %v7493_v8 }
0x2187   :  { %v7520_v13 = vmul.f32 %v7516_v50, %v7498_v11 }
0x2188   :  { %v7519_v14 = vmul.f32 %v7515_v51, %v7493_v8 }
0x2189   :  { %v7524_v17 = vmul.f32 %v7520_v13, %v7498_v11 }
0x218a   :  { %v7523_v12 = vmul.f32 %v7519_v14, %v7493_v8 }
0x218b   :  { %v7528_v19 = vadd.f32 %v7524_v17, %v7498_v11 }
0x218c   :  { %v7527_v20 = vadd.f32 %v7523_v12, %v7493_v8 }
0x218d   :  { %v7532_v21 = vmul.f32 0.7978846, %v7528_v19  ;;  %v9505_v23 = vpop.f32.mrb[86].mxu1 }
0x218e   :  { %v7508_v60 = vadd.f32 %v9505_v23, %v8732_v3  ;;  %v7502_v25 = vpop.f32.mrb[87].mxu1  ;;  %v7531_v15 = vmul.f32 0.7978846, %v7527_v20 }
0x218f   :  { %9999 = vtanh.f32 %v7532_v21  ;;  %v7503_v16 = vadd.f32 %v8732_v3, %v7502_v25 }
0x2190   :  { %v7518_v26 = vmul.f32 0.044715, %v7508_v60  ;;  %10001 = vtanh.f32 %v7531_v15  ;;  %v7514_v45 = vmul.f32 0.5, %v7508_v60 }
0x2191   :  { %v7517_v29 = vmul.f32 0.044715, %v7503_v16  ;;  %v7513_v27 = vmul.f32 0.5, %v7503_v16 }
0x2192   :  { %v7522_v31 = vmul.f32 %v7518_v26, %v7508_v60 }
0x2193   :  { %v7521_v5 = vmul.f32 %v7517_v29, %v7503_v16 }
0x2194   :  { %v7526_v7 = vmul.f32 %v7522_v31, %v7508_v60 }
0x2195   :  { %v7525_v32 = vmul.f32 %v7521_v5, %v7503_v16 }
0x2196   :  { %v7530_v33 = vadd.f32 %v7526_v7, %v7508_v60 }
0x2197   :  { %v7529_v35 = vadd.f32 %v7525_v32, %v7503_v16  ;;  %v7749_v32 = vld [vmem:[%s11487_s0] sm:$0xff] }
0x2198   :  { %v7534_v38 = vmul.f32 0.7978846, %v7530_v33  ;;  %v7750_v33 = vld [vmem:[%s11487_s0 + $0x8] sm:$0xff] }
0x2199   :  { %v10000_v40 = vpop.eup %9999  ;;  %v7533_v43 = vmul.f32 0.7978846, %v7529_v35  ;;  %v7751_v35 = vld [vmem:[%s11487_s0 + $0x10] sm:$0xff] }
0x219a   :  { %v10002_v57 = vpop.eup %10001  ;;  %v7540_v36 = vadd.f32 1.0, %v10000_v40  ;;  %10003 = vtanh.f32 %v7534_v38  ;;  %v9726_v38 = vpack.c.bf16 %v7750_v33, %v7749_v32  ;;  %v7752_v40 = vld [vmem:[%s11487_s0 + $0x18] sm:$0xff] }
0x219b   :  { %v7539_v41 = vadd.f32 1.0, %v10002_v57  ;;  %10005 = vtanh.f32 %v7533_v43  ;;  %v9729_v43 = vpack.c.bf16 %v7752_v40, %v7751_v35 }
0x219c   :  { %v7544_v4 = vmul.f32 %v7540_v36, %v7512_v62  ;;  %9727 = vmatpush3.bf16.msra.mxu1 %v9726_v38 }
0x219d   :  { %v7543_v10 = vmul.f32 %v7539_v41, %v7511_v39  ;;  %9728 = vmatprep.subr.bf16.mxu1 %v10118_v0 }
0x219f   :  { %9538 = vmatprep.mubr.f32.mxu0 %v7543_v10 }
0x21a0   :  { %9539 = vmatmul.mubr.f32.vlgmr.msra.gmra.mrb[76].mxu0 %v7544_v4  ;;  %9730 = vmatpush3.bf16.msra.mxu1 %v9729_v43 }
0x21a1   :  { %9731 = vmatprep.subr.bf16.mxu1 %v10118_v0 }
0x21a4   :  { %v10004_v24 = vpop.eup %10003 }
0x21a5   :  { %v10006_v22 = vpop.eup %10005  ;;  %v7542_v6 = vadd.f32 1.0, %v10004_v24 }
0x21a6   :  { %v7541_v28 = vadd.f32 1.0, %v10006_v22  ;;  %v8738_v22 = vld [vmem:[%s11488_s7] ss:$0 sm:$0xff] }
0x21a7   :  { %v7546_v18 = vmul.f32 %v7542_v6, %v7514_v45 }
0x21a8   :  { %v7545_v48 = vmul.f32 %v7541_v28, %v7513_v27 }
0x21aa   :  { %9541 = vmatprep.mubr.f32.mxu0 %v7545_v48 }
0x21ab   :  { %9542 = vmatmul.mubr.f32.gmra.mrb[78].mxu0 %v7546_v18 }
0x2273   :  { %v9540_v49 = vpop.f32.mrb[76].mxu0 }
0x2274   :  { %v7629_v52 = vpop.f32.mrb[77].mxu0  ;;  %v7649_v53 = vadd.f32 %v9540_v49, %v11284_v30 }
0x2275   :  { %v7648_v44 = vadd.f32 %v7629_v52, %v11286_v34  ;;  %v8739_v52 = vld [vmem:[%s11489_s11] ss:$0 sm:$0xff] }
0x2276   :  { %v7660_v55 = vadd.f32 %v8737_v54, %v7649_v53 }
0x2277   :  { %v7659_v2 = vadd.f32 %v8737_v54, %v7648_v44 }
0x2278   :  { %v7669_v63 = vrot.slane %v7660_v55, 7 }
0x227a   :  { %v7671_v30 = vsel %vm7670_vm2, %v7669_v63, %v7659_v2 }
0x227e   :  { %v9543_v56 = vpop.f32.mrb[78].mxu0 }
0x227f   :  { %v7651_v58 = vadd.f32 %v9543_v56, %v11296_v37  ;;  %v7639_v59 = vpop.f32.mrb[79].mxu0 }
0x2280   :  { %v7650_v61 = vadd.f32 %v7639_v59, %v11294_v1 }
0x2281   :  { %v7662_v3 = vadd.f32 %v8737_v54, %v7651_v58 }
0x2282   :  { %v7661_v9 = vadd.f32 %v8737_v54, %v7650_v61 }
0x2283   :  { %v7675_v46 = vrot.slane %v7662_v3, 5 }
0x2284   :  { %v7672_v11 = vrot.slane %v7661_v9, 6 }
0x2286   :  { %v7674_v34 = vsel %vm7673_vm3, %v7672_v11, %v7671_v30  ;;  %v7930_v30 = vld [vmem:[%s11490_s5 + $0x10] sm:$0xff] }
0x2287   :  { %v7677_v8 = vsel %vm7676_vm4, %v7675_v46, %v7674_v34  ;;  %v7931_v46 = vld [vmem:[%s11490_s5 + $0x18] sm:$0xff] }
0x2288   :  { %v7680_v37 = vsel %vm7679_vm5, %v7677_v8, 0.0  ;;  %v9735_v34 = vpack.c.bf16 %v7931_v46, %v7930_v30  ;;  %v10132_v8 = vmov 1983009808  }
0x2289   :  { %7681 = vadd.xlane.f32.xlu0 %v7680_v37  ;;  %v7839_v37 = vunpack.c.l.s4 %v10132_v8 }
0x2316   :  { %v7682_v1 = vpop.xlane.xlu0 %7681 }
0x2317   :  { %v7683_v50 = vmul.f32 0.03125, %v7682_v1  ;;  %v7840_v1 = vunpack.c.0.s8 %v7839_v37 }
0x2319   :  { %v7685_v51 = vrot.slane %v7683_v50, 1  ;;  %v7686_v13 = vrot.slane %v7683_v50, 2  ;;  %v7687_v14 = vrot.slane %v7683_v50, 3  ;;  %v7692_v17 = vsub.f32 %v7659_v2, %v7683_v50 }
0x231a   :  { %v11374_v50 = vsub.s32 %v7840_v1, %v10403_v42  ;;  %v8105_v1 = vld [vmem:[%s11493_s17] sm:$0xff] }
0x231b   :  { %v7693_v12 = vsub.f32 %v7660_v55, %v7685_v51  ;;  %v7694_v19 = vsub.f32 %v7661_v9, %v7686_v13  ;;  %v7695_v20 = vsub.f32 %v7662_v3, %v7687_v14  ;;  %v7696_v25 = vmul.f32 %v7692_v17, %v7692_v17  ;;  %v7928_v3 = vld [vmem:[%s11490_s5] sm:$0xff]  ;;  %v7929_v9 = vld [vmem:[%s11490_s5 + $0x8] sm:$0xff] }
0x231c   :  { %v9732_v11 = vpack.c.bf16 %v7929_v9, %v7928_v3 }
0x231d   :  { %v7697_v21 = vmul.f32 %v7693_v12, %v7693_v12  ;;  %v7698_v23 = vmul.f32 %v7694_v19, %v7694_v19  ;;  %v7699_v60 = vmul.f32 %v7695_v20, %v7695_v20 }
0x231f   :  { %v7704_v15 = vrot.slane %v7697_v21, 7  ;;  %v7706_v16 = vrot.slane %v7698_v23, 6  ;;  %v7708_v29 = vrot.slane %v7699_v60, 5 }
0x2321   :  { %v7705_v26 = vsel %vm7670_vm2, %v7704_v15, %v7696_v25 }
0x2322   :  { %v7707_v31 = vsel %vm7673_vm3, %v7706_v16, %v7705_v26 }
0x2323   :  { %v7709_v5 = vsel %vm7676_vm4, %v7708_v29, %v7707_v31 }
0x2324   :  { %v7711_v7 = vsel %vm7679_vm5, %v7709_v5, 0.0 }
0x2325   :  { %7712 = vadd.xlane.f32.xlu1 %v7711_v7 }
0x23b2   :  { %v7713_v57 = vpop.xlane.xlu1 %7712 }
0x23b3   :  { %v7714_v36 = vmul.f32 0.03125, %v7713_v57 }
0x23b5   :  { %v7715_v39 = vadd.f32 1e-06, %v7714_v36 }
0x23b7   :  { %10007 = vrsqrt.f32 %v7715_v39 }
0x23c1   :  { %v10008_v41 = vpop.eup %10007 }
0x23c2   :  { %v7718_v62 = vrot.slane %v10008_v41, 1  ;;  %v7719_v10 = vrot.slane %v10008_v41, 2  ;;  %v7720_v4 = vrot.slane %v10008_v41, 3  ;;  %v7725_v24 = vmul.f32 %v10008_v41, %v7692_v17 }
0x23c4   :  { %v7726_v6 = vmul.f32 %v7718_v62, %v7693_v12  ;;  %v7727_v27 = vmul.f32 %v7719_v10, %v7694_v19  ;;  %v7728_v28 = vmul.f32 %v7720_v4, %v7695_v20  ;;  %v7735_v45 = vmul.f32 %v8738_v22, %v7725_v24 }
0x23c6   :  { %v7736_v48 = vmul.f32 %v8738_v22, %v7726_v6  ;;  %v7737_v18 = vmul.f32 %v8738_v22, %v7727_v27  ;;  %v7738_v49 = vmul.f32 %v8738_v22, %v7728_v28  ;;  %v7745_v44 = vadd.f32 %v8739_v52, %v7735_v45 }
0x23c8   :  { %v7746_v53 = vadd.f32 %v8739_v52, %v7736_v48  ;;  %v7747_v54 = vadd.f32 %v8739_v52, %v7737_v18  ;;  %v7748_v55 = vadd.f32 %v8739_v52, %v7738_v49 }
0x23ca   :  { %v7757_v56 = vrot.slane %v7746_v53, 7  ;;  %v7759_v58 = vrot.slane %v7747_v54, 6  ;;  %v7761_v61 = vrot.slane %v7748_v55, 5  ;;  %v8741_v53 = vld [vmem:[%s11491_s9] ss:$0 sm:$0xff] }
0x23cb   :  { %v8742_v54 = vld [vmem:[%s11492_s13] ss:$0 sm:$0xff]  ;;  %v7903_v55 = vrot.slane %v8741_v53, %v11374_v50 }
0x23cc   :  { %v7758_v59 = vsel %vm7670_vm2, %v7757_v56, %v7745_v44  ;;  %v7920_v44 = vrot.slane %v8742_v54, %v11374_v50 }
0x23cd   :  { %v7760_v63 = vsel %vm7673_vm3, %v7759_v58, %v7758_v59  ;;  %v7904_v59 = vcombine.high %v7903_v55, %v7903_v55 }
0x23ce   :  { %v7762_v2 = vsel %vm7676_vm4, %v7761_v61, %v7760_v63  ;;  %v7921_v3 = vcombine.high %v7920_v44, %v7920_v44 }
0x23cf   :  { %9553 = vmatmul.mubr.msk.f32.vlgmr.msra.gmra.mrb[88].mxu1 %vm461_vm14, %v7762_v2 }
0x23d0   :  { %9563 = vmatprep.mubr.msk.f32.mxu1 %vm10120_vm15, %v10119_v47  ;;  %9733 = vmatpush3.bf16.msra.mxu1 %v9732_v11 }
0x23d1   :  { %9734 = vmatprep.subr.bf16.mxu1 %v10118_v0 }
0x23d4   :  { %9736 = vmatpush3.bf16.msra.mxu1 %v9735_v34 }
0x23d5   :  { %9737 = vmatprep.subr.bf16.mxu1 %v10118_v0 }
0x24a2   :  { %v7831_v51 = vpop.f32.mrb[88].mxu1 }
0x24a3   :  { %v7844_v13 = vrot.slane %v7831_v51, %v11374_v50  ;;  %v9554_v14 = vpop.f32.mrb[89].mxu1  ;;  %v8106_v51 = vld [vmem:[%s11493_s17 + $0x8] sm:$0xff] }
0x24a4   :  { %v8107_v14 = vld [vmem:[%s11493_s17 + $0x10] sm:$0xff] }
0x24a5   :  { %v7845_v17 = vcombine.high %v7844_v13, %v7844_v13  ;;  %v7849_v12 = vsel %vm7848_vm7, %v7844_v13, 0.0 }
0x24a6   :  { %v7850_v19 = vrot.slane %v7849_v12, 4 }
0x24a7   :  { %v7856_v20 = vsel %vm7848_vm7, %v7845_v17, 0.0 }
0x24a8   :  { %v7851_v21 = vadd.f32 %v7850_v19, %v7849_v12  ;;  %v7857_v23 = vrot.slane %v7856_v20, 4 }
0x24aa   :  { %v7852_v60 = vrot.slane %v7851_v21, 2  ;;  %v7858_v25 = vadd.f32 %v7857_v23, %v7856_v20 }
0x24ac   :  { %v7853_v15 = vadd.f32 %v7852_v60, %v7851_v21  ;;  %v7859_v16 = vrot.slane %v7858_v25, 2 }
0x24ae   :  { %v7854_v26 = vrot.slane %v7853_v15, 1  ;;  %v7860_v42 = vadd.f32 %v7859_v16, %v7858_v25 }
0x24b0   :  { %v7855_v29 = vadd.f32 %v7854_v26, %v7853_v15  ;;  %v7861_v31 = vrot.slane %v7860_v42, 1 }
0x24b2   :  { %v7862_v5 = vadd.f32 %v7861_v31, %v7860_v42  ;;  %v7864_v7 = vmul.f32 0.5, %v7855_v29 }
0x24b4   :  { %v7865_v32 = vmul.f32 0.5, %v7862_v5  ;;  %v7866_v33 = vsub.f32 %v7844_v13, %v7864_v7  ;;  %v9738_v13 = vpack.c.bf16 %v8106_v51, %v8105_v1 }
0x24b6   :  { %v7867_v35 = vsub.f32 %v7845_v17, %v7865_v32  ;;  %v7868_v38 = vmul.f32 %v7866_v33, %v7866_v33  ;;  %v8108_v17 = vld [vmem:[%s11493_s17 + $0x18] sm:$0xff] }
0x24b7   :  { %v9741_v12 = vpack.c.bf16 %v8108_v17, %v8107_v14  ;;  %v8245_v17 = vld [vmem:[%s11496_s29] sm:$0xff] }
0x24b8   :  { %v7869_v40 = vmul.f32 %v7867_v35, %v7867_v35  ;;  %v7870_v43 = vsel %vm7848_vm7, %v7868_v38, 0.0 }
0x24b9   :  { %v7871_v57 = vrot.slane %v7870_v43, 4 }
0x24ba   :  { %v7877_v36 = vsel %vm7848_vm7, %v7869_v40, 0.0 }
0x24bb   :  { %v7872_v39 = vadd.f32 %v7871_v57, %v7870_v43  ;;  %v7878_v41 = vrot.slane %v7877_v36, 4 }
0x24bd   :  { %v7873_v62 = vrot.slane %v7872_v39, 2  ;;  %v7879_v10 = vadd.f32 %v7878_v41, %v7877_v36 }
0x24bf   :  { %v7874_v4 = vadd.f32 %v7873_v62, %v7872_v39  ;;  %v7880_v24 = vrot.slane %v7879_v10, 2 }
0x24c1   :  { %v7875_v22 = vrot.slane %v7874_v4, 1  ;;  %v7881_v6 = vadd.f32 %v7880_v24, %v7879_v10 }
0x24c3   :  { %v7876_v27 = vadd.f32 %v7875_v22, %v7874_v4  ;;  %v7882_v28 = vrot.slane %v7881_v6, 1 }
0x24c5   :  { %v7883_v45 = vadd.f32 %v7882_v28, %v7881_v6  ;;  %v7884_v48 = vmul.f32 0.5, %v7876_v27 }
0x24c7   :  { %v7885_v18 = vmul.f32 0.5, %v7883_v45  ;;  %v7886_v49 = vadd.f32 1e-05, %v7884_v48 }
0x24c9   :  { %v7887_v52 = vadd.f32 1e-05, %v7885_v18  ;;  %10009 = vrsqrt.f32 %v7886_v49 }
0x24cb   :  { %10011 = vrsqrt.f32 %v7887_v52 }
0x24d3   :  { %v10010_v56 = vpop.eup %10009 }
0x24d4   :  { %v7890_v58 = vmul.f32 %v10010_v56, %v7866_v33  ;;  %v8744_v56 = vld [vmem:[%s11494_s21] ss:$0 sm:$0xff] }
0x24d5   :  { %v10012_v61 = vpop.eup %10011 }
0x24d6   :  { %v7891_v63 = vmul.f32 %v10012_v61, %v7867_v35  ;;  %v7907_v2 = vmul.f32 %v7903_v55, %v7890_v58  ;;  %v8745_v58 = vld [vmem:[%s11495_s25] ss:$0 sm:$0xff] }
0x24d7   :  { %v8097_v61 = vrot.slane %v8745_v58, %v11374_v50 }
0x24d8   :  { %v7908_v9 = vmul.f32 %v7904_v59, %v7891_v63  ;;  %v7924_v11 = vadd.f32 %v7920_v44, %v7907_v2  ;;  %v8080_v59 = vrot.slane %v8744_v56, %v11374_v50 }
0x24da   :  { %v7925_v30 = vadd.f32 %v7921_v3, %v7908_v9  ;;  %v7926_v46 = vmax.f32 %v7924_v11, 0.0  ;;  %v8081_v3 = vcombine.high %v8080_v59, %v8080_v59 }
0x24dc   :  { %v7927_v34 = vmax.f32 %v7925_v30, 0.0 }
0x24de   :  { %v7934_v8 = vcombine.low %v7926_v46, %v7927_v34  ;;  %v8098_v46 = vcombine.high %v8097_v61, %v8097_v61 }
0x24e0   :  { %v7941_v37 = vrot.slane %v7934_v8, %v11374_v50 }
0x24e2   :  { %9564 = vmatmul.mubr.msk.f32.vlgmr.msra.gmra.mrb[90].mxu1 %vm461_vm14, %v7941_v37 }
0x24e3   :  { %9574 = vmatprep.mubr.msk.f32.mxu1 %vm10120_vm15, %v10119_v47  ;;  %9739 = vmatpush3.bf16.msra.mxu1 %v9738_v13 }
0x24e4   :  { %9740 = vmatprep.subr.bf16.mxu1 %v10118_v0 }
0x24e7   :  { %9742 = vmatpush3.bf16.msra.mxu1 %v9741_v12  ;;  %v8246_v12 = vld [vmem:[%s11496_s29 + $0x8] sm:$0xff] }
0x24e8   :  { %9743 = vmatprep.subr.bf16.mxu1 %v10118_v0 }
0x25b5   :  { %v8010_v19 = vpop.f32.mrb[90].mxu1 }
0x25b6   :  { %v8023_v20 = vrot.slane %v8010_v19, %v11374_v50  ;;  %v9565_v21 = vpop.f32.mrb[91].mxu1  ;;  %v9744_v19 = vpack.c.bf16 %v8246_v12, %v8245_v17 }
0x25b8   :  { %v8024_v23 = vcombine.high %v8023_v20, %v8023_v20  ;;  %v8027_v60 = vsel %vm7848_vm7, %v8023_v20, 0.0 }
0x25b9   :  { %v8028_v25 = vrot.slane %v8027_v60, 4 }
0x25ba   :  { %v8034_v15 = vsel %vm7848_vm7, %v8024_v23, 0.0 }
0x25bb   :  { %v8029_v16 = vadd.f32 %v8028_v25, %v8027_v60  ;;  %v8035_v26 = vrot.slane %v8034_v15, 4 }
0x25bd   :  { %v8030_v42 = vrot.slane %v8029_v16, 2  ;;  %v8036_v29 = vadd.f32 %v8035_v26, %v8034_v15 }
0x25bf   :  { %v8031_v31 = vadd.f32 %v8030_v42, %v8029_v16  ;;  %v8037_v5 = vrot.slane %v8036_v29, 2 }
0x25c1   :  { %v8032_v7 = vrot.slane %v8031_v31, 1  ;;  %v8038_v32 = vadd.f32 %v8037_v5, %v8036_v29 }
0x25c3   :  { %v8033_v33 = vadd.f32 %v8032_v7, %v8031_v31  ;;  %v8039_v0 = vrot.slane %v8038_v32, 1 }
0x25c5   :  { %v8040_v35 = vadd.f32 %v8039_v0, %v8038_v32  ;;  %v8041_v38 = vmul.f32 0.5, %v8033_v33 }
0x25c7   :  { %v8042_v40 = vmul.f32 0.5, %v8040_v35  ;;  %v8043_v43 = vsub.f32 %v8023_v20, %v8041_v38 }
0x25c9   :  { %v8044_v57 = vsub.f32 %v8024_v23, %v8042_v40  ;;  %v8045_v36 = vmul.f32 %v8043_v43, %v8043_v43 }
0x25cb   :  { %v8046_v39 = vmul.f32 %v8044_v57, %v8044_v57  ;;  %v8047_v41 = vsel %vm7848_vm7, %v8045_v36, 0.0 }
0x25cc   :  { %v8048_v62 = vrot.slane %v8047_v41, 4 }
0x25cd   :  { %v8054_v10 = vsel %vm7848_vm7, %v8046_v39, 0.0 }
0x25ce   :  { %v8049_v4 = vadd.f32 %v8048_v62, %v8047_v41  ;;  %v8055_v24 = vrot.slane %v8054_v10, 4 }
0x25d0   :  { %v8050_v22 = vrot.slane %v8049_v4, 2  ;;  %v8056_v6 = vadd.f32 %v8055_v24, %v8054_v10 }
0x25d2   :  { %v8051_v27 = vadd.f32 %v8050_v22, %v8049_v4  ;;  %v8057_v28 = vrot.slane %v8056_v6, 2 }
0x25d4   :  { %v8052_v45 = vrot.slane %v8051_v27, 1  ;;  %v8058_v48 = vadd.f32 %v8057_v28, %v8056_v6 }
0x25d6   :  { %v8053_v18 = vadd.f32 %v8052_v45, %v8051_v27  ;;  %v8059_v49 = vrot.slane %v8058_v48, 1 }
0x25d8   :  { %v8060_v52 = vadd.f32 %v8059_v49, %v8058_v48  ;;  %v8061_v53 = vmul.f32 0.5, %v8053_v18 }
0x25da   :  { %v8062_v54 = vmul.f32 0.5, %v8060_v52  ;;  %v8063_v55 = vadd.f32 1e-05, %v8061_v53 }
0x25dc   :  { %v8064_v44 = vadd.f32 1e-05, %v8062_v54  ;;  %10013 = vrsqrt.f32 %v8063_v55 }
0x25de   :  { %10015 = vrsqrt.f32 %v8064_v44 }
0x25e6   :  { %v10014_v63 = vpop.eup %10013 }
0x25e7   :  { %v8067_v2 = vmul.f32 %v10014_v63, %v8043_v43 }
0x25e8   :  { %v10016_v9 = vpop.eup %10015 }
0x25e9   :  { %v8068_v11 = vmul.f32 %v10016_v9, %v8044_v57  ;;  %v8084_v30 = vmul.f32 %v8080_v59, %v8067_v2  ;;  %v8421_v9 = vld [vmem:[%s10345_s4] sm:$0xff]  ;;  %s11497_s4 = sld [smem:[#allocation33_spill]] }
0x25eb   :  { %v8085_v34 = vmul.f32 %v8081_v3, %v8068_v11  ;;  %v8101_v8 = vadd.f32 %v8097_v61, %v8084_v30 }
0x25ed   :  { %v8102_v37 = vadd.f32 %v8098_v46, %v8085_v34  ;;  %v8103_v1 = vmax.f32 %v8101_v8, 0.0 }
0x25ef   :  { %v8104_v51 = vmax.f32 %v8102_v37, 0.0 }
0x25f1   :  { %v8111_v13 = vcombine.low %v8103_v1, %v8104_v51 }
0x25f3   :  { %v8118_v14 = vrot.slane %v8111_v13, %v11374_v50 }
0x25f5   :  { %9575 = vmatmul.mubr.msk.f32.vlgmr.msra.gmra.mrb[92].mxu1 %vm461_vm14, %v8118_v14 }
0x25f6   :  { %9581 = vmatprep.mubr.msk.f32.mxu1 %vm10120_vm15, %v10119_v47  ;;  %9745 = vmatpush3.bf16.msra.mxu1 %v9744_v19 }
0x25f7   :  { %9584 = vmatprep.subr.mxu1 %v10119_v47 }
0x26c8   :  { %v8187_v20 = vpop.f32.mrb[92].mxu1 }
0x26c9   :  { %v8198_v21 = vrot.slane %v8187_v20, %v11374_v50  ;;  %v9576_v23 = vpop.f32.mrb[93].mxu1 }
0x26cb   :  { %v8199_v60 = vcombine.high %v8198_v21, %v8198_v21  ;;  %v8203_v25 = vsel %vm8202_vm8, %v8198_v21, 0.0 }
0x26cc   :  { %v8204_v15 = vrot.slane %v8203_v25, 4 }
0x26cd   :  { %v8210_v16 = vsel %vm8202_vm8, %v8199_v60, 0.0 }
0x26ce   :  { %v8205_v26 = vadd.f32 %v8204_v15, %v8203_v25  ;;  %v8211_v42 = vrot.slane %v8210_v16, 4 }
0x26d0   :  { %v8206_v29 = vrot.slane %v8205_v26, 2  ;;  %v8212_v31 = vadd.f32 %v8211_v42, %v8210_v16 }
0x26d2   :  { %v8207_v5 = vadd.f32 %v8206_v29, %v8205_v26  ;;  %v8213_v7 = vrot.slane %v8212_v31, 2 }
0x26d4   :  { %v8208_v32 = vrot.slane %v8207_v5, 1  ;;  %v8214_v33 = vadd.f32 %v8213_v7, %v8212_v31 }
0x26d6   :  { %v8209_v0 = vadd.f32 %v8208_v32, %v8207_v5  ;;  %v8215_v35 = vrot.slane %v8214_v33, 1 }
0x26d8   :  { %v8216_v38 = vadd.f32 %v8215_v35, %v8214_v33  ;;  %v8217_v40 = vmul.f32 0.5, %v8209_v0 }
0x26da   :  { %v8218_v43 = vmul.f32 0.5, %v8216_v38  ;;  %v8219_v57 = vsub.f32 %v8198_v21, %v8217_v40 }
0x26dc   :  { %v8220_v36 = vsub.f32 %v8199_v60, %v8218_v43  ;;  %v8221_v39 = vmul.f32 %v8219_v57, %v8219_v57 }
0x26de   :  { %v8222_v41 = vmul.f32 %v8220_v36, %v8220_v36  ;;  %v8223_v62 = vsel %vm8202_vm8, %v8221_v39, 0.0 }
0x26df   :  { %v8224_v10 = vrot.slane %v8223_v62, 4 }
0x26e0   :  { %v8230_v4 = vsel %vm8202_vm8, %v8222_v41, 0.0 }
0x26e1   :  { %v8225_v24 = vadd.f32 %v8224_v10, %v8223_v62  ;;  %v8231_v22 = vrot.slane %v8230_v4, 4 }
0x26e3   :  { %v8226_v6 = vrot.slane %v8225_v24, 2  ;;  %v8232_v27 = vadd.f32 %v8231_v22, %v8230_v4  ;;  %v8748_v22 = vld [vmem:[%s11497_s4] ss:$0 sm:$0xff] }
0x26e5   :  { %v8227_v28 = vadd.f32 %v8226_v6, %v8225_v24  ;;  %v8233_v45 = vrot.slane %v8232_v27, 2  ;;  %v8749_v6 = vld [vmem:[#allocation2] ss:$0 sm:$0xff] }
0x26e7   :  { %v8228_v48 = vrot.slane %v8227_v28, 1  ;;  %v8234_v18 = vadd.f32 %v8233_v45, %v8232_v27  ;;  %v8396_v27 = vrot.slane %v8748_v22, %v11374_v50 }
0x26e9   :  { %v8229_v49 = vadd.f32 %v8228_v48, %v8227_v28  ;;  %v8235_v52 = vrot.slane %v8234_v18, 1  ;;  %v8413_v28 = vrot.slane %v8749_v6, %v11374_v50 }
0x26eb   :  { %v8236_v53 = vadd.f32 %v8235_v52, %v8234_v18  ;;  %v8237_v54 = vmul.f32 0.5, %v8229_v49  ;;  %v8397_v18 = vcombine.high %v8396_v27, %v8396_v27 }
0x26ed   :  { %v8238_v55 = vmul.f32 0.5, %v8236_v53  ;;  %v8239_v44 = vadd.f32 1e-05, %v8237_v54  ;;  %v8414_v54 = vcombine.high %v8413_v28, %v8413_v28 }
0x26ef   :  { %v8240_v56 = vadd.f32 1e-05, %v8238_v55  ;;  %10017 = vrsqrt.f32 %v8239_v44 }
0x26f1   :  { %10019 = vrsqrt.f32 %v8240_v56 }
0x26f9   :  { %v10018_v58 = vpop.eup %10017 }
0x26fa   :  { %v8243_v61 = vmul.f32 %v10018_v58, %v8219_v57 }
0x26fb   :  { %v10020_v59 = vpop.eup %10019 }
0x26fc   :  { %v8244_v63 = vmul.f32 %v10020_v59, %v8220_v36 }
0x26fe   :  { %v8249_v2 = vcombine.low %v8243_v61, %v8244_v63 }
0x2700   :  { %v8256_v3 = vrot.slane %v8249_v2, %v11374_v50  ;;  %v8750_v2 = vld [vmem:[#allocation4] ss:$0 sm:$0xff] }
0x2702   :  { %9582 = vmatmul.mubr.msk.f32.vlgmr.msra.gmra.mrb[94].mxu1 %vm344_vm6, %v8256_v3  ;;  %8513 = vst.msk [vmem:[%s10355_s30] sm:$0xf] %vm8512_vm9, %v8256_v3  ;;  %vm8518_vm6 = vcmask 257152  }
0x2703   :  { %9586 = vmatprep.mubr.msk.f32.mxu1 %vm10120_vm15, %v10119_v47  ;;  %9585 = vmatpush3.msra.mxu1 %v8421_v9 }
0x27d5   :  { %v8325_v11 = vpop.f32.mrb[94].mxu1 }
0x27d6   :  { %v8338_v30 = vrot.slane %v8325_v11, %v11374_v50  ;;  %v9583_v46 = vpop.f32.mrb[95].mxu1 }
0x27d8   :  { %v8339_v34 = vcombine.high %v8338_v30, %v8338_v30  ;;  %v8343_v8 = vsel %vm8342_vm10, %v8338_v30, 0.0 }
0x27d9   :  { %v8344_v37 = vrot.slane %v8343_v8, 4 }
0x27da   :  { %v8350_v1 = vsel %vm8342_vm10, %v8339_v34, 0.0 }
0x27db   :  { %v8345_v51 = vadd.f32 %v8344_v37, %v8343_v8  ;;  %v8351_v13 = vrot.slane %v8350_v1, 4 }
0x27dd   :  { %v8346_v14 = vrot.slane %v8345_v51, 2  ;;  %v8352_v17 = vadd.f32 %v8351_v13, %v8350_v1 }
0x27df   :  { %v8347_v12 = vadd.f32 %v8346_v14, %v8345_v51  ;;  %v8353_v19 = vrot.slane %v8352_v17, 2 }
0x27e1   :  { %v8348_v47 = vrot.slane %v8347_v12, 1  ;;  %v8354_v20 = vadd.f32 %v8353_v19, %v8352_v17 }
0x27e3   :  { %v8349_v21 = vadd.f32 %v8348_v47, %v8347_v12  ;;  %v8355_v23 = vrot.slane %v8354_v20, 1 }
0x27e5   :  { %v8356_v60 = vadd.f32 %v8355_v23, %v8354_v20  ;;  %v8357_v25 = vmul.f32 0.5, %v8349_v21 }
0x27e7   :  { %v8358_v15 = vmul.f32 0.5, %v8356_v60  ;;  %v8359_v16 = vsub.f32 %v8338_v30, %v8357_v25 }
0x27e9   :  { %v8360_v26 = vsub.f32 %v8339_v34, %v8358_v15  ;;  %v8361_v42 = vmul.f32 %v8359_v16, %v8359_v16 }
0x27eb   :  { %v8362_v29 = vmul.f32 %v8360_v26, %v8360_v26  ;;  %v8363_v31 = vsel %vm8342_vm10, %v8361_v42, 0.0 }
0x27ec   :  { %v8364_v5 = vrot.slane %v8363_v31, 4 }
0x27ed   :  { %v8370_v7 = vsel %vm8342_vm10, %v8362_v29, 0.0 }
0x27ee   :  { %v8365_v32 = vadd.f32 %v8364_v5, %v8363_v31  ;;  %v8371_v33 = vrot.slane %v8370_v7, 4 }
0x27f0   :  { %v8366_v0 = vrot.slane %v8365_v32, 2  ;;  %v8372_v35 = vadd.f32 %v8371_v33, %v8370_v7 }
0x27f2   :  { %v8367_v38 = vadd.f32 %v8366_v0, %v8365_v32  ;;  %v8373_v40 = vrot.slane %v8372_v35, 2 }
0x27f4   :  { %v8368_v43 = vrot.slane %v8367_v38, 1  ;;  %v8374_v57 = vadd.f32 %v8373_v40, %v8372_v35 }
0x27f6   :  { %v8369_v36 = vadd.f32 %v8368_v43, %v8367_v38  ;;  %v8375_v39 = vrot.slane %v8374_v57, 1 }
0x27f8   :  { %v8376_v41 = vadd.f32 %v8375_v39, %v8374_v57  ;;  %v8377_v62 = vmul.f32 0.5, %v8369_v36 }
0x27fa   :  { %v8378_v10 = vmul.f32 0.5, %v8376_v41  ;;  %v8379_v4 = vadd.f32 1e-05, %v8377_v62 }
0x27fc   :  { %v8380_v24 = vadd.f32 1e-05, %v8378_v10  ;;  %10021 = vrsqrt.f32 %v8379_v4 }
0x27fe   :  { %10023 = vrsqrt.f32 %v8380_v24 }
0x2806   :  { %v10022_v45 = vpop.eup %10021 }
0x2807   :  { %v8383_v48 = vmul.f32 %v10022_v45, %v8359_v16 }
0x2808   :  { %v10024_v49 = vpop.eup %10023 }
0x2809   :  { %v8384_v52 = vmul.f32 %v10024_v49, %v8360_v26  ;;  %v8400_v53 = vmul.f32 %v8396_v27, %v8383_v48 }
0x280b   :  { %v8401_v55 = vmul.f32 %v8397_v18, %v8384_v52  ;;  %v8417_v44 = vadd.f32 %v8413_v28, %v8400_v53 }
0x280d   :  { %v8418_v56 = vadd.f32 %v8414_v54, %v8401_v55  ;;  %v8419_v58 = vmax.f32 %v8417_v44, 0.0 }
0x280f   :  { %v8420_v59 = vmax.f32 %v8418_v56, 0.0 }
0x2811   :  { %v8431_v61 = vcombine.low %v8419_v58, %v8420_v59 }
0x2813   :  { %v8438_v63 = vrot.slane %v8431_v61, %v11374_v50 }
0x2815   :  { %9587 = vmatmul.mubr.msk.f32.vlgmr.msra.gmra.mrb[96].mxu1 %vm647_vm0, %v8438_v63 }
0x28e8   :  { %v8507_v3 = vpop.f32.mrb[96].mxu1 }
0x28e9   :  { %v8508_v9 = vadd.f32 %v8750_v2, %v8507_v3  ;;  %v9588_v11 = vpop.f32.mrb[97].mxu1 }
0x28eb   :  { %8515 = vrot.lane.b32.xlu0 %v8508_v9, %s10133_s3 }
0x295d   :  { %v8516_v30 = vpop.permute.xlu0 %8515 }
0x295e   :  { %8519 = vst.msk [vmem:[%s10355_s30] sm:$0xf] %vm8518_vm6, %v8516_v30 }
0x295f   :  { %8524 = vsyncpa [#allocation3], 1 }
0x2960   :  { %8525 = vsyncpa [#allocation5], 1 }

</bundles_post_ra>
